<compile_context>
chip_gen: v7x
topology: tpu7x:2x2x1
jax: 0.10.0
libtpu: 0.0.40
codegen_flags: <defaults>
</compile_context>

<pallas_src>
import jax
import jax.numpy as jnp
from jax.experimental import pallas as pl
from jax.experimental.pallas import tpu as pltpu

EPS = 1e-5            # PyTorch BatchNorm1d default eps
BOTTLENECK = 1024     # PointNetfeat bottleneck_dim


# ---------------------------------------------------------------------------
# Parameter setup (deterministic, synthetic) + BatchNorm folding (plain JAX glue)
# ---------------------------------------------------------------------------
def _fold_bn(w, b, gamma, beta, mean, var):
  """Fold eval-mode BatchNorm1d into a preceding 1x1 conv / linear.

  w: (out, in) torch convention, b: (out,). Returns W_eff (in, out), b_eff (1, out).
  """
  s = gamma / jnp.sqrt(var + EPS)
  w_eff = (w * s[:, None]).T
  b_eff = (b - mean) * s + beta
  return w_eff.astype(jnp.float32), b_eff[None, :].astype(jnp.float32)


def init_params(key, cin=3, k=2):
  """Deterministically initialize all PointNetCls parameters and fold BN."""
  dims_conv = [(64, cin), (128, 64), (BOTTLENECK, 128)]   # conv1, conv2, conv3
  dims_fc = [(512, BOTTLENECK), (256, 512), (k, 256)]     # fc1, fc2, fc3 (head)

  keys = jax.random.split(key, 32)
  ki = iter(keys)

  def lin(kout, kin):
    w = jax.random.normal(next(ki), (kout, kin), jnp.float32) * 0.1
    b = jax.random.normal(next(ki), (kout,), jnp.float32) * 0.1
    return w, b

  def bn(c):
    gamma = 1.0 + 0.1 * jax.random.normal(next(ki), (c,), jnp.float32)
    beta = 0.1 * jax.random.normal(next(ki), (c,), jnp.float32)
    mean = 0.1 * jax.random.normal(next(ki), (c,), jnp.float32)
    var = jnp.abs(jax.random.normal(next(ki), (c,), jnp.float32)) + 0.5
    return gamma, beta, mean, var

  folded = {}
  # PointNetfeat: conv1+bn1, conv2+bn2, conv3+bn3
  for i, (co, cI) in enumerate(dims_conv, start=1):
    w, b = lin(co, cI)
    folded[f"w{i}"], folded[f"b{i}"] = _fold_bn(w, b, *bn(co))
  # Head: fc1+bn1, fc2+(dropout=id)+bn2, fc3 (no BN)
  for i, (co, cI) in enumerate(dims_fc[:2], start=1):
    w, b = lin(co, cI)
    folded[f"wf{i}"], folded[f"bf{i}"] = _fold_bn(w, b, *bn(co))
  w3, b3 = lin(*dims_fc[2])
  folded["wf3"] = w3.T.astype(jnp.float32)
  folded["bf3"] = b3[None, :].astype(jnp.float32)
  return folded


# ---------------------------------------------------------------------------
# Pallas kernel: Bt samples x Nt-point tile per grid step, online max over points
# ---------------------------------------------------------------------------
def _pointnet_kernel(x_ref, w1_ref, b1_ref, w2_ref, b2_ref, w3_ref, b3_ref,
                     wf1_ref, bf1_ref, wf2_ref, bf2_ref, wf3_ref, bf3_ref,
                     out_ref, g_ref):
  bt, nt, cin = x_ref.shape
  cmax = g_ref.shape[1]          # bottleneck dim (1024)
  p = pl.program_id(1)           # point-tile index (reduction axis, last in grid)

  # ---- per-point shared MLP on this (bt, nt) point tile --------------------
  # (B, N, Cin) block: leading-dim merge is free (no XLU relayout per step).
  xt = x_ref[...].reshape(bt * nt, cin)                  # (bt*nt, cin) f32

  # conv1 (+bn1) + relu: K=cin=3 contraction done on the VPU as unrolled FMAs
  # (the MXU contraction depth would be <3% utilized, and the VPU has slack).
  h = xt[:, 0:1] * w1_ref[0:1, :]
  for c in range(1, cin):
    h = h + xt[:, c:c + 1] * w1_ref[c:c + 1, :]
  h = jnp.maximum(h + b1_ref[...], 0.0)

  # conv2 (+bn2) + relu: bf16 MXU inputs, f32 accumulation
  h = jnp.dot(h.astype(jnp.bfloat16), w2_ref[...],
              preferred_element_type=jnp.float32) + b2_ref[...]
  h = jnp.maximum(h, 0.0)

  # conv3 (+bn3): bias hoisted past the max (added once in the head), no relu
  h = jnp.dot(h.astype(jnp.bfloat16), w3_ref[...],
              preferred_element_type=jnp.float32)

  # maskMax with mask=None -> plain max over points; online across point tiles
  tile_max = jnp.max(h.reshape(bt, nt, cmax), axis=1)    # (bt, cmax)

  @pl.when(p == 0)
  def _init():
    g_ref[...] = jnp.full((bt, cmax), -jnp.inf, dtype=jnp.float32)

  g_ref[...] = jnp.maximum(g_ref[...], tile_max)

  # ---- classifier head: once per batch block, on the last point tile -------
  @pl.when(p == pl.num_programs(1) - 1)
  def _head():
    g = (g_ref[...] + b3_ref[...]).astype(jnp.bfloat16)  # conv3 bias added here
    f = jnp.dot(g, wf1_ref[...],
                preferred_element_type=jnp.float32) + bf1_ref[...]
    f = jnp.maximum(f, 0.0)                              # fc1+bn1+relu
    f = jnp.dot(f.astype(jnp.bfloat16), wf2_ref[...],
                preferred_element_type=jnp.float32) + bf2_ref[...]
    f = jnp.maximum(f, 0.0)                              # fc2+dropout(id)+bn2+relu
    out = jnp.dot(f.astype(jnp.bfloat16), wf3_ref[...],
                  preferred_element_type=jnp.float32) + bf3_ref[...]
    out_ref[...] = out[None].astype(out_ref.dtype)       # (1, bt, kpad) lane-dense


# ---------------------------------------------------------------------------
# Generation-aware tiling heuristics
# ---------------------------------------------------------------------------
def _generation_config():
  try:
    kind = jax.devices()[0].device_kind.lower()
  except Exception:  # pragma: no cover - defensive
    kind = ""
  if "v5" in kind:
    # 16 MiB default scoped VMEM; 128x128 MXU gains little from M > ~1024
    return dict(rows=1024, vmem=32 << 20, split_batch=False)
  if "v6" in kind:
    # 128 MiB physical VMEM; larger M amortizes per-step overhead
    return dict(rows=4096, vmem=64 << 20, split_batch=False)
  # v7x and newer: 64 MiB physical per TC, 2 TensorCores/chip
  return dict(rows=2048, vmem=32 << 20, split_batch=True)


def _pick_point_tile(n_pad, target_rows):
  for cand in (512, 256, 128):
    if cand <= max(target_rows, 128) and n_pad % cand == 0:
      return cand
  return 128   # n_pad is always a multiple of 128 after wrapper padding


def _pick_block_batch(b, nt, target_rows, prefer_split):
  cap = max(1, target_rows // nt)
  divisors = [d for d in range(1, b + 1) if b % d == 0 and d <= cap] or [1]
  bt = max(divisors)
  if prefer_split and b // bt < 2:
    # v7x: guarantee >= 2 batch blocks so both TensorCores get work.
    split_ok = [d for d in divisors if b // d >= 2]
    if split_ok:
      bt = max(split_ok)
  return bt


# ---------------------------------------------------------------------------
# Wrapper
# ---------------------------------------------------------------------------
def pointnet_cls_forward(x_bcn, params):
  """x_bcn: (B, C_in, N) float32 (PyTorch layout). Returns (logits, trans, trans_feat)."""
  B, cin, N = x_bcn.shape
  k = params["wf3"].shape[1]
  kpad = max(128, ((k + 127) // 128) * 128)   # lane-dense padded logits width

  cfg = _generation_config()

  # Wrapper-side layout plumbing: one-time transpose to (B, N, Cin) and pad the
  # point axis to a multiple of 128 by duplicating the last point (the max pool
  # is invariant to duplicated points).
  x_bnc = jnp.transpose(x_bcn, (0, 2, 1)).astype(jnp.float32)
  n_pad = ((N + 127) // 128) * 128
  if n_pad != N:
    pad = jnp.broadcast_to(x_bnc[:, N - 1:N, :], (B, n_pad - N, cin))
    x_bnc = jnp.concatenate([x_bnc, pad], axis=1)

  nt = _pick_point_tile(n_pad, cfg["rows"])
  bt = _pick_block_batch(B, nt, cfg["rows"], cfg["split_batch"])
  assert B % bt == 0 and n_pad % nt == 0

  # Weight prep: bf16 for MXU inputs (f32 accumulation in-kernel); biases f32.
  # conv1 weight stays f32 (used on the VPU). fc3 is zero-padded to kpad lanes
  # so the output store is lane-dense.
  w1 = params["w1"]
  w2 = params["w2"].astype(jnp.bfloat16)
  w3 = params["w3"].astype(jnp.bfloat16)
  wf1 = params["wf1"].astype(jnp.bfloat16)
  wf2 = params["wf2"].astype(jnp.bfloat16)
  wf3 = (jnp.zeros((params["wf3"].shape[0], kpad), jnp.float32)
         .at[:, :k].set(params["wf3"])).astype(jnp.bfloat16)
  bf3 = jnp.zeros((1, kpad), jnp.float32).at[:, :k].set(params["bf3"])

  weights = [w1, params["b1"], w2, params["b2"], w3, params["b3"],
             wf1, params["bf1"], wf2, params["bf2"], wf3, bf3]

  # (pl.Buffered(1) on these constant-weight specs intentionally skipped; see
  # header comment.)
  def full_spec(arr):
    nd = arr.ndim
    return pl.BlockSpec(arr.shape, lambda i, p, _nd=nd: (0,) * _nd)

  in_specs = [pl.BlockSpec((bt, nt, cin), lambda i, p: (i, p, 0))]
  in_specs += [full_spec(w) for w in weights]

  weight_bytes = sum(int(w.size) * w.dtype.itemsize for w in weights)
  flops = (2 * B * n_pad * (cin * 64 + 64 * 128 + 128 * BOTTLENECK)
           + 2 * B * (BOTTLENECK * 512 + 512 * 256 + 256 * kpad))
  bytes_accessed = int(x_bnc.size) * 4 + weight_bytes + B * kpad * 4

  # Output is (B//bt, bt, kpad) so the block's trailing dims always equal the
  # full array dims (layout-legal for any bt, including bt=1 on v7x).
  out = pl.pallas_call(
      _pointnet_kernel,
      out_shape=jax.ShapeDtypeStruct((B // bt, bt, kpad), jnp.float32),
      grid_spec=pltpu.PrefetchScalarGridSpec(
          num_scalar_prefetch=0,
          grid=(B // bt, n_pad // nt),          # reduction (points) axis last
          in_specs=in_specs,
          out_specs=pl.BlockSpec((1, bt, kpad), lambda i, p: (i, 0, 0)),
          scratch_shapes=[pltpu.VMEM((bt, BOTTLENECK), jnp.float32)],
      ),
      compiler_params=pltpu.CompilerParams(
          dimension_semantics=("parallel", "arbitrary"),
          vmem_limit_bytes=cfg["vmem"]),
      cost_estimate=pl.CostEstimate(flops=flops, transcendentals=0,
                                    bytes_accessed=bytes_accessed),
  )(x_bnc, *weights)

  logits = out.reshape(B, kpad)[:, :k]
  # input_transform=False, feature_transform=False -> trans / trans_feat are None
  return logits, None, None


# ---------------------------------------------------------------------------
# Pure-JAX reference (same folded f32 params) for a correctness check
# ---------------------------------------------------------------------------
def ref_forward(x_bcn, P):
  x = jnp.transpose(x_bcn, (0, 2, 1))
  h = jax.nn.relu(x @ P["w1"] + P["b1"])
  h = jax.nn.relu(h @ P["w2"] + P["b2"])
  h = h @ P["w3"] + P["b3"]
  g = jnp.max(h, axis=1)                 # (B, 1024)  == maskMax(..., mask=None)
  f = jax.nn.relu(g @ P["wf1"] + P["bf1"])
  f = jax.nn.relu(f @ P["wf2"] + P["bf2"])
  return f @ P["wf3"] + P["bf3"]


if __name__ == "__main__":
  key = jax.random.PRNGKey(0)
  kp, kx1, kx2 = jax.random.split(key, 3)

  B, CIN, N, K = 2, 3, 128, 2   # batch, input channels, points, classes
  params = init_params(kp, cin=CIN, k=K)

  def check(x):
    logits, trans, trans_feat = pointnet_cls_forward(x, params)
    logits = jax.block_until_ready(logits)
    ref = ref_forward(x, params)
    assert logits.shape == ref.shape
    assert trans is None and trans_feat is None
    err = float(jnp.max(jnp.abs(logits - ref)))
    scale = float(jnp.max(jnp.abs(ref)))
    # bf16 matmul inputs (f32 accumulation) -> compare with scale-aware tolerance
    assert err <= 3e-2 * scale + 1e-3, (err, scale)

  # Main case (N a multiple of 128)
  x = jax.random.normal(kx1, (B, CIN, N), jnp.float32)
  check(x)

  # N not a multiple of 128 -> exercises the wrapper-side point padding path
  x_odd = jax.random.normal(kx2, (B, CIN, 200), jnp.float32)
  check(x_odd)

  print("KERNEL_OK")
</pallas_src>

<mosaic_0001>
module attributes {stable_mosaic.version = 11 : i64} {
  func.func @_pointnet_kernel(%arg0: i32, %arg1: i32, %arg2: memref<1x128x3xf32, #tpu.memory_space<vmem>>, %arg3: memref<3x64xf32, #tpu.memory_space<vmem>>, %arg4: memref<1x64xf32, #tpu.memory_space<vmem>>, %arg5: memref<64x128xbf16, #tpu.memory_space<vmem>>, %arg6: memref<1x128xf32, #tpu.memory_space<vmem>>, %arg7: memref<128x1024xbf16, #tpu.memory_space<vmem>>, %arg8: memref<1x1024xf32, #tpu.memory_space<vmem>>, %arg9: memref<1024x512xbf16, #tpu.memory_space<vmem>>, %arg10: memref<1x512xf32, #tpu.memory_space<vmem>>, %arg11: memref<512x256xbf16, #tpu.memory_space<vmem>>, %arg12: memref<1x256xf32, #tpu.memory_space<vmem>>, %arg13: memref<256x128xbf16, #tpu.memory_space<vmem>>, %arg14: memref<1x128xf32, #tpu.memory_space<vmem>>, %arg15: memref<1x1x128xf32, #tpu.memory_space<vmem>>, %arg16: memref<1x1024xf32, #tpu.memory_space<vmem>>) attributes {dimension_semantics = [#tpu.dimension_semantics<parallel>, #tpu.dimension_semantics<arbitrary>], iteration_bounds = array<i64: 2, 1>, scalar_prefetch = 0 : i64, scratch_operands = 1 : i64, tpu.core_type = #tpu.core_type<tc>, window_params = [{transform_indices = @transform_0, window_bounds = array<i64: 1, 128, 3>}, {pipeline_mode = #tpu.pipeline_mode<synchronous>, transform_indices = @transform_1, window_bounds = array<i64: 3, 64>}, {pipeline_mode = #tpu.pipeline_mode<synchronous>, transform_indices = @transform_2, window_bounds = array<i64: 1, 64>}, {pipeline_mode = #tpu.pipeline_mode<synchronous>, transform_indices = @transform_3, window_bounds = array<i64: 64, 128>}, {pipeline_mode = #tpu.pipeline_mode<synchronous>, transform_indices = @transform_4, window_bounds = array<i64: 1, 128>}, {pipeline_mode = #tpu.pipeline_mode<synchronous>, transform_indices = @transform_5, window_bounds = array<i64: 128, 1024>}, {pipeline_mode = #tpu.pipeline_mode<synchronous>, transform_indices = @transform_6, window_bounds = array<i64: 1, 1024>}, {pipeline_mode = #tpu.pipeline_mode<synchronous>, transform_indices = @transform_7, window_bounds = array<i64: 1024, 512>}, {pipeline_mode = #tpu.pipeline_mode<synchronous>, transform_indices = @transform_8, window_bounds = array<i64: 1, 512>}, {pipeline_mode = #tpu.pipeline_mode<synchronous>, transform_indices = @transform_9, window_bounds = array<i64: 512, 256>}, {pipeline_mode = #tpu.pipeline_mode<synchronous>, transform_indices = @transform_10, window_bounds = array<i64: 1, 256>}, {pipeline_mode = #tpu.pipeline_mode<synchronous>, transform_indices = @transform_11, window_bounds = array<i64: 256, 128>}, {pipeline_mode = #tpu.pipeline_mode<synchronous>, transform_indices = @transform_12, window_bounds = array<i64: 1, 128>}, {transform_indices = @transform_13, window_bounds = array<i64: 1, 1, 128>}]} {
    %c0 = arith.constant 0 : index
    %c0_0 = arith.constant 0 : index
    %c0_1 = arith.constant 0 : index
    %0 = vector.load %arg2[%c0, %c0_0, %c0_1] : memref<1x128x3xf32, #tpu.memory_space<vmem>>, vector<1x128x3xf32>
    %1 = vector.shape_cast %0 : vector<1x128x3xf32> to vector<128x3xf32>
    %2 = vector.extract_strided_slice %1 {offsets = [0, 0], sizes = [128, 1], strides = [1, 1]} : vector<128x3xf32> to vector<128x1xf32>
    %c0_2 = arith.constant 0 : index
    %c0_3 = arith.constant 0 : index
    %3 = vector.load %arg3[%c0_2, %c0_3] : memref<3x64xf32, #tpu.memory_space<vmem>>, vector<1x64xf32>
    %4 = vector.broadcast %2 : vector<128x1xf32> to vector<128x64xf32>
    %5 = vector.broadcast %3 : vector<1x64xf32> to vector<128x64xf32>
    %6 = arith.mulf %4, %5 : vector<128x64xf32>
    %7 = vector.extract_strided_slice %1 {offsets = [0, 1], sizes = [128, 1], strides = [1, 1]} : vector<128x3xf32> to vector<128x1xf32>
    %c1 = arith.constant 1 : index
    %c0_4 = arith.constant 0 : index
    %8 = vector.load %arg3[%c1, %c0_4] : memref<3x64xf32, #tpu.memory_space<vmem>>, vector<1x64xf32>
    %9 = vector.broadcast %7 : vector<128x1xf32> to vector<128x64xf32>
    %10 = vector.broadcast %8 : vector<1x64xf32> to vector<128x64xf32>
    %11 = arith.mulf %9, %10 : vector<128x64xf32>
    %12 = arith.addf %6, %11 : vector<128x64xf32>
    %13 = vector.extract_strided_slice %1 {offsets = [0, 2], sizes = [128, 1], strides = [1, 1]} : vector<128x3xf32> to vector<128x1xf32>
    %c2 = arith.constant 2 : index
    %c0_5 = arith.constant 0 : index
    %14 = vector.load %arg3[%c2, %c0_5] : memref<3x64xf32, #tpu.memory_space<vmem>>, vector<1x64xf32>
    %15 = vector.broadcast %13 : vector<128x1xf32> to vector<128x64xf32>
    %16 = vector.broadcast %14 : vector<1x64xf32> to vector<128x64xf32>
    %17 = arith.mulf %15, %16 : vector<128x64xf32>
    %18 = arith.addf %12, %17 : vector<128x64xf32>
    %c0_6 = arith.constant 0 : index
    %c0_7 = arith.constant 0 : index
    %19 = vector.load %arg4[%c0_6, %c0_7] : memref<1x64xf32, #tpu.memory_space<vmem>>, vector<1x64xf32>
    %20 = vector.broadcast %19 : vector<1x64xf32> to vector<128x64xf32>
    %21 = arith.addf %18, %20 : vector<128x64xf32>
    %cst = arith.constant 0.000000e+00 : f32
    %22 = vector.broadcast %cst : f32 to vector<128x64xf32>
    %23 = arith.maximumf %21, %22 : vector<128x64xf32>
    %24 = arith.truncf %23 : vector<128x64xf32> to vector<128x64xbf16>
    %c0_8 = arith.constant 0 : index
    %c0_9 = arith.constant 0 : index
    %25 = vector.load %arg5[%c0_8, %c0_9] : memref<64x128xbf16, #tpu.memory_space<vmem>>, vector<64x128xbf16>
    %cst_10 = arith.constant dense<0.000000e+00> : vector<128x128xf32>
    %26 = tpu.matmul %24, %25, %cst_10 {dimension_numbers = #tpu.dot_dimension_numbers<[1], [0], [0], [1], [0, 0, 1, 1], [], []>} : vector<128x64xbf16>, vector<64x128xbf16>, vector<128x128xf32> -> vector<128x128xf32>
    %c0_11 = arith.constant 0 : index
    %c0_12 = arith.constant 0 : index
    %27 = vector.load %arg6[%c0_11, %c0_12] : memref<1x128xf32, #tpu.memory_space<vmem>>, vector<1x128xf32>
    %28 = vector.broadcast %27 : vector<1x128xf32> to vector<128x128xf32>
    %29 = arith.addf %26, %28 : vector<128x128xf32>
    %cst_13 = arith.constant 0.000000e+00 : f32
    %30 = vector.broadcast %cst_13 : f32 to vector<128x128xf32>
    %31 = arith.maximumf %29, %30 : vector<128x128xf32>
    %32 = arith.truncf %31 : vector<128x128xf32> to vector<128x128xbf16>
    %c0_14 = arith.constant 0 : index
    %c0_15 = arith.constant 0 : index
    %33 = vector.load %arg7[%c0_14, %c0_15] : memref<128x1024xbf16, #tpu.memory_space<vmem>>, vector<128x1024xbf16>
    %cst_16 = arith.constant dense<0.000000e+00> : vector<128x1024xf32>
    %34 = tpu.matmul %32, %33, %cst_16 {dimension_numbers = #tpu.dot_dimension_numbers<[1], [0], [0], [1], [0, 0, 1, 1], [], []>} : vector<128x128xbf16>, vector<128x1024xbf16>, vector<128x1024xf32> -> vector<128x1024xf32>
    %35 = vector.shape_cast %34 : vector<128x1024xf32> to vector<1x128x1024xf32>
    %cst_17 = arith.constant dense<0xFF800000> : vector<1x1024xf32>
    %36 = vector.multi_reduction <maximumf>, %35, %cst_17 [1] : vector<1x128x1024xf32> to vector<1x1024xf32>
    %c0_i32 = arith.constant 0 : i32
    %37 = arith.cmpi eq, %arg1, %c0_i32 : i32
    %38 = arith.extui %37 : i1 to i32
    %c0_i32_18 = arith.constant 0 : i32
    %39 = arith.cmpi ne, %38, %c0_i32_18 : i32
    scf.if %39 {
      %cst_25 = arith.constant 0xFF800000 : f32
      %46 = vector.broadcast %cst_25 : f32 to vector<1x1024xf32>
      %c0_26 = arith.constant 0 : index
      %c0_27 = arith.constant 0 : index
      %47 = vector.load %arg16[%c0_26, %c0_27] : memref<1x1024xf32, #tpu.memory_space<vmem>>, vector<1x1024xf32>
      tpu.vector_store %arg16[%c0_26, %c0_27], %46 {strides = array<i32>} : memref<1x1024xf32, #tpu.memory_space<vmem>>, vector<1x1024xf32>,
    } else {
    }
    %c0_19 = arith.constant 0 : index
    %c0_20 = arith.constant 0 : index
    %40 = vector.load %arg16[%c0_19, %c0_20] : memref<1x1024xf32, #tpu.memory_space<vmem>>, vector<1x1024xf32>
    %41 = arith.maximumf %40, %36 : vector<1x1024xf32>
    %c0_21 = arith.constant 0 : index
    %c0_22 = arith.constant 0 : index
    %42 = vector.load %arg16[%c0_21, %c0_22] : memref<1x1024xf32, #tpu.memory_space<vmem>>, vector<1x1024xf32>
    tpu.vector_store %arg16[%c0_21, %c0_22], %41 {strides = array<i32>} : memref<1x1024xf32, #tpu.memory_space<vmem>>, vector<1x1024xf32>,
    %c0_i32_23 = arith.constant 0 : i32
    %43 = arith.cmpi eq, %arg1, %c0_i32_23 : i32
    %44 = arith.extui %43 : i1 to i32
    %c0_i32_24 = arith.constant 0 : i32
    %45 = arith.cmpi ne, %44, %c0_i32_24 : i32
    scf.if %45 {
      %c0_25 = arith.constant 0 : index
      %c0_26 = arith.constant 0 : index
      %46 = vector.load %arg16[%c0_25, %c0_26] : memref<1x1024xf32, #tpu.memory_space<vmem>>, vector<1x1024xf32>
      %c0_27 = arith.constant 0 : index
      %c0_28 = arith.constant 0 : index
      %47 = vector.load %arg8[%c0_27, %c0_28] : memref<1x1024xf32, #tpu.memory_space<vmem>>, vector<1x1024xf32>
      %48 = arith.addf %46, %47 : vector<1x1024xf32>
      %49 = arith.truncf %48 : vector<1x1024xf32> to vector<1x1024xbf16>
      %c0_29 = arith.constant 0 : index
      %c0_30 = arith.constant 0 : index
      %50 = vector.load %arg9[%c0_29, %c0_30] : memref<1024x512xbf16, #tpu.memory_space<vmem>>, vector<1024x512xbf16>
      %cst_31 = arith.constant dense<0.000000e+00> : vector<1x512xf32>
      %51 = tpu.matmul %49, %50, %cst_31 {dimension_numbers = #tpu.dot_dimension_numbers<[1], [0], [0], [1], [0, 0, 1, 1], [], []>} : vector<1x1024xbf16>, vector<1024x512xbf16>, vector<1x512xf32> -> vector<1x512xf32>
      %c0_32 = arith.constant 0 : index
      %c0_33 = arith.constant 0 : index
      %52 = vector.load %arg10[%c0_32, %c0_33] : memref<1x512xf32, #tpu.memory_space<vmem>>, vector<1x512xf32>
      %53 = arith.addf %51, %52 : vector<1x512xf32>
      %cst_34 = arith.constant 0.000000e+00 : f32
      %54 = vector.broadcast %cst_34 : f32 to vector<1x512xf32>
      %55 = arith.maximumf %53, %54 : vector<1x512xf32>
      %56 = arith.truncf %55 : vector<1x512xf32> to vector<1x512xbf16>
      %c0_35 = arith.constant 0 : index
      %c0_36 = arith.constant 0 : index
      %57 = vector.load %arg11[%c0_35, %c0_36] : memref<512x256xbf16, #tpu.memory_space<vmem>>, vector<512x256xbf16>
      %cst_37 = arith.constant dense<0.000000e+00> : vector<1x256xf32>
      %58 = tpu.matmul %56, %57, %cst_37 {dimension_numbers = #tpu.dot_dimension_numbers<[1], [0], [0], [1], [0, 0, 1, 1], [], []>} : vector<1x512xbf16>, vector<512x256xbf16>, vector<1x256xf32> -> vector<1x256xf32>
      %c0_38 = arith.constant 0 : index
      %c0_39 = arith.constant 0 : index
      %59 = vector.load %arg12[%c0_38, %c0_39] : memref<1x256xf32, #tpu.memory_space<vmem>>, vector<1x256xf32>
      %60 = arith.addf %58, %59 : vector<1x256xf32>
      %cst_40 = arith.constant 0.000000e+00 : f32
      %61 = vector.broadcast %cst_40 : f32 to vector<1x256xf32>
      %62 = arith.maximumf %60, %61 : vector<1x256xf32>
      %63 = arith.truncf %62 : vector<1x256xf32> to vector<1x256xbf16>
      %c0_41 = arith.constant 0 : index
      %c0_42 = arith.constant 0 : index
      %64 = vector.load %arg13[%c0_41, %c0_42] : memref<256x128xbf16, #tpu.memory_space<vmem>>, vector<256x128xbf16>
      %cst_43 = arith.constant dense<0.000000e+00> : vector<1x128xf32>
      %65 = tpu.matmul %63, %64, %cst_43 {dimension_numbers = #tpu.dot_dimension_numbers<[1], [0], [0], [1], [0, 0, 1, 1], [], []>} : vector<1x256xbf16>, vector<256x128xbf16>, vector<1x128xf32> -> vector<1x128xf32>
      %c0_44 = arith.constant 0 : index
      %c0_45 = arith.constant 0 : index
      %66 = vector.load %arg14[%c0_44, %c0_45] : memref<1x128xf32, #tpu.memory_space<vmem>>, vector<1x128xf32>
      %67 = arith.addf %65, %66 : vector<1x128xf32>
      %68 = vector.shape_cast %67 : vector<1x128xf32> to vector<1x1x128xf32>
      %c0_46 = arith.constant 0 : index
      %c0_47 = arith.constant 0 : index
      %c0_48 = arith.constant 0 : index
      %69 = vector.load %arg15[%c0_46, %c0_47, %c0_48] : memref<1x1x128xf32, #tpu.memory_space<vmem>>, vector<1x1x128xf32>
      tpu.vector_store %arg15[%c0_46, %c0_47, %c0_48], %68 {strides = array<i32>} : memref<1x1x128xf32, #tpu.memory_space<vmem>>, vector<1x1x128xf32>,
    } else {
    }
    return
  }
  func.func @transform_0(%arg0: i32, %arg1: i32) -> (i32, i32, i32) {
    %c0_i32 = arith.constant 0 : i32
    %c0_i32_0 = arith.constant 0 : i32
    return %arg0, %arg1, %c0_i32 : i32, i32, i32
  }
  func.func @transform_1(%arg0: i32, %arg1: i32) -> (i32, i32) {
    %c0_i32 = arith.constant 0 : i32
    %c0_i32_0 = arith.constant 0 : i32
    %c0_i32_1 = arith.constant 0 : i32
    return %c0_i32, %c0_i32_0 : i32, i32
  }
  func.func @transform_2(%arg0: i32, %arg1: i32) -> (i32, i32) {
    %c0_i32 = arith.constant 0 : i32
    %c0_i32_0 = arith.constant 0 : i32
    %c0_i32_1 = arith.constant 0 : i32
    return %c0_i32, %c0_i32_0 : i32, i32
  }
  func.func @transform_3(%arg0: i32, %arg1: i32) -> (i32, i32) {
    %c0_i32 = arith.constant 0 : i32
    %c0_i32_0 = arith.constant 0 : i32
    %c0_i32_1 = arith.constant 0 : i32
    return %c0_i32, %c0_i32_0 : i32, i32
  }
  func.func @transform_4(%arg0: i32, %arg1: i32) -> (i32, i32) {
    %c0_i32 = arith.constant 0 : i32
    %c0_i32_0 = arith.constant 0 : i32
    %c0_i32_1 = arith.constant 0 : i32
    return %c0_i32, %c0_i32_0 : i32, i32
  }
  func.func @transform_5(%arg0: i32, %arg1: i32) -> (i32, i32) {
    %c0_i32 = arith.constant 0 : i32
    %c0_i32_0 = arith.constant 0 : i32
    %c0_i32_1 = arith.constant 0 : i32
    return %c0_i32, %c0_i32_0 : i32, i32
  }
  func.func @transform_6(%arg0: i32, %arg1: i32) -> (i32, i32) {
    %c0_i32 = arith.constant 0 : i32
    %c0_i32_0 = arith.constant 0 : i32
    %c0_i32_1 = arith.constant 0 : i32
    return %c0_i32, %c0_i32_0 : i32, i32
  }
  func.func @transform_7(%arg0: i32, %arg1: i32) -> (i32, i32) {
    %c0_i32 = arith.constant 0 : i32
    %c0_i32_0 = arith.constant 0 : i32
    %c0_i32_1 = arith.constant 0 : i32
    return %c0_i32, %c0_i32_0 : i32, i32
  }
  func.func @transform_8(%arg0: i32, %arg1: i32) -> (i32, i32) {
    %c0_i32 = arith.constant 0 : i32
    %c0_i32_0 = arith.constant 0 : i32
    %c0_i32_1 = arith.constant 0 : i32
    return %c0_i32, %c0_i32_0 : i32, i32
  }
  func.func @transform_9(%arg0: i32, %arg1: i32) -> (i32, i32) {
    %c0_i32 = arith.constant 0 : i32
    %c0_i32_0 = arith.constant 0 : i32
    %c0_i32_1 = arith.constant 0 : i32
    return %c0_i32, %c0_i32_0 : i32, i32
  }
  func.func @transform_10(%arg0: i32, %arg1: i32) -> (i32, i32) {
    %c0_i32 = arith.constant 0 : i32
    %c0_i32_0 = arith.constant 0 : i32
    %c0_i32_1 = arith.constant 0 : i32
    return %c0_i32, %c0_i32_0 : i32, i32
  }
  func.func @transform_11(%arg0: i32, %arg1: i32) -> (i32, i32) {
    %c0_i32 = arith.constant 0 : i32
    %c0_i32_0 = arith.constant 0 : i32
    %c0_i32_1 = arith.constant 0 : i32
    return %c0_i32, %c0_i32_0 : i32, i32
  }
  func.func @transform_12(%arg0: i32, %arg1: i32) -> (i32, i32) {
    %c0_i32 = arith.constant 0 : i32
    %c0_i32_0 = arith.constant 0 : i32
    %c0_i32_1 = arith.constant 0 : i32
    return %c0_i32, %c0_i32_0 : i32, i32
  }
  func.func @transform_13(%arg0: i32, %arg1: i32) -> (i32, i32, i32) {
    %c0_i32 = arith.constant 0 : i32
    %c0_i32_0 = arith.constant 0 : i32
    %c0_i32_1 = arith.constant 0 : i32
    return %arg0, %c0_i32, %c0_i32_0 : i32, i32, i32
  }
}

</mosaic_0001>

<bundles_post_ra>
// kernel: tpu_custom_call.1
= control target key start
LH: loop header
LB: loop body
LE: loop exit
PB: predicated region body
PF: predicated region fallthrough
CT: control target
= control target key end

     0   :  { %s6868_s0 = inlined_call_operand.vmem [shape: f32[2,128,3], index: 0, kind: input, shape index: {}]   ;;  %s6869_s1 = inlined_call_operand.vmem [shape: f32[3,64], index: 1, kind: input, shape index: {}]   ;;  %s6870_s2 = inlined_call_operand.vmem [shape: f32[1,64], index: 2, kind: input, shape index: {}]   ;;  %s6871_s3 = inlined_call_operand.vmem [shape: bf16[64,128], index: 3, kind: input, shape index: {}]   ;;  %s6872_s4 = inlined_call_operand.vmem [shape: f32[1,128], index: 4, kind: input, shape index: {}]   ;;  %s6873_s5 = inlined_call_operand.hbm [shape: bf16[128,1024], index: 5, kind: input, shape index: {}]   ;;  %s6874_s6 = inlined_call_operand.vmem [shape: f32[1,1024], index: 6, kind: input, shape index: {}]   ;;  %s6875_s7 = inlined_call_operand.hbm [shape: bf16[1024,512], index: 7, kind: input, shape index: {}]   ;;  %s6876_s8 = inlined_call_operand.vmem [shape: f32[1,512], index: 8, kind: input, shape index: {}]   ;;  %s6877_s9 = inlined_call_operand.hbm [shape: bf16[512,256], index: 9, kind: input, shape index: {}]   ;;  %s6878_s10 = inlined_call_operand.vmem [shape: f32[1,256], index: 10, kind: input, shape index: {}]   ;;  %s6879_s11 = inlined_call_operand.vmem [shape: bf16[256,128], index: 11, kind: input, shape index: {}]   ;;  %s6880_s12 = inlined_call_operand.vmem [shape: f32[1,128], index: 12, kind: input, shape index: {}]   ;;  %s6881_s13 = inlined_call_operand.hbm [shape: f32[2,1,128], index: 13, kind: output, shape index: {}]  }
   0x1   :  { %6896 = sst [smem:[#allocation21_spill]] %s6875_s7 }
   0x2   :  { %6897 = sst [smem:[#allocation22_spill]] %s6880_s12 }
   0x3   :  { %6898 = sst [smem:[#allocation23_spill]] %s6881_s13 }
   0x4   :  { %18 = vsyncpa [#allocation4], 0 }
   0x5   :  { %19 = vsyncpa [#allocation7], 0 }
   0x6   :  { %20 = vsyncpa [#allocation5], 0 }
   0x7   :  { %22 = vsyncpa [#allocation5 + $0x1], 0  ;;  %s6267_s25 = smov 0   ;;  %s6269_s26 = smov 0  }
   0x8   :  { %s6271_s27 = smov 0   ;;  %s6273_s28 = smov 0  }
   0x9   :  { %s6275_s29 = smov 0   ;;  %s6277_s30 = smov 0  }
   0xa LB: > { %6899 = sst [smem:[#allocation13_spill]] %s6161_s25  ;;  %s4846_s14 = sadd.s32 4294967295, %s6181_s30   ;;  %s6181_s30 = sphi %s6277_s30, %s28_s30   ;;  %s6177_s29 = sphi %s6275_s29, %s6931_s29   ;;  %s6173_s28 = sphi %s6273_s28, %s6930_s28   ;;  %s6169_s27 = sphi %s6271_s27, %s6925_s27   ;;  %s6165_s26 = sphi %s6269_s26, %s6929_s26   ;;  %s6161_s25 = sphi %s6267_s25, %s6928_s25  }
   0xb   : > { %6900 = sst [smem:[#allocation14_spill]] %s6169_s27  ;;  %s4847_s15 = sadd.s32 4294967294, %s6181_s30  }
   0xc   : > { %6901 = sst [smem:[#allocation15_spill]] %s6177_s29  ;;  %s40_s16 = sadd.s32 1, %s6177_s29 }
   0xd   : > { %6902 = sst [smem:[#allocation16_spill]] %s6181_s30  ;;  %s327_s17 = sadd.s32 1, %s6169_s27 }
   0xe   : > { %p42_p0 = scmp.ge.s32.totalorder %s40_s16, 2  ;;  %p337_p1 = scmp.ne.s32.totalorder %s6169_s27, %s6165_s26 }
   0xf   : > { %p338_p2 = scmp.eq.s32.totalorder %s4846_s14, 1  ;;  %p343_p3 = scmp.ne.s32.totalorder %s6165_s26, %s6161_s25 }
  0x10   : > { %s6933_s16 = smov (%p42_p0, %s40_s16), 0  ;;  %p344_p5 = scmp.eq.s32.totalorder %s4847_s15, 1 }
  0x11   : > { %6903 = sst [smem:[#allocation17_spill]] %s6933_s16  ;;  %p6307_p4 = por %p338_p2, %p337_p1 }
  0x12   : > { %s324_s19 = ssub.s32 %s6177_s29, %s6933_s16  ;;  %p4848_p6 = scmp.ge.s32.totalorder %s6181_s30, 1 }
  0x13   : > { %s6904_s18 = scalar_select %p6307_p4, 1, 0 }
  0x14   : > { %p325_p7 = scmp.eq.s32.totalorder %s324_s19, 0  ;;  %p6314_p8 = por %p344_p5, %p343_p3 }
  0x15   : > { %6905 = sst [smem:[#allocation18_spill]] %s6904_s18  ;;  %p351_p9 = scmp.lt.s32.totalorder %s6181_s30, 3 }
  0x16   : > { %s6906_s20 = scalar_select %p6314_p8, 1, 0 }
  0x17   : > { %s6320_s21 = scalar_select %p325_p7, %s6169_s27, %s327_s17  }
  0x18   : > { %6907 = sst [smem:[#allocation19_spill]] %s6906_s20  ;;  %p6322_p10 = pnand %p4848_p6, %p351_p9 }
  0x19   : > { %6908 = sst [smem:[#allocation20_spill]] %s6320_s21  ;;  %p6326_p11 = scmp.eq.s32.totalorder %s4846_s14, 0 }
  0x1a   : > { %s6909_s22 = scalar_select %p6322_p10, 1, 0 }
  0x1b   : > { %s6910_s23 = scalar_select %p6326_p11, 1, 0 }
  0x1c   : > { %p5402_p12 = pneg %p6322_p10  ;;  %s6183_s24 = smov [#allocation6]  }
  0x1d   : > { %s391_s15 = sshll.u32 %s6183_s24, 4  ;;  %s6184_s17 = smov [#allocation3]   ;;  %s392_s15 = int_to_ptr.vmem [resolvable:$true] %s391_s15 }
  0x1e   : > { %p6334_p13 = pnand %p6326_p11, %p5402_p12  ;;  %s375_s16 = sshll.u32 %s6184_s17, 4  ;;  %s376_s16 = int_to_ptr.vmem [resolvable:$true] %s375_s16 }
  0x1f   : > { %s6912_s7 = sld [smem:[#allocation21_spill]] }
  0x20   : > { %p6346_p1 = pneg %p6334_p13 }
  0x25   : > { %s6011_s14 = scalar_lea.hbm %s6912_s7, 32768 }
  0x26   : > { %p6012_p0 = scmp.ne.s32.totalorder %s6912_s7, %s6011_s14  ;;  %p6018_p5 = scmp.lt.u32.totalorder %s6011_s14, %s6912_s7 }
  0x28   : > { %p6014_p2 = pnand %p6346_p1, %p6012_p0 }
  0x2a   : > { %p6015_p3 = pneg %p6014_p2 }
  0x2c   : > { %p6020_p6 = pnand %p6018_p5, %p6015_p3 }
  0x2e   : > { %6023 = shalt.err (!%p6020_p6)
}
  0x2f   : > { %s6024_s29 = scalar_lea.vmem %s392_s15, 32768  ;;  %p6032_p8 = scmp.lt.s32.totalorder %s392_s15, %s392_s15 }
  0x30   : > { %p6025_p7 = scmp.ne.s32.totalorder %s392_s15, %s6024_s29  ;;  %p6033_p4 = scmp.lt.s32.totalorder %s6024_s29, %s6024_s29 }
  0x32   : > { %p6027_p9 = pnand %p6025_p7, %p6346_p1  ;;  %p6034_p11 = por %p6033_p4, %p6032_p8 }
  0x34   : > { %p6028_p12 = pneg %p6027_p9 }
  0x36   : > { %p6035_p10 = pnand %p6034_p11, %p6028_p12 }
  0x38   : > { %6038 = shalt.err (!%p6035_p10)
}
  0x39   : > { %s6185_s27 = smov 256   ;;  %s6186_s20 = smov 16  }
  0x3a   : > { %5408 = dma.hbm_to_vmem [thread:$0]  (!%p6334_p13), %s6912_s7, 32768, %s392_s15, [#allocation7], %s6185_s27, %s6185_s27, %s6186_s20  }
  0x3b   : > { %s6039_s14 = scalar_lea.hbm %s6873_s5, 8192 }
  0x3c   : > { %p6040_p4 = scmp.ne.s32.totalorder %s6873_s5, %s6039_s14  ;;  %p6046_p11 = scmp.lt.u32.totalorder %s6039_s14, %s6873_s5 }
  0x3e   : > { %p6042_p8 = pnand %p6040_p4, %p6346_p1 }
  0x40   : > { %p6043_p10 = pneg %p6042_p8 }
  0x42   : > { %p6048_p0 = pnand %p6046_p11, %p6043_p10 }
  0x44   : > { %6051 = shalt.err (!%p6048_p0)
}
  0x45   : > { %s6052_s25 = scalar_lea.vmem %s376_s16, 8192  ;;  %p6060_p6 = scmp.lt.s32.totalorder %s376_s16, %s376_s16 }
  0x46   : > { %p6053_p2 = scmp.ne.s32.totalorder %s376_s16, %s6052_s25  ;;  %p6061_p7 = scmp.lt.s32.totalorder %s6052_s25, %s6052_s25 }
  0x48   : > { %p6055_p3 = pnand %p6053_p2, %p6346_p1  ;;  %p6062_p9 = por %p6061_p7, %p6060_p6 }
  0x4a   : > { %p6056_p5 = pneg %p6055_p3 }
  0x4c   : > { %p6063_p12 = pnand %p6062_p9, %p6056_p5 }
  0x4e   : > { %6066 = shalt.err (!%p6063_p12)
}
  0x4f   : > { %s6187_s13 = smov 512   ;;  %s6188_s18 = smov 32  }
  0x50   : > { %5405 = dma.hbm_to_vmem [thread:$0]  (!%p6334_p13), %s6873_s5, 8192, %s376_s16, [#allocation4], %s6187_s13, %s6187_s13, %s6188_s18  }
  0x51   : > { %s6189_s27 = smov [#allocation8]   ;;  %s6067_s17 = scalar_lea.hbm %s6877_s9, 8192 }
  0x52   : > { %s407_s20 = sshll.u32 %s6189_s27, 4  ;;  %p6068_p4 = scmp.ne.s32.totalorder %s6877_s9, %s6067_s17  ;;  %s408_s20 = int_to_ptr.vmem [resolvable:$true] %s407_s20 }
  0x53   : > { %p6074_p11 = scmp.lt.u32.totalorder %s6067_s17, %s6877_s9 }
  0x54   : > { %p6070_p8 = pnand %p6068_p4, %p6346_p1 }
  0x56   : > { %p6071_p10 = pneg %p6070_p8 }
  0x58   : > { %p6076_p0 = pnand %p6074_p11, %p6071_p10 }
  0x5a   : > { %6079 = shalt.err (!%p6076_p0)
}
  0x5b   : > { %s6080_s16 = scalar_lea.vmem %s408_s20, 8192  ;;  %p6088_p6 = scmp.lt.s32.totalorder %s408_s20, %s408_s20 }
  0x5c   : > { %p6081_p2 = scmp.ne.s32.totalorder %s408_s20, %s6080_s16  ;;  %p6089_p7 = scmp.lt.s32.totalorder %s6080_s16, %s6080_s16 }
  0x5e   : > { %p6083_p3 = pnand %p6081_p2, %p6346_p1  ;;  %p6090_p9 = por %p6089_p7, %p6088_p6 }
  0x60   : > { %p6084_p5 = pneg %p6083_p3 }
  0x62   : > { %p6091_p12 = pnand %p6090_p9, %p6084_p5 }
  0x64   : > { %6094 = shalt.err (!%p6091_p12)
}
  0x65   : > { %s6190_s13 = smov 128   ;;  %s6191_s18 = smov 8  }
  0x66   : > { %5411 = dma.hbm_to_vmem [thread:$0]  (!%p6334_p13), %s6877_s9, 8192, %s408_s20, [#allocation7], %s6190_s13, %s6190_s13, %s6191_s18  }
  0x67   : > { %p6914_p4 = scmp.ne.s32.totalorder %s6909_s22, 0 }
  0x68   : > { %p6915_p8 = scmp.ne.s32.totalorder (!%p6914_p4), %s6910_s23, 0 }
  0x69   : > { %445 = sbr.rel (%p6914_p4) target bundleno = 1856 (0x740), region = 72 }
  0x70   : > { %6148 = dma.done.wait (%p6915_p8), [#allocation4], 8192  }
  0x71   : > { %6150 = vsyncadd (%p6915_p8), [#allocation4], 4294959104 }
  0x72   : > { %6152 = dma.done.wait (%p6915_p8), [#allocation7], 40960  }
  0x73   : > { %6154 = vsyncadd (%p6915_p8), [#allocation7], 4294926336  ;;  %p501_p1 = scmp.lt.s32.totalorder %s6173_s28, 1  ;;  %v6192_v0 = vmov 1   ;;  %v6193_v1 = vmov 0   ;;  %v6194_v4 = vmov 2  }
  0x74   : > { %5485 = vset.pattern.permute.xlu1 %v6192_v0  ;;  %5484 = vset.pattern.permute.xlu0 %v6193_v1  ;;  %v5511_v8 = vld [vmem:[%s6871_s3] sm:$0xff]   ;;  %v5512_v10 = vld [vmem:[%s6871_s3 + $0x8] sm:$0xff]   ;;  %v5513_v12 = vld [vmem:[%s6871_s3 + $0x10] sm:$0xff]   ;;  %vm916_vm0 = vcmask 523264   ;;  %s498_s30 = sand.u32 1, %s6165_s26   ;;  %s6916_s14 = sld [smem:[#allocation22_spill]] }
  0x75   : > { %s502_s22 = scalar_select %p501_p1, %s6173_s28, 1  ;;  %1518 = vmatprep.mubr.bf16.mxu1 %v6193_v1  ;;  %5314 = vmatprep.subr.bf16.mxu0 %v5511_v8  ;;  %v5514_v13 = vld [vmem:[%s6871_s3 + $0x18] sm:$0xff]   ;;  %v6474_v28 = vld [vmem:[%s6869_s1] ss:$0 sm:$0xff]  ;;  %v6479_v30 = vld [vmem:[%s6869_s1 + $0x1] ss:$0 sm:$0xff] }
  0x76   : > { %5315 = vmatpush3.bf16.msra.mxu0 %v5511_v8  ;;  %v6484_v31 = vld [vmem:[%s6869_s1 + $0x2] ss:$0 sm:$0xff]  ;;  %v6501_v52 = vld [vmem:[%s6870_s2] ss:$0 sm:$0xff]  ;;  %s6917_s29 = sld [smem:[#allocation18_spill]]  ;;  %s5276_s25 = sshll.u32 %s6173_s28, 4 }
  0x77   : > { %s5279_s19 = sshll.u32 %s502_s22, 7  ;;  %5316 = vmatprep.subr.bf16.mxu0 %v5512_v10  ;;  %v1062_v34 = vld [vmem:[#allocation3] sm:$0xff]  ;;  %s499_s16 = scalar_lea.vmem [#allocation9], %s498_s30 }
  0x78   : > { %s6416_s27 = scalar_lea.vmem %s6868_s0, %s5279_s19  ;;  %v1066_v35 = vld [vmem:[#allocation3 + $0x20] sm:$0xff]  ;;  %s4746_s13 = sshll.u32 %s499_s16, 4  ;;  %s6823_s13 = int_to_ptr.vmem [resolvable:$true] %s4746_s13 }
  0x79   : > { %v511_v2 = vld [vmem:[%s6416_s27] sm:$0xff]  ;;  %v512_v3 = vld [vmem:[%s6416_s27 + $0x8] sm:$0xff]  ;;  %v514_v5 = vld [vmem:[%s6416_s27 + $0x18] sm:$0xff]  ;;  %v4877_v40 = vcombine.high %v1062_v34, %v1066_v35  ;;  %v6491_v45 = vcombine.low %v1062_v34, %v1066_v35  ;;  %s6918_s7 = sld [smem:[#allocation23_spill]]  ;;  %s4734_s19 = scalar_lea.sflag [#allocation5], %s498_s30 }
  0x7a   : > { %630 = vperm.xlu1 %5485, %v511_v2   ;;  %530 = vperm.xlu0 %5484, %v511_v2   ;;  %v513_v6 = vld [vmem:[%s6416_s27 + $0x10] sm:$0xff]  ;;  %v515_v7 = vld [vmem:[%s6416_s27 + $0x20] sm:$0xff]  ;;  %v516_v9 = vld [vmem:[%s6416_s27 + $0x28] sm:$0xff]  ;;  %s6095_s24 = scalar_lea.vmem %s6823_s13, 16  ;;  %s6196_s28 = smov [#allocation9]  }
  0x7b   : > { %v517_v11 = vld [vmem:[%s6416_s27 + $0x30] sm:$0xff]  ;;  %5317 = vmatpush3.bf16.msra.mxu0 %v5512_v10  ;;  %v518_v14 = vld [vmem:[%s6416_s27 + $0x38] sm:$0xff]  ;;  %v520_v15 = vld [vmem:[%s6416_s27 + $0x48] sm:$0xff]  ;;  %5338 = vmatprep.subr.bf16.mxu1 %v4877_v40  ;;  %p6096_p13 = scmp.ne.s32.totalorder %s6823_s13, %s6095_s24  ;;  %s6099_s15 = sshll.u32 %s6196_s28, 4  ;;  %s6100_s15 = int_to_ptr.vmem [resolvable:$false] %s6099_s15 }
  0x7c   : > { %5318 = vmatprep.subr.bf16.mxu0 %v5513_v12  ;;  %v521_v16 = vld [vmem:[%s6416_s27 + $0x50] sm:$0xff]  ;;  %v523_v17 = vld [vmem:[%s6416_s27 + $0x60] sm:$0xff]  ;;  %v524_v19 = vld [vmem:[%s6416_s27 + $0x68] sm:$0xff]  ;;  %5346 = vmatpush1.bf16.msra.mxu1 %v6491_v45  ;;  %p6919_p10 = scmp.ne.s32.totalorder %s6917_s29, 0  ;;  %p6102_p2 = scmp.lt.s32.totalorder %s6823_s13, %s6100_s15 }
  0x7d   : > { %v519_v18 = vld [vmem:[%s6416_s27 + $0x40] sm:$0xff]  ;;  %v525_v20 = vld [vmem:[%s6416_s27 + $0x70] sm:$0xff]  ;;  %v522_v21 = vld [vmem:[%s6416_s27 + $0x58] sm:$0xff] }
  0x7e   : > { %634 = vperm.xlu1 %5485, %v512_v3   ;;  %5489 = vset.pattern.permute.xlu0 %v6194_v4  ;;  %v526_v22 = vld [vmem:[%s6416_s27 + $0x78] sm:$0xff]  ;;  %v1070_v41 = vld [vmem:[#allocation3 + $0x40] sm:$0xff]  ;;  %p6097_p11 = pnand %p6096_p13, %p6919_p10  ;;  %s6101_s27 = scalar_lea.vmem %s6100_s15, 32 }
  0x7f   : > { %735 = vperm.xlu0 %5489, %v512_v3   ;;  %5319 = vmatpush3.bf16.msra.mxu0 %v5513_v12  ;;  %v1074_v42 = vld [vmem:[#allocation3 + $0x60] sm:$0xff]  ;;  %s6821_s22 = scalar_lea.hbm %s6918_s7, %s5276_s25  ;;  %p6103_p3 = scmp.lt.s32.totalorder %s6101_s27, %s6095_s24 }
  0x80   : > { %5320 = vmatprep.subr.bf16.mxu0 %v5514_v13  ;;  %v6493_v46 = vcombine.high %v1070_v41, %v1074_v42  ;;  %v1078_v49 = vld [vmem:[#allocation3 + $0x80] sm:$0xff]  ;;  %v4884_v55 = vcombine.low %v1070_v41, %v1074_v42  ;;  %p6098_p0 = pneg %p6097_p11 }
  0x81   : > { %v1082_v50 = vld [vmem:[#allocation3 + $0xa0] sm:$0xff]  ;;  %p6104_p5 = por %p6103_p3, %p6102_p2 }
  0x82   : > { %5486 = vset.pattern.permute.xlu1 %v6193_v1  ;;  %5339 = vmatprep.subr.bf16.mxu1 %v6493_v46  ;;  %v4893_v56 = vcombine.high %v1078_v49, %v1082_v50  ;;  %v1086_v60 = vld [vmem:[#allocation3 + $0xc0] sm:$0xff] }
  0x83   : > { %545 = vperm.xlu1 %5486, %v514_v5   ;;  %5490 = vset.pattern.permute.xlu0 %v6193_v1  ;;  %v1090_v61 = vld [vmem:[#allocation3 + $0xe0] sm:$0xff]  ;;  %p6105_p6 = pnand %p6104_p5, %p6098_p0 }
  0x84   : > { %535 = vperm.xlu0 %5490, %v512_v3   ;;  %5321 = vmatpush3.bf16.msra.mxu0 %v5514_v13  ;;  %v1098_v12 = vld [vmem:[#allocation3 + $0x120] sm:$0xff] }
  0x85   : > { %1446 = vmatprep.subr.bf16.mxu0 %v4877_v40  ;;  %5347 = vmatpush1.bf16.msra.mxu1 %v4884_v55 }
  0x86   : > { %5340 = vmatprep.subr.bf16.mxu1 %v4893_v56 }
  0x87   : > { %5487 = vset.pattern.permute.xlu1 %v6192_v0 }
  0x88   : > { %642 = vperm.xlu1 %5487, %v514_v5   ;;  %540 = vperm.xlu0 %5490, %v513_v6  }
  0x8c   : > { %5488 = vset.pattern.permute.xlu1 %v6194_v4  ;;  %550 = vperm.xlu0 %5490, %v515_v7  }
  0x8d   : > { %731 = vperm.xlu1 %5488, %v511_v2  }
  0x90   : > { %5491 = vset.pattern.permute.xlu0 %v6192_v0 }
  0x91   : > { %739 = vperm.xlu1 %5488, %v513_v6   ;;  %638 = vperm.xlu0 %5491, %v513_v6   ;;  %v4901_v6 = vcombine.high %v1086_v60, %v1090_v61 }
  0x95   : > { %743 = vperm.xlu1 %5488, %v514_v5   ;;  %650 = vperm.xlu0 %5491, %v516_v9  }
  0x99   : > { %5492 = vset.pattern.permute.xlu1 %v6193_v1  ;;  %654 = vperm.xlu0 %5491, %v517_v11  }
  0x9a   : > { %555 = vperm.xlu1 %5492, %v516_v9  }
  0x9d   : > { %5496 = vset.pattern.permute.xlu0 %v6194_v4 }
  0x9e   : > { %5493 = vset.pattern.permute.xlu1 %v6192_v0  ;;  %747 = vperm.xlu0 %5496, %v515_v7  }
  0x9f   : > { %646 = vperm.xlu1 %5493, %v515_v7  }
  0xa2   : > { %759 = vperm.xlu0 %5496, %v518_v14  }
  0xa3   : > { %5494 = vset.pattern.permute.xlu1 %v6193_v1 }
  0xa4   : > { %560 = vperm.xlu1 %5494, %v517_v11  }
  0xa6   : > { %767 = vperm.xlu0 %5496, %v520_v15  }
  0xa8   : > { %565 = vperm.xlu1 %5494, %v518_v14  }
  0xaa   : > { %5503 = vset.pattern.permute.xlu0 %v6193_v1 }
  0xab   : > { %575 = vperm.xlu0 %5503, %v520_v15  }
  0xac   : > { %5495 = vset.pattern.permute.xlu1 %v6192_v0 }
  0xad   : > { %658 = vperm.xlu1 %5495, %v518_v14   ;;  %v4900_v14 = vcombine.low %v1086_v60, %v1090_v61 }
  0xaf   : > { %580 = vperm.xlu0 %5503, %v521_v16  }
  0xb1   : > { %5497 = vset.pattern.permute.xlu1 %v6194_v4 }
  0xb2   : > { %751 = vperm.xlu1 %5497, %v516_v9  }
  0xb3   : > { %590 = vperm.xlu0 %5503, %v523_v17  }
  0xb6   : > { %755 = vperm.xlu1 %5497, %v517_v11   ;;  %v1094_v11 = vld [vmem:[#allocation3 + $0x100] sm:$0xff] }
  0xb7   : > { %5504 = vset.pattern.permute.xlu0 %v6192_v0 }
  0xb8   : > { %670 = vperm.xlu0 %5504, %v521_v16  }
  0xba   : > { %5498 = vset.pattern.permute.xlu1 %v6193_v1 }
  0xbb   : > { %570 = vperm.xlu1 %5498, %v519_v18  }
  0xbc   : > { %682 = vperm.xlu0 %5504, %v524_v19  }
  0xbf   : > { %5499 = vset.pattern.permute.xlu1 %v6192_v0 }
  0xc0   : > { %662 = vperm.xlu1 %5499, %v519_v18   ;;  %686 = vperm.xlu0 %5504, %v525_v20  }
  0xc4   : > { %666 = vperm.xlu1 %5499, %v520_v15   ;;  %5509 = vset.pattern.permute.xlu0 %v6194_v4 }
  0xc5   : > { %779 = vperm.xlu0 %5509, %v523_v17  }
  0xc8   : > { %5500 = vset.pattern.permute.xlu1 %v6193_v1 }
  0xc9   : > { %585 = vperm.xlu1 %5500, %v522_v21   ;;  %791 = vperm.xlu0 %5509, %v526_v22  }
  0xcd   : > { %5501 = vset.pattern.permute.xlu1 %v6192_v0 }
  0xce   : > { %674 = vperm.xlu1 %5501, %v522_v21  }
  0xd2   : > { %5502 = vset.pattern.permute.xlu1 %v6194_v4 }
  0xd3   : > { %763 = vperm.xlu1 %5502, %v519_v18  }
  0xd7   : > { %771 = vperm.xlu1 %5502, %v521_v16  }
  0xdb   : > { %775 = vperm.xlu1 %5502, %v522_v21  }
  0xdf   : > { %5505 = vset.pattern.permute.xlu1 %v6193_v1 }
  0xe0   : > { %595 = vperm.xlu1 %5505, %v524_v19  }
  0xe4   : > { %5506 = vset.pattern.permute.xlu1 %v6192_v0 }
  0xe5   : > { %678 = vperm.xlu1 %5506, %v523_v17  }
  0xe9   : > { %5507 = vset.pattern.permute.xlu1 %v6193_v1 }
  0xea   : > { %600 = vperm.xlu1 %5507, %v525_v20  }
  0xee   : > { %605 = vperm.xlu1 %5507, %v526_v22  }
  0xf2   : > { %5508 = vset.pattern.permute.xlu1 %v6192_v0 }
  0xf3   : > { %690 = vperm.xlu1 %5508, %v526_v22   ;;  %v1102_v22 = vld [vmem:[#allocation3 + $0x140] sm:$0xff] }
  0xf7   : > { %5510 = vset.pattern.permute.xlu1 %v6194_v4  ;;  %v4892_v4 = vcombine.low %v1078_v49, %v1082_v50 }
  0xf8   : > { %783 = vperm.xlu1 %5510, %v524_v19   ;;  %v4909_v19 = vcombine.high %v1094_v11, %v1098_v12 }
  0xf9   : > { %v631_v23 = vpop.permute.xlu1 %630  ;;  %v531_v24 = vpop.permute.xlu0 %530  ;;  %5348 = vmatpush1.bf16.msra.mxu1 %v4892_v4 }
  0xfa   : > { %v697_v43 = vmul.f32 %v6479_v30, %v631_v23  ;;  %v612_v44 = vmul.f32 %v6474_v28, %v531_v24  ;;  %5341 = vmatprep.subr.bf16.mxu1 %v4901_v6  ;;  %v1106_v23 = vld [vmem:[#allocation3 + $0x160] sm:$0xff] }
  0xfb   : > { %v4916_v35 = vcombine.low %v1102_v22, %v1106_v23 }
  0xfc   : > { %787 = vperm.xlu1 %5510, %v525_v20   ;;  %v713_v53 = vadd.f32 %v697_v43, %v612_v44 }
  0xfd   : > { %v635_v25 = vpop.permute.xlu1 %634  ;;  %5349 = vmatpush1.bf16.msra.mxu1 %v4900_v14 }
  0xfe   : > { %v736_v26 = vpop.permute.xlu0 %735  ;;  %v698_v33 = vmul.f32 %v6479_v30, %v635_v25  ;;  %5342 = vmatprep.subr.bf16.mxu1 %v4909_v19 }
  0xff   : > { %v799_v36 = vmul.f32 %v6484_v31, %v736_v26  ;;  %v4908_v26 = vcombine.low %v1094_v11, %v1098_v12 }
 0x101   : > { %5350 = vmatpush1.bf16.msra.mxu1 %v4908_v26 }
 0x102   : > { %v546_v27 = vpop.permute.xlu1 %545 }
 0x103   : > { %v536_v29 = vpop.permute.xlu0 %535  ;;  %v615_v5 = vmul.f32 %v6474_v28, %v546_v27  ;;  %v4917_v27 = vcombine.high %v1102_v22, %v1106_v23 }
 0x104   : > { %v613_v32 = vmul.f32 %v6474_v28, %v536_v29 }
 0x105   : > { %5343 = vmatprep.subr.bf16.mxu1 %v4917_v27 }
 0x106   : > { %v714_v37 = vadd.f32 %v698_v33, %v613_v32  ;;  %5351 = vmatpush1.bf16.msra.mxu1 %v4916_v35 }
 0x107   : > { %v643_v38 = vpop.permute.xlu1 %642  ;;  %v541_v39 = vpop.permute.xlu0 %540 }
 0x108   : > { %v815_v47 = vadd.f32 %v799_v36, %v714_v37  ;;  %v614_v57 = vmul.f32 %v6474_v28, %v541_v39  ;;  %v700_v0 = vmul.f32 %v6479_v30, %v643_v38 }
 0x10a   : > { %v838_v59 = vadd.f32 %v6501_v52, %v815_v47  ;;  %v716_v15 = vadd.f32 %v700_v0, %v615_v5 }
 0x10b   : > { %v6495_v48 = vpop.permute.xlu0 %550 }
 0x10c   : > { %v732_v51 = vpop.permute.xlu1 %731  ;;  %v854_v10 = vmax.f32 %v838_v59, 0.0  ;;  %v616_v42 = vmul.f32 %v6474_v28, %v6495_v48 }
 0x10d   : > { %v798_v54 = vmul.f32 %v6484_v31, %v732_v51 }
 0x10f   : > { %v814_v58 = vadd.f32 %v798_v54, %v713_v53 }
 0x110   : > { %v740_v62 = vpop.permute.xlu1 %739  ;;  %v639_v63 = vpop.permute.xlu0 %638 }
 0x111   : > { %v699_v2 = vmul.f32 %v6479_v30, %v639_v63  ;;  %v837_v3 = vadd.f32 %v6501_v52, %v814_v58  ;;  %v800_v7 = vmul.f32 %v6484_v31, %v740_v62 }
 0x113   : > { %v715_v8 = vadd.f32 %v699_v2, %v614_v57  ;;  %v853_v9 = vmax.f32 %v837_v3, 0.0 }
 0x114   : > { %v744_v13 = vpop.permute.xlu1 %743  ;;  %v651_v34 = vpop.permute.xlu0 %650 }
 0x115   : > { %v816_v16 = vadd.f32 %v800_v7, %v715_v8  ;;  %v801_v17 = vmul.f32 %v6484_v31, %v744_v13  ;;  %v869_v18 = vpack.c.bf16 %v854_v10, %v853_v9  ;;  %v702_v49 = vmul.f32 %v6479_v30, %v651_v34 }
 0x117   : > { %v839_v20 = vadd.f32 %v6501_v52, %v816_v16  ;;  %v817_v21 = vadd.f32 %v801_v17, %v716_v15  ;;  %5322 = vmatprep.mubr.msk.bf16.mxu0 %vm916_vm0, %v869_v18 }
 0x118   : > { %v655_v37 = vpop.permute.xlu0 %654 }
 0x119   : > { %v840_v24 = vadd.f32 %v6501_v52, %v817_v21  ;;  %v556_v25 = vpop.permute.xlu1 %555  ;;  %v855_v29 = vmax.f32 %v839_v20, 0.0  ;;  %v703_v57 = vmul.f32 %v6479_v30, %v655_v37 }
 0x11a   : > { %v617_v50 = vmul.f32 %v6474_v28, %v556_v25 }
 0x11b   : > { %v856_v32 = vmax.f32 %v840_v24, 0.0 }
 0x11d   : > { %v870_v33 = vpack.c.bf16 %v856_v32, %v855_v29  ;;  %v748_v41 = vpop.permute.xlu0 %747 }
 0x11e   : > { %v647_v36 = vpop.permute.xlu1 %646  ;;  %v802_v44 = vmul.f32 %v6484_v31, %v748_v41 }
 0x11f   : > { %5323 = vmatmul.mubr.msk.bf16.vlgmr.msra.gmra.mrb[0].mxu0 %vm916_vm0, %v870_v33  ;;  %v701_v40 = vmul.f32 %v6479_v30, %v647_v36 }
 0x120   : > { %1447 = vmatpush1.bf16.msra.mxu0 %v6491_v45 }
 0x121   : > { %1448 = vmatprep.subr.bf16.mxu0 %v6493_v46  ;;  %v717_v43 = vadd.f32 %v701_v40, %v616_v42  ;;  %v760_v46 = vpop.permute.xlu0 %759 }
 0x123   : > { %v561_v38 = vpop.permute.xlu1 %560  ;;  %v818_v53 = vadd.f32 %v802_v44, %v717_v43 }
 0x124   : > { %1449 = vmatpush1.bf16.msra.mxu0 %v4884_v55  ;;  %v805_v55 = vmul.f32 %v6484_v31, %v760_v46  ;;  %v618_v58 = vmul.f32 %v6474_v28, %v561_v38 }
 0x125   : > { %1450 = vmatprep.subr.bf16.mxu0 %v4893_v56  ;;  %v718_v56 = vadd.f32 %v702_v49, %v617_v50  ;;  %v841_v60 = vadd.f32 %v6501_v52, %v818_v53  ;;  %v768_v10 = vpop.permute.xlu0 %767 }
 0x126   : > { %v719_v0 = vadd.f32 %v703_v57, %v618_v58 }
 0x127   : > { %v566_v39 = vpop.permute.xlu1 %565 }
 0x128   : > { %1451 = vmatpush1.bf16.msra.mxu0 %v4892_v4  ;;  %v619_v51 = vmul.f32 %v6474_v28, %v566_v39  ;;  %v857_v4 = vmax.f32 %v841_v60, 0.0 }
 0x129   : > { %1452 = vmatprep.subr.bf16.mxu0 %v4901_v6 }
 0x12a   : > { %v576_v15 = vpop.permute.xlu0 %575 }
 0x12b   : > { %v621_v22 = vmul.f32 %v6474_v28, %v576_v15 }
 0x12c   : > { %v659_v47 = vpop.permute.xlu1 %658  ;;  %1453 = vmatpush1.bf16.msra.mxu0 %v4900_v14 }
 0x12d   : > { %v704_v45 = vmul.f32 %v6479_v30, %v659_v47  ;;  %1454 = vmatprep.subr.bf16.mxu0 %v4909_v19 }
 0x12e   : > { %v581_v17 = vpop.permute.xlu0 %580 }
 0x12f   : > { %v720_v54 = vadd.f32 %v704_v45, %v619_v51  ;;  %v622_v33 = vmul.f32 %v6474_v28, %v581_v17 }
 0x130   : > { %1455 = vmatpush1.bf16.msra.mxu0 %v4908_v26  ;;  %v807_v26 = vmul.f32 %v6484_v31, %v768_v10 }
 0x131   : > { %v752_v48 = vpop.permute.xlu1 %751  ;;  %1456 = vmatprep.subr.bf16.mxu0 %v4917_v27  ;;  %v821_v61 = vadd.f32 %v805_v55, %v720_v54 }
 0x132   : > { %v803_v59 = vmul.f32 %v6484_v31, %v752_v48  ;;  %v591_v20 = vpop.permute.xlu0 %590 }
 0x133   : > { %v844_v5 = vadd.f32 %v6501_v52, %v821_v61 }
 0x134   : > { %v819_v62 = vadd.f32 %v803_v59, %v718_v56  ;;  %1457 = vmatpush1.bf16.msra.mxu0 %v4916_v35 }
 0x135   : > { %v756_v63 = vpop.permute.xlu1 %755  ;;  %v860_v12 = vmax.f32 %v844_v5, 0.0  ;;  %v624_v5 = vmul.f32 %v6474_v28, %v591_v20 }
 0x136   : > { %v842_v2 = vadd.f32 %v6501_v52, %v819_v62  ;;  %v804_v3 = vmul.f32 %v6484_v31, %v756_v63 }
 0x137   : > { %v671_v25 = vpop.permute.xlu0 %670 }
 0x138   : > { %v858_v6 = vmax.f32 %v842_v2, 0.0  ;;  %v820_v7 = vadd.f32 %v804_v3, %v719_v0  ;;  %v707_v34 = vmul.f32 %v6479_v30, %v671_v25 }
 0x13a   : > { %v871_v8 = vpack.c.bf16 %v858_v6, %v857_v4  ;;  %v843_v9 = vadd.f32 %v6501_v52, %v820_v7  ;;  %v571_v11 = vpop.permute.xlu1 %570  ;;  %v723_v40 = vadd.f32 %v707_v34, %v622_v33  ;;  %v1110_v6 = vld [vmem:[#allocation3 + $0x180] sm:$0xff] }
 0x13b   : > { %v620_v29 = vmul.f32 %v6474_v28, %v571_v11  ;;  %v683_v61 = vpop.permute.xlu0 %682  ;;  %v1114_v7 = vld [vmem:[#allocation3 + $0x1a0] sm:$0xff] }
 0x13c   : > { %v859_v13 = vmax.f32 %v843_v9, 0.0  ;;  %5326 = vmatprep.mubr.msk.bf16.mxu0 %vm916_vm0, %v871_v8  ;;  %v4925_v11 = vcombine.high %v1110_v6, %v1114_v7  ;;  %v710_v15 = vmul.f32 %v6479_v30, %v683_v61 }
 0x13e   : > { %v872_v14 = vpack.c.bf16 %v860_v12, %v859_v13  ;;  %1458 = vmatprep.subr.bf16.mxu0 %v4925_v11  ;;  %5344 = vmatprep.subr.bf16.mxu1 %v4925_v11 }
 0x13f   : > { %v663_v16 = vpop.permute.xlu1 %662  ;;  %v687_v63 = vpop.permute.xlu0 %686 }
 0x140   : > { %5327 = vmatmul.mubr.msk.bf16.gmra.mrb[4].mxu0 %vm916_vm0, %v872_v14  ;;  %v705_v27 = vmul.f32 %v6479_v30, %v663_v16  ;;  %v4924_v14 = vcombine.low %v1110_v6, %v1114_v7 }
 0x142   : > { %v721_v36 = vadd.f32 %v705_v27, %v620_v29  ;;  %1459 = vmatpush1.bf16.msra.mxu0 %v4924_v14  ;;  %5352 = vmatpush1.bf16.msra.mxu1 %v4924_v14  ;;  %v1091_v14 = vld [vmem:[#allocation3 + $0xe8] sm:$0xff] }
 0x143   : > { %v667_v18 = vpop.permute.xlu1 %666 }
 0x144   : > { %v706_v21 = vmul.f32 %v6479_v30, %v667_v18  ;;  %v780_v4 = vpop.permute.xlu0 %779  ;;  %v1118_v18 = vld [vmem:[#allocation3 + $0x1c0] sm:$0xff] }
 0x145   : > { %v810_v9 = vmul.f32 %v6484_v31, %v780_v4 }
 0x146   : > { %v722_v23 = vadd.f32 %v706_v21, %v621_v22 }
 0x148   : > { %v586_v19 = vpop.permute.xlu1 %585  ;;  %v823_v32 = vadd.f32 %v807_v26, %v722_v23  ;;  %v792_v13 = vpop.permute.xlu0 %791 }
 0x149   : > { %v623_v45 = vmul.f32 %v6474_v28, %v586_v19  ;;  %v1122_v19 = vld [vmem:[#allocation3 + $0x1e0] sm:$0xff]  ;;  %v813_v22 = vmul.f32 %v6484_v31, %v792_v13  ;;  %v1087_v13 = vld [vmem:[#allocation3 + $0xc8] sm:$0xff] }
 0x14a   : > { %v846_v38 = vadd.f32 %v6501_v52, %v823_v32  ;;  %v4933_v23 = vcombine.high %v1118_v18, %v1122_v19  ;;  %v4932_v26 = vcombine.low %v1118_v18, %v1122_v19  ;;  %v1099_v18 = vld [vmem:[#allocation3 + $0x128] sm:$0xff]  ;;  %v4902_v19 = vcombine.low %v1087_v13, %v1091_v14 }
 0x14c   : > { %v862_v47 = vmax.f32 %v846_v38, 0.0  ;;  %1460 = vmatprep.subr.bf16.mxu0 %v4933_v23  ;;  %5345 = vmatprep.subr.bf16.mxu1 %v4933_v23 }
 0x14d   : > { %v675_v24 = vpop.permute.xlu1 %674  ;;  %1461 = vmatpush1.bf16.msra.mxu0 %v4932_v26  ;;  %5353 = vmatpush1.bf16.msra.mxu1 %v4932_v26  ;;  %v1115_v26 = vld [vmem:[#allocation3 + $0x1a8] sm:$0xff] }
 0x14e   : > { %v708_v42 = vmul.f32 %v6479_v30, %v675_v24  ;;  %v711_v24 = vmul.f32 %v6479_v30, %v687_v63 }
 0x150   : > { %v724_v51 = vadd.f32 %v708_v42, %v623_v45 }
 0x152   : > { %v764_v35 = vpop.permute.xlu1 %763 }
 0x153   : > { %v806_v37 = vmul.f32 %v6484_v31, %v764_v35 }
 0x155   : > { %v822_v39 = vadd.f32 %v806_v37, %v721_v36 }
 0x156   : > { %v772_v41 = vpop.permute.xlu1 %771 }
 0x157   : > { %v845_v43 = vadd.f32 %v6501_v52, %v822_v39  ;;  %v808_v44 = vmul.f32 %v6484_v31, %v772_v41 }
 0x159   : > { %v861_v46 = vmax.f32 %v845_v43, 0.0  ;;  %v824_v49 = vadd.f32 %v808_v44, %v723_v40 }
 0x15a   : > { %v776_v50 = vpop.permute.xlu1 %775 }
 0x15b   : > { %v873_v53 = vpack.c.bf16 %v862_v47, %v861_v46  ;;  %v809_v54 = vmul.f32 %v6484_v31, %v776_v50  ;;  %v847_v55 = vadd.f32 %v6501_v52, %v824_v49  ;;  %v1063_v46 = vld [vmem:[#allocation3 + $0x8] sm:$0xff] }
 0x15c   : > { %v1067_v49 = vld [vmem:[#allocation3 + $0x28] sm:$0xff] }
 0x15d   : > { %v825_v48 = vadd.f32 %v809_v54, %v724_v51  ;;  %5330 = vmatprep.mubr.msk.bf16.mxu0 %vm916_vm0, %v873_v53  ;;  %v863_v58 = vmax.f32 %v847_v55, 0.0  ;;  %v4878_v50 = vcombine.low %v1063_v46, %v1067_v49  ;;  %v4879_v51 = vcombine.high %v1063_v46, %v1067_v49  ;;  %v6577_v53 = vld [vmem:[#allocation3 + $0x30] sm:$0xff]  ;;  %v6586_v55 = vld [vmem:[%s6872_s4] ss:$0 sm:$0xff] }
 0x15f   : > { %v848_v56 = vadd.f32 %v6501_v52, %v825_v48  ;;  %v596_v57 = vpop.permute.xlu1 %595  ;;  %1559 = vmatprep.subr.bf16.mxu0 %v4879_v51 }
 0x160   : > { %v625_v16 = vmul.f32 %v6474_v28, %v596_v57 }
 0x161   : > { %v864_v59 = vmax.f32 %v848_v56, 0.0 }
 0x162   : > { %v726_v27 = vadd.f32 %v710_v15, %v625_v16  ;;  %v4903_v16 = vcombine.high %v1087_v13, %v1091_v14 }
 0x163   : > { %v874_v60 = vpack.c.bf16 %v864_v59, %v863_v58 }
 0x164   : > { %v679_v62 = vpop.permute.xlu1 %678 }
 0x165   : > { %5331 = vmatmul.mubr.msk.bf16.gmra.mrb[8].mxu0 %vm916_vm0, %v874_v60  ;;  %v709_v3 = vmul.f32 %v6479_v30, %v679_v62 }
 0x167   : > { %v725_v8 = vadd.f32 %v709_v3, %v624_v5  ;;  %v1075_v3 = vld [vmem:[#allocation3 + $0x68] sm:$0xff] }
 0x169   : > { %v601_v0 = vpop.permute.xlu1 %600  ;;  %v826_v20 = vadd.f32 %v810_v9, %v725_v8  ;;  %v1079_v9 = vld [vmem:[#allocation3 + $0x88] sm:$0xff] }
 0x16a   : > { %v626_v29 = vmul.f32 %v6474_v28, %v601_v0 }
 0x16b   : > { %v849_v33 = vadd.f32 %v6501_v52, %v826_v20 }
 0x16c   : > { %v727_v37 = vadd.f32 %v711_v24, %v626_v29 }
 0x16d   : > { %v606_v2 = vpop.permute.xlu1 %605  ;;  %v865_v39 = vmax.f32 %v849_v33, 0.0  ;;  %v1123_v33 = vld [vmem:[#allocation3 + $0x1e8] sm:$0xff] }
 0x16e   : > { %v627_v17 = vmul.f32 %v6474_v28, %v606_v2  ;;  %v1071_v2 = vld [vmem:[#allocation3 + $0x48] sm:$0xff] }
 0x16f   : > { %v4887_v8 = vcombine.high %v1071_v2, %v1075_v3  ;;  %v4886_v11 = vcombine.low %v1071_v2, %v1075_v3 }
 0x172   : > { %v691_v10 = vpop.permute.xlu1 %690 }
 0x173   : > { %v712_v12 = vmul.f32 %v6479_v30, %v691_v10  ;;  %v1083_v10 = vld [vmem:[#allocation3 + $0xa8] sm:$0xff] }
 0x174   : > { %v4894_v15 = vcombine.low %v1079_v9, %v1083_v10 }
 0x175   : > { %v728_v21 = vadd.f32 %v712_v12, %v627_v17  ;;  %v4895_v12 = vcombine.high %v1079_v9, %v1083_v10  ;;  %v1095_v17 = vld [vmem:[#allocation3 + $0x108] sm:$0xff] }
 0x176   : > { %v4911_v20 = vcombine.high %v1095_v17, %v1099_v18  ;;  %v4910_v23 = vcombine.low %v1095_v17, %v1099_v18 }
 0x177   : > { %v784_v25 = vpop.permute.xlu1 %783  ;;  %v829_v34 = vadd.f32 %v813_v22, %v728_v21  ;;  %v1103_v21 = vld [vmem:[#allocation3 + $0x148] sm:$0xff] }
 0x178   : > { %v811_v32 = vmul.f32 %v6484_v31, %v784_v25  ;;  %v1107_v22 = vld [vmem:[#allocation3 + $0x168] sm:$0xff] }
 0x179   : > { %v852_v40 = vadd.f32 %v6501_v52, %v829_v34  ;;  %v4919_v24 = vcombine.high %v1103_v21, %v1107_v22  ;;  %v1111_v25 = vld [vmem:[#allocation3 + $0x188] sm:$0xff] }
 0x17a   : > { %v827_v35 = vadd.f32 %v811_v32, %v726_v27  ;;  %v4918_v27 = vcombine.low %v1103_v21, %v1107_v22  ;;  %v4927_v29 = vcombine.high %v1111_v25, %v1115_v26  ;;  %v1119_v32 = vld [vmem:[#allocation3 + $0x1c8] sm:$0xff]  ;;  %v4926_v34 = vcombine.low %v1111_v25, %v1115_v26  ;;  %v1072_v22 = vld [vmem:[#allocation3 + $0x50] sm:$0xff]  ;;  %v1113_v26 = vld [vmem:[#allocation3 + $0x198] sm:$0xff] }
 0x17b   : > { %v788_v36 = vpop.permute.xlu1 %787  ;;  %v868_v44 = vmax.f32 %v852_v40, 0.0  ;;  %v1076_v25 = vld [vmem:[#allocation3 + $0x70] sm:$0xff] }
 0x17c   : > { %v850_v38 = vadd.f32 %v6501_v52, %v827_v35  ;;  %v812_v30 = vmul.f32 %v6484_v31, %v788_v36  ;;  %v6575_v31 = vld [vmem:[#allocation3 + $0x10] sm:$0xff]  ;;  %v4935_v35 = vcombine.high %v1119_v32, %v1123_v33 }
 0x17d   : > { %v4881_v54 = vcombine.high %v6575_v31, %v6577_v53 }
 0x17e   : > { %v866_v28 = vmax.f32 %v850_v38, 0.0  ;;  %v828_v41 = vadd.f32 %v812_v30, %v727_v37  ;;  %v1065_v37 = vld [vmem:[#allocation3 + $0x18] sm:$0xff] }
 0x17f   : > { %1672 = vmatprep.subr.bf16.mxu1 %v4881_v54  ;;  %v1069_v38 = vld [vmem:[#allocation3 + $0x38] sm:$0xff] }
 0x180   : > { %v875_v42 = vpack.c.bf16 %v866_v28, %v865_v39  ;;  %v851_v43 = vadd.f32 %v6501_v52, %v828_v41  ;;  %v4880_v52 = vcombine.low %v6575_v31, %v6577_v53  ;;  %v4934_v41 = vcombine.low %v1119_v32, %v1123_v33  ;;  %v1096_v31 = vld [vmem:[#allocation3 + $0x110] sm:$0xff] }
 0x181   : > { %v1100_v53 = vld [vmem:[#allocation3 + $0x130] sm:$0xff] }
 0x182   : > { %v867_v47 = vmax.f32 %v851_v43, 0.0  ;;  %5334 = vmatprep.mubr.msk.bf16.mxu0 %vm916_vm0, %v875_v42 }
 0x184   : > { %v876_v45 = vpack.c.bf16 %v868_v44, %v867_v47  ;;  %v4883_v44 = vcombine.high %v1065_v37, %v1069_v38 }
 0x186   : > { %5335 = vmatmul.mubr.msk.bf16.gmra.mrb[12].mxu0 %vm916_vm0, %v876_v45 }
 0x187   : > { %1478 = vmatprep.mubr.bf16.mxu0 %v6193_v1 }
 0x1f2   : > { %v5324_v48 = vpop.f32.mrb[0].mxu0 }
 0x1f3   : > { %v984_v56 = vadd.f32 %v5324_v48, %v6586_v55  ;;  %v975_v57 = vpop.f32.mrb[1].mxu0  ;;  %v1073_v48 = vld [vmem:[#allocation3 + $0x58] sm:$0xff] }
 0x1f4   : > { %v976_v58 = vadd.f32 %v6586_v55, %v975_v57  ;;  %v5325_v59 = vpop.f32.mrb[2].mxu0  ;;  %v4882_v57 = vcombine.low %v1065_v37, %v1069_v38  ;;  %v1121_v38 = vld [vmem:[#allocation3 + $0x1d8] sm:$0xff] }
 0x1f5   : > { %v987_v60 = vadd.f32 %v5325_v59, %v6586_v55  ;;  %v978_v61 = vpop.f32.mrb[3].mxu0  ;;  %v1040_v63 = vmax.f32 %v984_v56, 0.0  ;;  %v1077_v56 = vld [vmem:[#allocation3 + $0x78] sm:$0xff] }
 0x1f6   : > { %v979_v62 = vadd.f32 %v6586_v55, %v978_v61  ;;  %v1038_v4 = vmax.f32 %v976_v58, 0.0  ;;  %v4891_v58 = vcombine.high %v1073_v48, %v1077_v56  ;;  %v1081_v59 = vld [vmem:[#allocation3 + $0x98] sm:$0xff]  ;;  %v4890_v61 = vcombine.low %v1073_v48, %v1077_v56  ;;  %v1104_v48 = vld [vmem:[#allocation3 + $0x150] sm:$0xff] }
 0x1f7   : > { %v1041_v0 = vmax.f32 %v987_v60, 0.0  ;;  %v1085_v60 = vld [vmem:[#allocation3 + $0xb8] sm:$0xff]  ;;  %v1108_v56 = vld [vmem:[#allocation3 + $0x170] sm:$0xff] }
 0x1f8   : > { %v1039_v5 = vmax.f32 %v979_v62, 0.0  ;;  %v4899_v62 = vcombine.high %v1081_v59, %v1085_v60  ;;  %v4898_v2 = vcombine.low %v1081_v59, %v1085_v60  ;;  %v1112_v59 = vld [vmem:[#allocation3 + $0x190] sm:$0xff] }
 0x1f9   : > { %v6592_v6 = vpack.c.bf16 %v1041_v0, %v1040_v63  ;;  %v1089_v63 = vld [vmem:[#allocation3 + $0xd8] sm:$0xff]  ;;  %v1116_v60 = vld [vmem:[#allocation3 + $0x1b0] sm:$0xff] }
 0x1fa   : > { %v6594_v7 = vpack.c.bf16 %v1039_v5, %v1038_v4  ;;  %v1093_v0 = vld [vmem:[#allocation3 + $0xf8] sm:$0xff] }
 0x1fb   : > { %v4907_v3 = vcombine.high %v1089_v63, %v1093_v0  ;;  %v1097_v4 = vld [vmem:[#allocation3 + $0x118] sm:$0xff] }
 0x1fc   : > { %1479 = vmatmul.mubr.bf16.vlgmr.msra.gmra.mrb[16].mxu0 %v6594_v7  ;;  %v1101_v5 = vld [vmem:[#allocation3 + $0x138] sm:$0xff] }
 0x1fd   : > { %1488 = vmatprep.mubr.bf16.mxu0 %v6193_v1  ;;  %1560 = vmatpush1.bf16.msra.mxu0 %v4878_v50  ;;  %v4915_v9 = vcombine.high %v1097_v4, %v1101_v5  ;;  %v4914_v17 = vcombine.low %v1097_v4, %v1101_v5 }
 0x1fe   : > { %1561 = vmatprep.subr.bf16.mxu0 %v4887_v8  ;;  %v4906_v8 = vcombine.low %v1089_v63, %v1093_v0  ;;  %v1120_v63 = vld [vmem:[#allocation3 + $0x1d0] sm:$0xff] }
 0x1ff   : > { %v1124_v0 = vld [vmem:[#allocation3 + $0x1f0] sm:$0xff] }
 0x201   : > { %1562 = vmatpush1.bf16.msra.mxu0 %v4886_v11  ;;  %v1105_v11 = vld [vmem:[#allocation3 + $0x158] sm:$0xff] }
 0x202   : > { %1563 = vmatprep.subr.bf16.mxu0 %v4895_v12  ;;  %v1109_v12 = vld [vmem:[#allocation3 + $0x178] sm:$0xff] }
 0x203   : > { %v4922_v33 = vcombine.low %v1105_v11, %v1109_v12 }
 0x204   : > { %1489 = vmatmul.mubr.bf16.gmra.mrb[20].mxu0 %v6592_v6 }
 0x205   : > { %1564 = vmatpush1.bf16.msra.mxu0 %v4894_v15  ;;  %1498 = vmatprep.mubr.bf16.mxu0 %v6193_v1 }
 0x206   : > { %1565 = vmatprep.subr.bf16.mxu0 %v4903_v16 }
 0x209   : > { %1566 = vmatpush1.bf16.msra.mxu0 %v4902_v19 }
 0x20a   : > { %1567 = vmatprep.subr.bf16.mxu0 %v4911_v20  ;;  %v4923_v20 = vcombine.high %v1105_v11, %v1109_v12  ;;  %v4936_v11 = vcombine.low %v1120_v63, %v1124_v0 }
 0x20d   : > { %1568 = vmatpush1.bf16.msra.mxu0 %v4910_v23 }
 0x20e   : > { %1569 = vmatprep.subr.bf16.mxu0 %v4919_v24 }
 0x211   : > { %1570 = vmatpush1.bf16.msra.mxu0 %v4918_v27  ;;  %v1117_v27 = vld [vmem:[#allocation3 + $0x1b8] sm:$0xff] }
 0x212   : > { %1571 = vmatprep.subr.bf16.mxu0 %v4927_v29  ;;  %v4931_v37 = vcombine.high %v1113_v26, %v1117_v27 }
 0x213   : > { %v5328_v36 = vpop.f32.mrb[4].mxu0 }
 0x214   : > { %v1000_v30 = vadd.f32 %v5328_v36, %v6586_v55  ;;  %v991_v39 = vpop.f32.mrb[5].mxu0  ;;  %v4889_v36 = vcombine.high %v1072_v22, %v1076_v25 }
 0x215   : > { %v992_v40 = vadd.f32 %v6586_v55, %v991_v39  ;;  %v5329_v28 = vpop.f32.mrb[6].mxu0  ;;  %1572 = vmatpush1.bf16.msra.mxu0 %v4926_v34  ;;  %v1080_v39 = vld [vmem:[#allocation3 + $0x90] sm:$0xff] }
 0x216   : > { %v1003_v42 = vadd.f32 %v5329_v28, %v6586_v55  ;;  %v994_v43 = vpop.f32.mrb[7].mxu0  ;;  %1573 = vmatprep.subr.bf16.mxu0 %v4935_v35  ;;  %v1044_v45 = vmax.f32 %v1000_v30, 0.0  ;;  %v1125_v30 = vld [vmem:[#allocation3 + $0x1f8] sm:$0xff]  ;;  %v4930_v28 = vcombine.low %v1113_v26, %v1117_v27 }
 0x217   : > { %v995_v47 = vadd.f32 %v6586_v55, %v994_v43  ;;  %v1042_v49 = vmax.f32 %v992_v40, 0.0  ;;  %v1084_v40 = vld [vmem:[#allocation3 + $0xb0] sm:$0xff] }
 0x218   : > { %v1045_v46 = vmax.f32 %v1003_v42, 0.0  ;;  %v4939_v42 = vcombine.high %v1121_v38, %v1125_v30  ;;  %v4897_v43 = vcombine.high %v1080_v39, %v1084_v40 }
 0x219   : > { %v1043_v50 = vmax.f32 %v995_v47, 0.0  ;;  %1574 = vmatpush1.bf16.msra.mxu0 %v4934_v41  ;;  %v4888_v41 = vcombine.low %v1072_v22, %v1076_v25  ;;  %v1092_v47 = vld [vmem:[#allocation3 + $0xf0] sm:$0xff] }
 0x21a   : > { %v6604_v51 = vpack.c.bf16 %v1045_v46, %v1044_v45  ;;  %1785 = vmatprep.subr.bf16.mxu0 %v4883_v44  ;;  %v1088_v44 = vld [vmem:[#allocation3 + $0xd0] sm:$0xff]  ;;  %v4938_v45 = vcombine.low %v1121_v38, %v1125_v30  ;;  %v4896_v46 = vcombine.low %v1080_v39, %v1084_v40  ;;  %v5524_v38 = vld [vmem:[#allocation6 + $0x28] ss:$16 sps:$4 sm:$0xff]   ;;  %v5526_v30 = vld [vmem:[#allocation6 + $0x2c] ss:$16 sps:$4 sm:$0xff]  }
 0x21b   : > { %v6606_v54 = vpack.c.bf16 %v1043_v50, %v1042_v49  ;;  %v4905_v49 = vcombine.high %v1088_v44, %v1092_v47  ;;  %v4913_v50 = vcombine.high %v1096_v31, %v1100_v53  ;;  %v5529_v39 = vld [vmem:[#allocation6 + $0x44] ss:$16 sps:$4 sm:$0xff]   ;;  %v5532_v40 = vld [vmem:[#allocation6 + $0x4c] ss:$16 sps:$4 sm:$0xff]  }
 0x21d   : > { %1499 = vmatmul.mubr.bf16.gmra.mrb[24].mxu0 %v6606_v54 }
 0x21e   : > { %1508 = vmatprep.mubr.bf16.mxu0 %v6193_v1 }
 0x225   : > { %1509 = vmatmul.mubr.bf16.gmra.mrb[28].mxu0 %v6604_v51 }
 0x226   : > { %1591 = vmatprep.mubr.bf16.mxu0 %v6193_v1 }
 0x22d   : > { %1592 = vmatmul.mubr.bf16.vlgmr.msra.gmra.mrb[32].mxu0 %v6594_v7 }
 0x22e   : > { %1786 = vmatpush1.bf16.msra.mxu0 %v4882_v57  ;;  %1601 = vmatprep.mubr.bf16.mxu0 %v6193_v1  ;;  %v4912_v57 = vcombine.low %v1096_v31, %v1100_v53  ;;  %v5542_v31 = vld [vmem:[#allocation6 + $0x88] ss:$16 sps:$4 sm:$0xff]  }
 0x22f   : > { %1787 = vmatprep.subr.bf16.mxu0 %v4891_v58  ;;  %v4921_v58 = vcombine.high %v1104_v48, %v1108_v56 }
 0x232   : > { %1788 = vmatpush1.bf16.msra.mxu0 %v4890_v61  ;;  %v4920_v61 = vcombine.low %v1104_v48, %v1108_v56 }
 0x233   : > { %1789 = vmatprep.subr.bf16.mxu0 %v4899_v62  ;;  %v4929_v62 = vcombine.high %v1112_v59, %v1116_v60 }
 0x235   : > { %1602 = vmatmul.mubr.bf16.gmra.mrb[36].mxu0 %v6592_v6 }
 0x236   : > { %1611 = vmatprep.mubr.bf16.mxu0 %v6193_v1  ;;  %1790 = vmatpush1.bf16.msra.mxu0 %v4898_v2  ;;  %v4928_v2 = vcombine.low %v1112_v59, %v1116_v60 }
 0x237   : > { %1791 = vmatprep.subr.bf16.mxu0 %v4907_v3  ;;  %v4937_v3 = vcombine.high %v1120_v63, %v1124_v0  ;;  %v5553_v0 = vld [vmem:[#allocation6 + $0xc4] ss:$16 sps:$4 sm:$0xff]  }
 0x238   : > { %v5332_v10 = vpop.f32.mrb[8].mxu0 }
 0x239   : > { %v1016_v13 = vadd.f32 %v5332_v10, %v6586_v55  ;;  %v1007_v14 = vpop.f32.mrb[9].mxu0 }
 0x23a   : > { %v1008_v15 = vadd.f32 %v6586_v55, %v1007_v14  ;;  %v5333_v16 = vpop.f32.mrb[10].mxu0  ;;  %1792 = vmatpush1.bf16.msra.mxu0 %v4906_v8 }
 0x23b   : > { %v1019_v18 = vadd.f32 %v5333_v16, %v6586_v55  ;;  %v1010_v19 = vpop.f32.mrb[11].mxu0  ;;  %1793 = vmatprep.subr.bf16.mxu0 %v4915_v9  ;;  %v1048_v23 = vmax.f32 %v1016_v13, 0.0 }
 0x23c   : > { %v1011_v21 = vadd.f32 %v6586_v55, %v1010_v19  ;;  %v1046_v29 = vmax.f32 %v1008_v15, 0.0 }
 0x23d   : > { %v1049_v24 = vmax.f32 %v1019_v18, 0.0  ;;  %1612 = vmatmul.mubr.bf16.gmra.mrb[40].mxu0 %v6606_v54 }
 0x23e   : > { %v1047_v32 = vmax.f32 %v1011_v21, 0.0  ;;  %1621 = vmatprep.mubr.bf16.mxu0 %v6193_v1  ;;  %1794 = vmatpush1.bf16.msra.mxu0 %v4914_v17 }
 0x23f   : > { %v6622_v34 = vpack.c.bf16 %v1049_v24, %v1048_v23  ;;  %1795 = vmatprep.subr.bf16.mxu0 %v4923_v20 }
 0x240   : > { %v6624_v35 = vpack.c.bf16 %v1047_v32, %v1046_v29 }
 0x242   : > { %1519 = vmatmul.mubr.bf16.vlgmr.msra.gmra.mrb[0].mxu1 %v6624_v35  ;;  %1796 = vmatpush1.bf16.msra.mxu0 %v4922_v33  ;;  %v5517_v33 = vld [vmem:[#allocation6 + $0x4] ss:$16 sps:$4 sm:$0xff]  }
 0x243   : > { %1528 = vmatprep.mubr.bf16.mxu1 %v6193_v1  ;;  %1673 = vmatpush1.bf16.msra.mxu1 %v4880_v52  ;;  %v4904_v52 = vcombine.low %v1088_v44, %v1092_v47  ;;  %v5536_v44 = vld [vmem:[#allocation6 + $0x68] ss:$16 sps:$4 sm:$0xff]   ;;  %v5538_v47 = vld [vmem:[#allocation6 + $0x6c] ss:$16 sps:$4 sm:$0xff]  }
 0x244   : > { %1674 = vmatprep.subr.bf16.mxu1 %v4889_v36  ;;  %1797 = vmatprep.subr.bf16.mxu0 %v4931_v37  ;;  %v5521_v36 = vld [vmem:[#allocation6 + $0x20] ss:$16 sps:$4 sm:$0xff]   ;;  %v5523_v37 = vld [vmem:[#allocation6 + $0x24] ss:$16 sps:$4 sm:$0xff]  }
 0x245   : > { %1622 = vmatmul.mubr.bf16.gmra.mrb[44].mxu0 %v6604_v51 }
 0x246   : > { %1631 = vmatprep.mubr.bf16.mxu0 %v6193_v1  ;;  %1798 = vmatpush1.bf16.msra.mxu0 %v4930_v28  ;;  %v5527_v28 = vld [vmem:[#allocation6 + $0x40] ss:$16 sps:$4 sm:$0xff]  }
 0x247   : > { %1675 = vmatpush1.bf16.msra.mxu1 %v4888_v41  ;;  %1799 = vmatprep.subr.bf16.mxu0 %v4939_v42  ;;  %v5530_v41 = vld [vmem:[#allocation6 + $0x48] ss:$16 sps:$4 sm:$0xff]   ;;  %v5533_v42 = vld [vmem:[#allocation6 + $0x60] ss:$16 sps:$4 sm:$0xff]  }
 0x248   : > { %1676 = vmatprep.subr.bf16.mxu1 %v4897_v43  ;;  %v5535_v43 = vld [vmem:[#allocation6 + $0x64] ss:$16 sps:$4 sm:$0xff]  }
 0x24a   : > { %1529 = vmatmul.mubr.bf16.gmra.mrb[4].mxu1 %v6622_v34  ;;  %1800 = vmatpush1.bf16.msra.mxu0 %v4938_v45  ;;  %v5541_v45 = vld [vmem:[#allocation6 + $0x84] ss:$16 sps:$4 sm:$0xff]  }
 0x24b   : > { %1677 = vmatpush1.bf16.msra.mxu1 %v4896_v46  ;;  %1538 = vmatprep.mubr.bf16.mxu1 %v6193_v1  ;;  %v5544_v46 = vld [vmem:[#allocation6 + $0x8c] ss:$16 sps:$4 sm:$0xff]  }
 0x24c   : > { %1678 = vmatprep.subr.bf16.mxu1 %v4905_v49  ;;  %v5539_v49 = vld [vmem:[#allocation6 + $0x80] ss:$16 sps:$4 sm:$0xff]  }
 0x24d   : > { %1632 = vmatmul.mubr.bf16.gmra.mrb[48].mxu0 %v6624_v35 }
 0x24e   : > { %1641 = vmatprep.mubr.bf16.mxu0 %v6193_v1 }
 0x24f   : > { %1679 = vmatpush1.bf16.msra.mxu1 %v4904_v52 }
 0x250   : > { %1680 = vmatprep.subr.bf16.mxu1 %v4913_v50 }
 0x253   : > { %1681 = vmatpush1.bf16.msra.mxu1 %v4912_v57  ;;  %v5545_v57 = vld [vmem:[#allocation6 + $0xa0] ss:$16 sps:$4 sm:$0xff]  }
 0x254   : > { %1682 = vmatprep.subr.bf16.mxu1 %v4921_v58  ;;  %v5547_v58 = vld [vmem:[#allocation6 + $0xa4] ss:$16 sps:$4 sm:$0xff]  }
 0x255   : > { %1642 = vmatmul.mubr.bf16.gmra.mrb[52].mxu0 %v6622_v34 }
 0x256   : > { %1651 = vmatprep.mubr.bf16.mxu0 %v6193_v1 }
 0x257   : > { %1683 = vmatpush1.bf16.msra.mxu1 %v4920_v61  ;;  %v5548_v61 = vld [vmem:[#allocation6 + $0xa8] ss:$16 sps:$4 sm:$0xff]  }
 0x258   : > { %1684 = vmatprep.subr.bf16.mxu1 %v4929_v62  ;;  %v5550_v62 = vld [vmem:[#allocation6 + $0xac] ss:$16 sps:$4 sm:$0xff]  }
 0x259   : > { %v5336_v4 = vpop.f32.mrb[12].mxu0 }
 0x25a   : > { %v1032_v5 = vadd.f32 %v5336_v4, %v6586_v55  ;;  %v1023_v8 = vpop.f32.mrb[13].mxu0  ;;  %v5554_v4 = vld [vmem:[#allocation6 + $0xc8] ss:$16 sps:$4 sm:$0xff]  }
 0x25b   : > { %v1024_v9 = vadd.f32 %v6586_v55, %v1023_v8  ;;  %v5337_v10 = vpop.f32.mrb[14].mxu0  ;;  %1685 = vmatpush1.bf16.msra.mxu1 %v4928_v2  ;;  %v5556_v2 = vld [vmem:[#allocation6 + $0xcc] ss:$16 sps:$4 sm:$0xff]  }
 0x25c   : > { %v1035_v12 = vadd.f32 %v5337_v10, %v6586_v55  ;;  %v1026_v13 = vpop.f32.mrb[15].mxu0  ;;  %1686 = vmatprep.subr.bf16.mxu1 %v4937_v3  ;;  %v1052_v15 = vmax.f32 %v1032_v5, 0.0  ;;  %v5551_v3 = vld [vmem:[#allocation6 + $0xc0] ss:$16 sps:$4 sm:$0xff]  }
 0x25d   : > { %v1027_v14 = vadd.f32 %v6586_v55, %v1026_v13  ;;  %v1050_v17 = vmax.f32 %v1024_v9, 0.0  ;;  %v5559_v13 = vld [vmem:[#allocation6 + $0xe4] ss:$16 sps:$4 sm:$0xff]  }
 0x25e   : > { %v1053_v16 = vmax.f32 %v1035_v12, 0.0  ;;  %v5557_v12 = vld [vmem:[#allocation6 + $0xe0] ss:$16 sps:$4 sm:$0xff]  }
 0x25f   : > { %v1051_v18 = vmax.f32 %v1027_v14, 0.0  ;;  %1687 = vmatpush1.bf16.msra.mxu1 %v4936_v11 }
 0x260   : > { %v1061_v19 = vpack.c.bf16 %v1053_v16, %v1052_v15  ;;  %3745 = vmatprep.subr.bf16.mxu1 %v5517_v33  ;;  %v5560_v16 = vld [vmem:[#allocation6 + $0xe8] ss:$16 sps:$4 sm:$0xff]   ;;  %v5575_v33 = vld [vmem:[#allocation6 + $0x140] ss:$16 sps:$4 sm:$0xff]  }
 0x261   : > { %v1060_v20 = vpack.c.bf16 %v1051_v18, %v1050_v17  ;;  %v5562_v17 = vld [vmem:[#allocation6 + $0xec] ss:$16 sps:$4 sm:$0xff]  }
 0x263   : > { %1539 = vmatmul.mubr.bf16.gmra.mrb[8].mxu1 %v1060_v20  ;;  %1652 = vmatmul.mubr.bf16.gmra.mrb[56].mxu0 %v1060_v20 }
 0x264   : > { %1548 = vmatprep.mubr.bf16.mxu1 %v6193_v1  ;;  %1661 = vmatprep.mubr.bf16.mxu0 %v6193_v1 }
 0x26b   : > { %1549 = vmatmul.mubr.bf16.gmra.mrb[12].mxu1 %v1061_v19  ;;  %1662 = vmatmul.mubr.bf16.gmra.mrb[60].mxu0 %v1061_v19 }
 0x26c   : > { %1704 = vmatprep.mubr.bf16.mxu1 %v6193_v1  ;;  %1817 = vmatprep.mubr.bf16.mxu0 %v6193_v1 }
 0x273   : > { %1705 = vmatmul.mubr.bf16.vlgmr.msra.gmra.mrb[16].mxu1 %v6594_v7  ;;  %1818 = vmatmul.mubr.bf16.vlgmr.msra.gmra.mrb[64].mxu0 %v6594_v7 }
 0x274   : > { %1714 = vmatprep.mubr.bf16.mxu1 %v6193_v1  ;;  %1827 = vmatprep.mubr.bf16.mxu0 %v6193_v1 }
 0x27b   : > { %1715 = vmatmul.mubr.bf16.gmra.mrb[20].mxu1 %v6592_v6  ;;  %1828 = vmatmul.mubr.bf16.gmra.mrb[68].mxu0 %v6592_v6 }
 0x27c   : > { %1724 = vmatprep.mubr.bf16.mxu1 %v6193_v1  ;;  %1837 = vmatprep.mubr.bf16.mxu0 %v6193_v1 }
 0x283   : > { %1725 = vmatmul.mubr.bf16.gmra.mrb[24].mxu1 %v6606_v54  ;;  %1838 = vmatmul.mubr.bf16.gmra.mrb[72].mxu0 %v6606_v54 }
 0x284   : > { %1734 = vmatprep.mubr.bf16.mxu1 %v6193_v1  ;;  %1847 = vmatprep.mubr.bf16.mxu0 %v6193_v1 }
 0x28b   : > { %1735 = vmatmul.mubr.bf16.gmra.mrb[28].mxu1 %v6604_v51  ;;  %1848 = vmatmul.mubr.bf16.gmra.mrb[76].mxu0 %v6604_v51 }
 0x28c   : > { %1744 = vmatprep.mubr.bf16.mxu1 %v6193_v1  ;;  %1857 = vmatprep.mubr.bf16.mxu0 %v6193_v1 }
 0x293   : > { %1745 = vmatmul.mubr.bf16.gmra.mrb[32].mxu1 %v6624_v35  ;;  %1858 = vmatmul.mubr.bf16.gmra.mrb[80].mxu0 %v6624_v35  ;;  %v5515_v35 = vld [vmem:[#allocation6] ss:$16 sps:$4 sm:$0xff]  }
 0x294   : > { %1754 = vmatprep.mubr.bf16.mxu1 %v6193_v1  ;;  %1867 = vmatprep.mubr.bf16.mxu0 %v6193_v1 }
 0x295   : > { %3746 = vmatpush1.bf16.msra.mxu1 %v5515_v35 }
 0x296   : > { %3747 = vmatprep.subr.bf16.mxu1 %v5523_v37 }
 0x299   : > { %3748 = vmatpush1.bf16.msra.mxu1 %v5521_v36 }
 0x29a   : > { %3749 = vmatprep.subr.bf16.mxu1 %v5529_v39  ;;  %v5586_v39 = vld [vmem:[#allocation6 + $0x16c] ss:$16 sps:$4 sm:$0xff]  }
 0x29b   : > { %1755 = vmatmul.mubr.bf16.gmra.mrb[36].mxu1 %v6622_v34  ;;  %1868 = vmatmul.mubr.bf16.gmra.mrb[84].mxu0 %v6622_v34  ;;  %v5520_v34 = vld [vmem:[#allocation6 + $0xc] ss:$16 sps:$4 sm:$0xff]  }
 0x29c   : > { %1764 = vmatprep.mubr.bf16.mxu1 %v6193_v1  ;;  %1877 = vmatprep.mubr.bf16.mxu0 %v6193_v1 }
 0x29d   : > { %3909 = vmatprep.subr.bf16.mxu0 %v5520_v34  ;;  %3750 = vmatpush1.bf16.msra.mxu1 %v5527_v28  ;;  %v5578_v34 = vld [vmem:[#allocation6 + $0x148] ss:$16 sps:$4 sm:$0xff]  }
 0x29e   : > { %3751 = vmatprep.subr.bf16.mxu1 %v5535_v43 }
 0x2a1   : > { %3752 = vmatpush1.bf16.msra.mxu1 %v5533_v42  ;;  %v5584_v42 = vld [vmem:[#allocation6 + $0x168] ss:$16 sps:$4 sm:$0xff]  }
 0x2a2   : > { %3753 = vmatprep.subr.bf16.mxu1 %v5541_v45  ;;  %v5587_v45 = vld [vmem:[#allocation6 + $0x180] ss:$16 sps:$4 sm:$0xff]  }
 0x2a3   : > { %1765 = vmatmul.mubr.bf16.gmra.mrb[40].mxu1 %v1060_v20  ;;  %1878 = vmatmul.mubr.bf16.gmra.mrb[88].mxu0 %v1060_v20  ;;  %v5568_v20 = vld [vmem:[#allocation6 + $0x10c] ss:$16 sps:$4 sm:$0xff]  }
 0x2a4   : > { %1774 = vmatprep.mubr.bf16.mxu1 %v6193_v1  ;;  %1887 = vmatprep.mubr.bf16.mxu0 %v6193_v1  ;;  %v5518_v1 = vld [vmem:[#allocation6 + $0x8] ss:$16 sps:$4 sm:$0xff]  }
 0x2a5   : > { %3910 = vmatpush1.bf16.msra.mxu0 %v5518_v1  ;;  %3754 = vmatpush1.bf16.msra.mxu1 %v5539_v49 }
 0x2a6   : > { %3911 = vmatprep.subr.bf16.mxu0 %v5526_v30  ;;  %3755 = vmatprep.subr.bf16.mxu1 %v5547_v58  ;;  %v5583_v30 = vld [vmem:[#allocation6 + $0x164] ss:$16 sps:$4 sm:$0xff]  }
 0x2a9   : > { %3912 = vmatpush1.bf16.msra.mxu0 %v5524_v38  ;;  %3756 = vmatpush1.bf16.msra.mxu1 %v5545_v57 }
 0x2aa   : > { %3913 = vmatprep.subr.bf16.mxu0 %v5532_v40  ;;  %3757 = vmatprep.subr.bf16.mxu1 %v5553_v0 }
 0x2ab   : > { %1775 = vmatmul.mubr.bf16.gmra.mrb[44].mxu1 %v1061_v19  ;;  %1888 = vmatmul.mubr.bf16.gmra.mrb[92].mxu0 %v1061_v19  ;;  %v5565_v19 = vld [vmem:[#allocation6 + $0x104] ss:$16 sps:$4 sm:$0xff]  }
 0x2ad   : > { %3914 = vmatpush1.bf16.msra.mxu0 %v5530_v41  ;;  %3758 = vmatpush1.bf16.msra.mxu1 %v5551_v3  ;;  %v5581_v41 = vld [vmem:[#allocation6 + $0x160] ss:$16 sps:$4 sm:$0xff]   ;;  %v5604_v3 = vld [vmem:[#allocation6 + $0x1cc] ss:$16 sps:$4 sm:$0xff]  }
 0x2ae   : > { %3915 = vmatprep.subr.bf16.mxu0 %v5538_v47  ;;  %3759 = vmatprep.subr.bf16.mxu1 %v5559_v13  ;;  %v5592_v47 = vld [vmem:[#allocation6 + $0x18c] ss:$16 sps:$4 sm:$0xff]  }
 0x2b1   : > { %3916 = vmatpush1.bf16.msra.mxu0 %v5536_v44  ;;  %3760 = vmatpush1.bf16.msra.mxu1 %v5557_v12  ;;  %v5589_v44 = vld [vmem:[#allocation6 + $0x184] ss:$16 sps:$4 sm:$0xff]   ;;  %v5602_v12 = vld [vmem:[#allocation6 + $0x1c8] ss:$16 sps:$4 sm:$0xff]  }
 0x2b2   : > { %3917 = vmatprep.subr.bf16.mxu0 %v5544_v46  ;;  %3761 = vmatprep.subr.bf16.mxu1 %v5565_v19  ;;  %v5590_v46 = vld [vmem:[#allocation6 + $0x188] ss:$16 sps:$4 sm:$0xff]  }
 0x2b5   : > { %3918 = vmatpush1.bf16.msra.mxu0 %v5542_v31 }
 0x2b6   : > { %3919 = vmatprep.subr.bf16.mxu0 %v5550_v62 }
 0x2b9   : > { %3920 = vmatpush1.bf16.msra.mxu0 %v5548_v61 }
 0x2ba   : > { %3921 = vmatprep.subr.bf16.mxu0 %v5556_v2  ;;  %v5601_v2 = vld [vmem:[#allocation6 + $0x1c4] ss:$16 sps:$4 sm:$0xff]  }
 0x2bd   : > { %3922 = vmatpush1.bf16.msra.mxu0 %v5554_v4 }
 0x2be   : > { %3923 = vmatprep.subr.bf16.mxu0 %v5562_v17 }
 0x2c1   : > { %3924 = vmatpush1.bf16.msra.mxu0 %v5560_v16 }
 0x2c2   : > { %3925 = vmatprep.subr.bf16.mxu0 %v5568_v20 }
 0x2cf   : > { %v1480_v55 = vpop.f32.mrb[16].mxu0 }
 0x2d0   : > { %v1482_v6 = vpop.f32.mrb[17].mxu0 }
 0x2d1   : > { %v1484_v7 = vpop.f32.mrb[18].mxu0 }
 0x2d2   : > { %v1898_v51 = vmax.f32 %v1480_v55, %v1484_v7  ;;  %v1486_v54 = vpop.f32.mrb[19].mxu0  ;;  %v5563_v55 = vld [vmem:[#allocation6 + $0x100] ss:$16 sps:$4 sm:$0xff]  }
 0x2d3   : > { %v1919_v21 = vmax.f32 %v1482_v6, %v1486_v54  ;;  %v5566_v6 = vld [vmem:[#allocation6 + $0x108] ss:$16 sps:$4 sm:$0xff]   ;;  %3762 = vmatpush1.bf16.msra.mxu1 %v5563_v55  ;;  %v5605_v55 = vld [vmem:[#allocation6 + $0x1e0] ss:$16 sps:$4 sm:$0xff]  }
 0x2d4   : > { %3926 = vmatpush1.bf16.msra.mxu0 %v5566_v6  ;;  %v5607_v6 = vld [vmem:[#allocation6 + $0x1e4] ss:$16 sps:$4 sm:$0xff]  }
 0x2d7   : > { %v1490_v22 = vpop.f32.mrb[20].mxu0 }
 0x2d8   : > { %v1899_v23 = vmax.f32 %v1898_v51, %v1490_v22  ;;  %v1492_v24 = vpop.f32.mrb[21].mxu0  ;;  %v5574_v22 = vld [vmem:[#allocation6 + $0x12c] ss:$16 sps:$4 sm:$0xff]  }
 0x2d9   : > { %v1920_v25 = vmax.f32 %v1919_v21, %v1492_v24  ;;  %v1494_v26 = vpop.f32.mrb[22].mxu0  ;;  %v5571_v21 = vld [vmem:[#allocation6 + $0x124] ss:$16 sps:$4 sm:$0xff]   ;;  %3927 = vmatprep.subr.bf16.mxu0 %v5574_v22 }
 0x2da   : > { %v1900_v27 = vmax.f32 %v1899_v23, %v1494_v26  ;;  %v1496_v29 = vpop.f32.mrb[23].mxu0  ;;  %v5572_v26 = vld [vmem:[#allocation6 + $0x128] ss:$16 sps:$4 sm:$0xff]   ;;  %3763 = vmatprep.subr.bf16.mxu1 %v5571_v21 }
 0x2db   : > { %v1921_v32 = vmax.f32 %v1920_v25, %v1496_v29  ;;  %v5569_v25 = vld [vmem:[#allocation6 + $0x120] ss:$16 sps:$4 sm:$0xff]   ;;  %3928 = vmatpush1.bf16.msra.mxu0 %v5572_v26  ;;  %v5577_v29 = vld [vmem:[#allocation6 + $0x144] ss:$16 sps:$4 sm:$0xff]  }
 0x2dc   : > { %3764 = vmatpush1.bf16.msra.mxu1 %v5569_v25 }
 0x2dd   : > { %3765 = vmatprep.subr.bf16.mxu1 %v5577_v29 }
 0x2e0   : > { %3766 = vmatpush1.bf16.msra.mxu1 %v5575_v33 }
 0x2e1   : > { %3767 = vmatprep.subr.bf16.mxu1 %v5583_v30 }
 0x2e4   : > { %3768 = vmatpush1.bf16.msra.mxu1 %v5581_v41 }
 0x2e5   : > { %3769 = vmatprep.subr.bf16.mxu1 %v5589_v44 }
 0x2e8   : > { %3770 = vmatpush1.bf16.msra.mxu1 %v5587_v45 }
 0x2f0   : > { %v1500_v53 = vpop.f32.mrb[24].mxu0 }
 0x2f1   : > { %v1901_v52 = vmax.f32 %v1900_v27, %v1500_v53  ;;  %v1502_v50 = vpop.f32.mrb[25].mxu0 }
 0x2f2   : > { %v1922_v48 = vmax.f32 %v1921_v32, %v1502_v50  ;;  %v1504_v56 = vpop.f32.mrb[26].mxu0  ;;  %v5580_v32 = vld [vmem:[#allocation6 + $0x14c] ss:$16 sps:$4 sm:$0xff]  }
 0x2f3   : > { %v1902_v59 = vmax.f32 %v1901_v52, %v1504_v56  ;;  %v1506_v60 = vpop.f32.mrb[27].mxu0  ;;  %3929 = vmatprep.subr.bf16.mxu0 %v5580_v32  ;;  %v5598_v56 = vld [vmem:[#allocation6 + $0x1ac] ss:$16 sps:$4 sm:$0xff]  }
 0x2f4   : > { %v1923_v63 = vmax.f32 %v1922_v48, %v1506_v60  ;;  %3930 = vmatpush1.bf16.msra.mxu0 %v5578_v34  ;;  %v5595_v48 = vld [vmem:[#allocation6 + $0x1a4] ss:$16 sps:$4 sm:$0xff]   ;;  %v5596_v60 = vld [vmem:[#allocation6 + $0x1a8] ss:$16 sps:$4 sm:$0xff]  }
 0x2f5   : > { %3931 = vmatprep.subr.bf16.mxu0 %v5586_v39  ;;  %3771 = vmatprep.subr.bf16.mxu1 %v5595_v48 }
 0x2f8   : > { %v1510_v5 = vpop.f32.mrb[28].mxu0  ;;  %3932 = vmatpush1.bf16.msra.mxu0 %v5584_v42 }
 0x2f9   : > { %v6673_v8 = vmax.f32 %v1902_v59, %v1510_v5  ;;  %v1512_v9 = vpop.f32.mrb[29].mxu0  ;;  %3933 = vmatprep.subr.bf16.mxu0 %v5592_v47  ;;  %v5593_v59 = vld [vmem:[#allocation6 + $0x1a0] ss:$16 sps:$4 sm:$0xff]  }
 0x2fa   : > { %v6675_v10 = vmax.f32 %v1923_v63, %v1512_v9  ;;  %v6677_v11 = vpop.f32.mrb[30].mxu0  ;;  %3772 = vmatpush1.bf16.msra.mxu1 %v5593_v59  ;;  %v5599_v9 = vld [vmem:[#allocation6 + $0x1c0] ss:$16 sps:$4 sm:$0xff]  }
 0x2fb   : > { %v1904_v14 = vmax.f32 %v6673_v8, %v6677_v11  ;;  %v6681_v15 = vpop.f32.mrb[31].mxu0  ;;  %3773 = vmatprep.subr.bf16.mxu1 %v5601_v2 }
 0x2fc   : > { %v1925_v18 = vmax.f32 %v6675_v10, %v6681_v15  ;;  %3934 = vmatpush1.bf16.msra.mxu0 %v5590_v46  ;;  %v5608_v15 = vld [vmem:[#allocation6 + $0x1e8] ss:$16 sps:$4 sm:$0xff]  }
 0x2fd   : > { %3935 = vmatprep.subr.bf16.mxu0 %v5598_v56 }
 0x2fe   : > { %3774 = vmatpush1.bf16.msra.mxu1 %v5599_v9 }
 0x2ff   : > { %3775 = vmatprep.subr.bf16.mxu1 %v5607_v6 }
 0x300   : > { %v1593_v7 = vpop.f32.mrb[32].mxu0  ;;  %3936 = vmatpush1.bf16.msra.mxu0 %v5596_v60 }
 0x301   : > { %v1595_v51 = vpop.f32.mrb[33].mxu0  ;;  %3937 = vmatprep.subr.bf16.mxu0 %v5604_v3 }
 0x302   : > { %v1597_v54 = vpop.f32.mrb[34].mxu0  ;;  %3776 = vmatpush1.bf16.msra.mxu1 %v5605_v55 }
 0x303   : > { %v1940_v23 = vmax.f32 %v1593_v7, %v1597_v54  ;;  %v1599_v24 = vpop.f32.mrb[35].mxu0 }
 0x304   : > { %v1961_v27 = vmax.f32 %v1595_v51, %v1599_v24  ;;  %3938 = vmatpush1.bf16.msra.mxu0 %v5602_v12  ;;  %v5616_v24 = vld [vmem:[#allocation6 + $0x20c] ss:$16 sps:$4 sm:$0xff]  }
 0x308   : > { %v1603_v35 = vpop.f32.mrb[36].mxu0 }
 0x309   : > { %v1941_v1 = vmax.f32 %v1940_v23, %v1603_v35  ;;  %v1605_v36 = vpop.f32.mrb[37].mxu0  ;;  %v5613_v23 = vld [vmem:[#allocation6 + $0x204] ss:$16 sps:$4 sm:$0xff]  }
 0x30a   : > { %v1962_v37 = vmax.f32 %v1961_v27, %v1605_v36  ;;  %v1607_v38 = vpop.f32.mrb[38].mxu0  ;;  %3786 = vmatprep.subr.bf16.mxu1 %v5613_v23 }
 0x30b   : > { %v1942_v40 = vmax.f32 %v1941_v1, %v1607_v38  ;;  %v1609_v28 = vpop.f32.mrb[39].mxu0 }
 0x30c   : > { %v1963_v43 = vmax.f32 %v1962_v37, %v1609_v28 }
 0x310   : > { %v1613_v49 = vpop.f32.mrb[40].mxu0 }
 0x311   : > { %v1943_v31 = vmax.f32 %v1942_v40, %v1613_v49  ;;  %v1615_v53 = vpop.f32.mrb[41].mxu0 }
 0x312   : > { %v1964_v52 = vmax.f32 %v1963_v43, %v1615_v53  ;;  %v1617_v50 = vpop.f32.mrb[42].mxu0 }
 0x313   : > { %v1944_v57 = vmax.f32 %v1943_v31, %v1617_v50  ;;  %v1619_v58 = vpop.f32.mrb[43].mxu0 }
 0x314   : > { %v1965_v61 = vmax.f32 %v1964_v52, %v1619_v58 }
 0x315   : > { %v1520_v62 = vpop.f32.mrb[0].mxu1 }
 0x316   : > { %v1905_v63 = vmax.f32 %v1904_v14, %v1520_v62  ;;  %v1522_v0 = vpop.f32.mrb[1].mxu1 }
 0x317   : > { %v1926_v4 = vmax.f32 %v1925_v18, %v1522_v0  ;;  %v1524_v5 = vpop.f32.mrb[2].mxu1  ;;  %v5610_v18 = vld [vmem:[#allocation6 + $0x1ec] ss:$16 sps:$4 sm:$0xff]  }
 0x318   : > { %v1906_v13 = vmax.f32 %v1905_v63, %v1524_v5  ;;  %v1526_v16 = vpop.f32.mrb[3].mxu1  ;;  %v1623_v17 = vpop.f32.mrb[44].mxu0  ;;  %3939 = vmatprep.subr.bf16.mxu0 %v5610_v18 }
 0x319   : > { %v1927_v19 = vmax.f32 %v1926_v4, %v1526_v16  ;;  %v1945_v20 = vmax.f32 %v1944_v57, %v1623_v17  ;;  %v1625_v8 = vpop.f32.mrb[45].mxu0  ;;  %3940 = vmatpush1.bf16.msra.mxu0 %v5608_v15  ;;  %v6195_v15 = vmov 1966171168  }
 0x31a   : > { %v1966_v11 = vmax.f32 %v1965_v61, %v1625_v8  ;;  %v1627_v14 = vpop.f32.mrb[46].mxu0  ;;  %3950 = vmatprep.subr.bf16.mxu0 %v5616_v24  ;;  %v2085_v18 = vunpack.c.l.s4 %v6195_v15 }
 0x31b   : > { %v1946_v7 = vmax.f32 %v1945_v20, %v1627_v14  ;;  %v1629_v10 = vpop.f32.mrb[47].mxu0 }
 0x31c   : > { %v1967_v51 = vmax.f32 %v1966_v11, %v1629_v10 }
 0x31d   : > { %v1530_v54 = vpop.f32.mrb[4].mxu1 }
 0x31e   : > { %v1907_v21 = vmax.f32 %v1906_v13, %v1530_v54  ;;  %v1532_v22 = vpop.f32.mrb[5].mxu1 }
 0x31f   : > { %v1928_v25 = vmax.f32 %v1927_v19, %v1532_v22  ;;  %v1534_v26 = vpop.f32.mrb[6].mxu1 }
 0x320   : > { %v1908_v27 = vmax.f32 %v1907_v21, %v1534_v26  ;;  %v1536_v29 = vpop.f32.mrb[7].mxu1  ;;  %v1633_v32 = vpop.f32.mrb[48].mxu0 }
 0x321   : > { %v1929_v33 = vmax.f32 %v1928_v25, %v1536_v29  ;;  %v1947_v34 = vmax.f32 %v1946_v7, %v1633_v32  ;;  %v1635_v35 = vpop.f32.mrb[49].mxu0 }
 0x322   : > { %v1968_v1 = vmax.f32 %v1967_v51, %v1635_v35  ;;  %v1637_v36 = vpop.f32.mrb[50].mxu0  ;;  %v2087_v51 = vlaneseq  ;;  %v2086_v35 = vunpack.c.0.s8 %v2085_v18 }
 0x323   : > { %v1948_v37 = vmax.f32 %v1947_v34, %v1637_v36  ;;  %v1639_v38 = vpop.f32.mrb[51].mxu0 }
 0x324   : > { %v1969_v30 = vmax.f32 %v1968_v1, %v1639_v38  ;;  %v6691_v1 = vshrl.u32 %v2087_v51, 7 }
 0x328   : > { %v1643_v39 = vpop.f32.mrb[52].mxu0 }
 0x329   : > { %v1949_v40 = vmax.f32 %v1948_v37, %v1643_v39  ;;  %v1645_v28 = vpop.f32.mrb[53].mxu0 }
 0x32a   : > { %v1970_v41 = vmax.f32 %v1969_v30, %v1645_v28  ;;  %v1647_v42 = vpop.f32.mrb[54].mxu0 }
 0x32b   : > { %v1950_v43 = vmax.f32 %v1949_v40, %v1647_v42  ;;  %v1649_v44 = vpop.f32.mrb[55].mxu0 }
 0x32c   : > { %v1971_v47 = vmax.f32 %v1970_v41, %v1649_v44 }
 0x336   : > { %v1540_v45 = vpop.f32.mrb[8].mxu1  ;;  %v1653_v46 = vpop.f32.mrb[56].mxu0 }
 0x337   : > { %v1909_v49 = vmax.f32 %v1908_v27, %v1540_v45  ;;  %v1951_v31 = vmax.f32 %v1950_v43, %v1653_v46  ;;  %v1542_v53 = vpop.f32.mrb[9].mxu1  ;;  %v1655_v52 = vpop.f32.mrb[57].mxu0 }
 0x338   : > { %v1930_v50 = vmax.f32 %v1929_v33, %v1542_v53  ;;  %v1972_v48 = vmax.f32 %v1971_v47, %v1655_v52  ;;  %v1544_v56 = vpop.f32.mrb[10].mxu1  ;;  %v1657_v57 = vpop.f32.mrb[58].mxu0 }
 0x339   : > { %v1910_v58 = vmax.f32 %v1909_v49, %v1544_v56  ;;  %v1952_v59 = vmax.f32 %v1951_v31, %v1657_v57  ;;  %v1546_v60 = vpop.f32.mrb[11].mxu1  ;;  %v1659_v61 = vpop.f32.mrb[59].mxu0  ;;  %v6694_v56 = vsub.s32 %v2086_v35, %v6691_v1 }
 0x33a   : > { %v1931_v62 = vmax.f32 %v1930_v50, %v1546_v60  ;;  %v1973_v63 = vmax.f32 %v1972_v48, %v1659_v61 }
 0x33e   : > { %v1550_v0 = vpop.f32.mrb[12].mxu1  ;;  %v1663_v2 = vpop.f32.mrb[60].mxu0 }
 0x33f   : > { %v1911_v3 = vmax.f32 %v1910_v58, %v1550_v0  ;;  %v1953_v4 = vmax.f32 %v1952_v59, %v1663_v2  ;;  %v1552_v5 = vpop.f32.mrb[13].mxu1  ;;  %v1665_v9 = vpop.f32.mrb[61].mxu0 }
 0x340   : > { %v1932_v12 = vmax.f32 %v1931_v62, %v1552_v5  ;;  %v1974_v13 = vmax.f32 %v1973_v63, %v1665_v9  ;;  %v1554_v16 = vpop.f32.mrb[14].mxu1  ;;  %v1667_v17 = vpop.f32.mrb[62].mxu0 }
 0x341   : > { %v1912_v19 = vmax.f32 %v1911_v3, %v1554_v16  ;;  %v1954_v20 = vmax.f32 %v1953_v4, %v1667_v17  ;;  %v1556_v8 = vpop.f32.mrb[15].mxu1  ;;  %v1669_v11 = vpop.f32.mrb[63].mxu0 }
 0x342   : > { %v1933_v14 = vmax.f32 %v1932_v12, %v1556_v8  ;;  %v1975_v55 = vmax.f32 %v1974_v13, %v1669_v11 }
 0x343   : > { %v1913_v6 = vrot.slane %v1912_v19, 4  ;;  %v1955_v7 = vrot.slane %v1954_v20, 4 }
 0x344   : > { %v1934_v10 = vrot.slane %v1933_v14, 4  ;;  %v1976_v54 = vrot.slane %v1975_v55, 4 }
 0x345   : > { %v1914_v21 = vmax.f32 %v1912_v19, %v1913_v6  ;;  %v1956_v22 = vmax.f32 %v1954_v20, %v1955_v7 }
 0x346   : > { %v1935_v23 = vmax.f32 %v1933_v14, %v1934_v10  ;;  %v1977_v24 = vmax.f32 %v1975_v55, %v1976_v54  ;;  %v1706_v25 = vpop.f32.mrb[16].mxu1  ;;  %v1819_v26 = vpop.f32.mrb[64].mxu0 }
 0x347   : > { %v1915_v27 = vrot.slane %v1914_v21, 2  ;;  %v1957_v29 = vrot.slane %v1956_v22, 2  ;;  %v1708_v32 = vpop.f32.mrb[17].mxu1  ;;  %v1821_v33 = vpop.f32.mrb[65].mxu0 }
 0x348   : > { %v1936_v34 = vrot.slane %v1935_v23, 2  ;;  %v1978_v36 = vrot.slane %v1977_v24, 2  ;;  %v1710_v37 = vpop.f32.mrb[18].mxu1  ;;  %v1823_v38 = vpop.f32.mrb[66].mxu0 }
 0x349   : > { %v1916_v30 = vmax.f32 %v1914_v21, %v1915_v27  ;;  %v1958_v39 = vmax.f32 %v1956_v22, %v1957_v29  ;;  %v1982_v40 = vmax.f32 %v1706_v25, %v1710_v37  ;;  %v2024_v28 = vmax.f32 %v1819_v26, %v1823_v38  ;;  %v1712_v41 = vpop.f32.mrb[19].mxu1  ;;  %v1825_v42 = vpop.f32.mrb[67].mxu0 }
 0x34a   : > { %v1937_v43 = vmax.f32 %v1935_v23, %v1936_v34  ;;  %v1979_v44 = vmax.f32 %v1977_v24, %v1978_v36  ;;  %v2003_v47 = vmax.f32 %v1708_v32, %v1712_v41  ;;  %v2045_v45 = vmax.f32 %v1821_v33, %v1825_v42 }
 0x34b   : > { %v1917_v46 = vrot.slane %v1916_v30, 1  ;;  %v1959_v49 = vrot.slane %v1958_v39, 1 }
 0x34c   : > { %v1938_v31 = vrot.slane %v1937_v43, 1  ;;  %v1980_v53 = vrot.slane %v1979_v44, 1 }
 0x34d   : > { %v1918_v52 = vmax.f32 %v1916_v30, %v1917_v46  ;;  %v1960_v50 = vmax.f32 %v1958_v39, %v1959_v49 }
 0x34e   : > { %v1939_v48 = vmax.f32 %v1937_v43, %v1938_v31  ;;  %v1981_v57 = vmax.f32 %v1979_v44, %v1980_v53  ;;  %v1716_v58 = vpop.f32.mrb[20].mxu1  ;;  %v1829_v59 = vpop.f32.mrb[68].mxu0 }
 0x34f   : > { %v1983_v60 = vmax.f32 %v1982_v40, %v1716_v58  ;;  %v2025_v61 = vmax.f32 %v2024_v28, %v1829_v59  ;;  %v1718_v62 = vpop.f32.mrb[21].mxu1  ;;  %v1831_v63 = vpop.f32.mrb[69].mxu0 }
 0x350   : > { %v2080_v0 = vcombine.low %v1918_v52, %v1939_v48  ;;  %v2081_v2 = vcombine.low %v1960_v50, %v1981_v57  ;;  %v2004_v3 = vmax.f32 %v2003_v47, %v1718_v62  ;;  %v2046_v4 = vmax.f32 %v2045_v45, %v1831_v63  ;;  %v1720_v5 = vpop.f32.mrb[22].mxu1  ;;  %v1833_v9 = vpop.f32.mrb[70].mxu0 }
 0x351   : > { %v1984_v12 = vmax.f32 %v1983_v60, %v1720_v5  ;;  %v2026_v13 = vmax.f32 %v2025_v61, %v1833_v9  ;;  %v1722_v16 = vpop.f32.mrb[23].mxu1  ;;  %v1835_v17 = vpop.f32.mrb[71].mxu0 }
 0x352   : > { %v6697_v19 = vrot.slane %v2080_v0, %v6694_v56  ;;  %v6700_v20 = vrot.slane %v2081_v2, %v6694_v56  ;;  %v2005_v8 = vmax.f32 %v2004_v3, %v1722_v16  ;;  %v2047_v11 = vmax.f32 %v2046_v4, %v1835_v17 }
 0x354   : > { %v2112_v14 = vcombine.low %v6697_v19, %v6700_v20 }
 0x356   : > { %v1726_v55 = vpop.f32.mrb[24].mxu1  ;;  %v1839_v6 = vpop.f32.mrb[72].mxu0 }
 0x357   : > { %v1985_v7 = vmax.f32 %v1984_v12, %v1726_v55  ;;  %v2027_v10 = vmax.f32 %v2026_v13, %v1839_v6  ;;  %v1728_v15 = vpop.f32.mrb[25].mxu1  ;;  %v1841_v18 = vpop.f32.mrb[73].mxu0 }
 0x358   : > { %v2006_v51 = vmax.f32 %v2005_v8, %v1728_v15  ;;  %v2048_v54 = vmax.f32 %v2047_v11, %v1841_v18  ;;  %v1730_v21 = vpop.f32.mrb[26].mxu1  ;;  %v1843_v22 = vpop.f32.mrb[74].mxu0 }
 0x359   : > { %v1986_v23 = vmax.f32 %v1985_v7, %v1730_v21  ;;  %v2028_v24 = vmax.f32 %v2027_v10, %v1843_v22  ;;  %v1732_v25 = vpop.f32.mrb[27].mxu1  ;;  %v1845_v26 = vpop.f32.mrb[75].mxu0 }
 0x35a   : > { %v2007_v27 = vmax.f32 %v2006_v51, %v1732_v25  ;;  %v2049_v29 = vmax.f32 %v2048_v54, %v1845_v26 }
 0x35e   : > { %v1736_v32 = vpop.f32.mrb[28].mxu1  ;;  %v1849_v33 = vpop.f32.mrb[76].mxu0 }
 0x35f   : > { %v1987_v34 = vmax.f32 %v1986_v23, %v1736_v32  ;;  %v2029_v35 = vmax.f32 %v2028_v24, %v1849_v33  ;;  %v1738_v36 = vpop.f32.mrb[29].mxu1  ;;  %v1851_v37 = vpop.f32.mrb[77].mxu0 }
 0x360   : > { %v2008_v38 = vmax.f32 %v2007_v27, %v1738_v36  ;;  %v2050_v30 = vmax.f32 %v2049_v29, %v1851_v37  ;;  %v1740_v39 = vpop.f32.mrb[30].mxu1  ;;  %v1853_v40 = vpop.f32.mrb[78].mxu0 }
 0x361   : > { %v1988_v28 = vmax.f32 %v1987_v34, %v1740_v39  ;;  %v2030_v41 = vmax.f32 %v2029_v35, %v1853_v40  ;;  %v1742_v42 = vpop.f32.mrb[31].mxu1  ;;  %v1855_v43 = vpop.f32.mrb[79].mxu0 }
 0x362   : > { %v2009_v44 = vmax.f32 %v2008_v38, %v1742_v42  ;;  %v2051_v47 = vmax.f32 %v2050_v30, %v1855_v43 }
 0x366   : > { %v1746_v45 = vpop.f32.mrb[32].mxu1  ;;  %v1859_v46 = vpop.f32.mrb[80].mxu0 }
 0x367   : > { %v1989_v49 = vmax.f32 %v1988_v28, %v1746_v45  ;;  %v2031_v31 = vmax.f32 %v2030_v41, %v1859_v46  ;;  %v1748_v53 = vpop.f32.mrb[33].mxu1  ;;  %v1861_v52 = vpop.f32.mrb[81].mxu0 }
 0x368   : > { %v2010_v50 = vmax.f32 %v2009_v44, %v1748_v53  ;;  %v2052_v48 = vmax.f32 %v2051_v47, %v1861_v52  ;;  %v1750_v57 = vpop.f32.mrb[34].mxu1  ;;  %v1863_v58 = vpop.f32.mrb[82].mxu0 }
 0x369   : > { %v1990_v59 = vmax.f32 %v1989_v49, %v1750_v57  ;;  %v2032_v60 = vmax.f32 %v2031_v31, %v1863_v58  ;;  %v1752_v61 = vpop.f32.mrb[35].mxu1  ;;  %v1865_v62 = vpop.f32.mrb[83].mxu0 }
 0x36a   : > { %v2011_v63 = vmax.f32 %v2010_v50, %v1752_v61  ;;  %v2053_v0 = vmax.f32 %v2052_v48, %v1865_v62 }
 0x36e   : > { %v1756_v2 = vpop.f32.mrb[36].mxu1  ;;  %v1869_v3 = vpop.f32.mrb[84].mxu0 }
 0x36f   : > { %v1991_v4 = vmax.f32 %v1990_v59, %v1756_v2  ;;  %v2033_v5 = vmax.f32 %v2032_v60, %v1869_v3  ;;  %v1758_v9 = vpop.f32.mrb[37].mxu1  ;;  %v1871_v12 = vpop.f32.mrb[85].mxu0 }
 0x370   : > { %v2012_v13 = vmax.f32 %v2011_v63, %v1758_v9  ;;  %v2054_v16 = vmax.f32 %v2053_v0, %v1871_v12  ;;  %v1760_v17 = vpop.f32.mrb[38].mxu1  ;;  %v1873_v8 = vpop.f32.mrb[86].mxu0 }
 0x371   : > { %v1992_v11 = vmax.f32 %v1991_v4, %v1760_v17  ;;  %v2034_v55 = vmax.f32 %v2033_v5, %v1873_v8  ;;  %v1762_v6 = vpop.f32.mrb[39].mxu1  ;;  %v1875_v7 = vpop.f32.mrb[87].mxu0 }
 0x372   : > { %v2013_v10 = vmax.f32 %v2012_v13, %v1762_v6  ;;  %v2055_v15 = vmax.f32 %v2054_v16, %v1875_v7 }
 0x376   : > { %v1766_v18 = vpop.f32.mrb[40].mxu1  ;;  %v1879_v51 = vpop.f32.mrb[88].mxu0 }
 0x377   : > { %v1993_v54 = vmax.f32 %v1992_v11, %v1766_v18  ;;  %v2035_v21 = vmax.f32 %v2034_v55, %v1879_v51  ;;  %v1768_v22 = vpop.f32.mrb[41].mxu1  ;;  %v1881_v23 = vpop.f32.mrb[89].mxu0 }
 0x378   : > { %v2014_v24 = vmax.f32 %v2013_v10, %v1768_v22  ;;  %v2056_v25 = vmax.f32 %v2055_v15, %v1881_v23  ;;  %v1770_v26 = vpop.f32.mrb[42].mxu1  ;;  %v1883_v27 = vpop.f32.mrb[90].mxu0  ;;  %v2136_v22 = vld [vmem:[%s6874_s6] sm:$0xff] }
 0x379   : > { %v1994_v29 = vmax.f32 %v1993_v54, %v1770_v26  ;;  %v2036_v32 = vmax.f32 %v2035_v21, %v1883_v27  ;;  %v1772_v33 = vpop.f32.mrb[43].mxu1  ;;  %v1885_v34 = vpop.f32.mrb[91].mxu0  ;;  %v2120_v54 = vrot.slane %v2112_v14, %v6694_v56  ;;  %v2153_v26 = vsub.s32 3, %v6691_v1 }
 0x37a   : > { %v2015_v35 = vmax.f32 %v2014_v24, %v1772_v33  ;;  %v2057_v36 = vmax.f32 %v2056_v25, %v1885_v34  ;;  %v6715_v24 = vsub.s32 1, %v6691_v1  ;;  %v6718_v25 = vsub.s32 0, %v6691_v1  ;;  %v5619_v34 = vld [vmem:[#allocation6 + $0x224] ss:$16 sps:$4 sm:$0xff]  }
 0x37e   : > { %v1776_v37 = vpop.f32.mrb[44].mxu1  ;;  %v1889_v38 = vpop.f32.mrb[92].mxu0 }
 0x37f   : > { %v1995_v30 = vmax.f32 %v1994_v29, %v1776_v37  ;;  %v2037_v39 = vmax.f32 %v2036_v32, %v1889_v38  ;;  %v1778_v40 = vpop.f32.mrb[45].mxu1  ;;  %v1891_v28 = vpop.f32.mrb[93].mxu0  ;;  %v5611_v29 = vld [vmem:[#allocation6 + $0x200] ss:$16 sps:$4 sm:$0xff]   ;;  %v5614_v32 = vld [vmem:[#allocation6 + $0x208] ss:$16 sps:$4 sm:$0xff]  }
 0x380   : > { %v2016_v41 = vmax.f32 %v2015_v35, %v1778_v40  ;;  %v2058_v42 = vmax.f32 %v2057_v36, %v1891_v28  ;;  %v1780_v43 = vpop.f32.mrb[46].mxu1  ;;  %v1893_v44 = vpop.f32.mrb[94].mxu0  ;;  %v5622_v35 = vld [vmem:[#allocation6 + $0x22c] ss:$16 sps:$4 sm:$0xff]   ;;  %v5617_v37 = vld [vmem:[#allocation6 + $0x220] ss:$16 sps:$4 sm:$0xff]  }
 0x381   : > { %v1996_v47 = vmax.f32 %v1995_v30, %v1780_v43  ;;  %v2038_v45 = vmax.f32 %v2037_v39, %v1893_v44  ;;  %v1782_v46 = vpop.f32.mrb[47].mxu1  ;;  %v1895_v49 = vpop.f32.mrb[95].mxu0  ;;  %v5620_v38 = vld [vmem:[#allocation6 + $0x228] ss:$16 sps:$4 sm:$0xff]   ;;  %v5625_v30 = vld [vmem:[#allocation6 + $0x244] ss:$16 sps:$4 sm:$0xff]  }
 0x382   : > { %v2017_v31 = vmax.f32 %v2016_v41, %v1782_v46  ;;  %v2059_v53 = vmax.f32 %v2058_v42, %v1895_v49  ;;  %v5628_v39 = vld [vmem:[#allocation6 + $0x24c] ss:$16 sps:$4 sm:$0xff]   ;;  %v5623_v40 = vld [vmem:[#allocation6 + $0x240] ss:$16 sps:$4 sm:$0xff]   ;;  %v5626_v28 = vld [vmem:[#allocation6 + $0x248] ss:$16 sps:$4 sm:$0xff]  }
 0x383   : > { %v1997_v52 = vrot.slane %v1996_v47, 4  ;;  %v2039_v50 = vrot.slane %v2038_v45, 4  ;;  %v5631_v41 = vld [vmem:[#allocation6 + $0x264] ss:$16 sps:$4 sm:$0xff]   ;;  %v5634_v42 = vld [vmem:[#allocation6 + $0x26c] ss:$16 sps:$4 sm:$0xff]  }
 0x384   : > { %v2018_v48 = vrot.slane %v2017_v31, 4  ;;  %v2060_v57 = vrot.slane %v2059_v53, 4  ;;  %v5629_v43 = vld [vmem:[#allocation6 + $0x260] ss:$16 sps:$4 sm:$0xff]   ;;  %v5632_v44 = vld [vmem:[#allocation6 + $0x268] ss:$16 sps:$4 sm:$0xff]  }
 0x385   : > { %v1998_v58 = vmax.f32 %v1996_v47, %v1997_v52  ;;  %v2040_v59 = vmax.f32 %v2038_v45, %v2039_v50  ;;  %v5637_v47 = vld [vmem:[#allocation6 + $0x284] ss:$16 sps:$4 sm:$0xff]   ;;  %v5640_v45 = vld [vmem:[#allocation6 + $0x28c] ss:$16 sps:$4 sm:$0xff]   ;;  %v5635_v46 = vld [vmem:[#allocation6 + $0x280] ss:$16 sps:$4 sm:$0xff]  }
 0x386   : > { %v2019_v60 = vmax.f32 %v2017_v31, %v2018_v48  ;;  %v2061_v61 = vmax.f32 %v2059_v53, %v2060_v57  ;;  %v5638_v49 = vld [vmem:[#allocation6 + $0x288] ss:$16 sps:$4 sm:$0xff]   ;;  %v5643_v31 = vld [vmem:[#allocation6 + $0x2a4] ss:$16 sps:$4 sm:$0xff]   ;;  %v5646_v53 = vld [vmem:[#allocation6 + $0x2ac] ss:$16 sps:$4 sm:$0xff]  }
 0x387   : > { %v1999_v62 = vrot.slane %v1998_v58, 2  ;;  %v2041_v63 = vrot.slane %v2040_v59, 2  ;;  %v5641_v52 = vld [vmem:[#allocation6 + $0x2a0] ss:$16 sps:$4 sm:$0xff]   ;;  %v5644_v50 = vld [vmem:[#allocation6 + $0x2a8] ss:$16 sps:$4 sm:$0xff]  }
 0x388   : > { %v2020_v0 = vrot.slane %v2019_v60, 2  ;;  %v2062_v2 = vrot.slane %v2061_v61, 2  ;;  %v5649_v48 = vld [vmem:[#allocation6 + $0x2c4] ss:$16 sps:$4 sm:$0xff]   ;;  %v5652_v57 = vld [vmem:[#allocation6 + $0x2cc] ss:$16 sps:$4 sm:$0xff]  }
 0x389   : > { %v2000_v3 = vmax.f32 %v1998_v58, %v1999_v62  ;;  %v2042_v4 = vmax.f32 %v2040_v59, %v2041_v63  ;;  %v5647_v58 = vld [vmem:[#allocation6 + $0x2c0] ss:$16 sps:$4 sm:$0xff]   ;;  %v5650_v59 = vld [vmem:[#allocation6 + $0x2c8] ss:$16 sps:$4 sm:$0xff]  }
 0x38a   : > { %v2021_v5 = vmax.f32 %v2019_v60, %v2020_v0  ;;  %v2063_v9 = vmax.f32 %v2061_v61, %v2062_v2  ;;  %v5655_v60 = vld [vmem:[#allocation6 + $0x2e4] ss:$16 sps:$4 sm:$0xff]   ;;  %v5658_v61 = vld [vmem:[#allocation6 + $0x2ec] ss:$16 sps:$4 sm:$0xff]   ;;  %v5653_v62 = vld [vmem:[#allocation6 + $0x2e0] ss:$16 sps:$4 sm:$0xff]  }
 0x38b   : > { %v2001_v12 = vrot.slane %v2000_v3, 1  ;;  %v2043_v13 = vrot.slane %v2042_v4, 1  ;;  %v5656_v63 = vld [vmem:[#allocation6 + $0x2e8] ss:$16 sps:$4 sm:$0xff]   ;;  %v5661_v0 = vld [vmem:[#allocation6 + $0x304] ss:$16 sps:$4 sm:$0xff]  }
 0x38c   : > { %v2022_v16 = vrot.slane %v2021_v5, 1  ;;  %v2064_v17 = vrot.slane %v2063_v9, 1  ;;  %v5664_v2 = vld [vmem:[#allocation6 + $0x30c] ss:$16 sps:$4 sm:$0xff]  }
 0x38d   : > { %v2002_v8 = vmax.f32 %v2000_v3, %v2001_v12  ;;  %v2044_v11 = vmax.f32 %v2042_v4, %v2043_v13  ;;  %v5659_v3 = vld [vmem:[#allocation6 + $0x300] ss:$16 sps:$4 sm:$0xff]   ;;  %v5662_v4 = vld [vmem:[#allocation6 + $0x308] ss:$16 sps:$4 sm:$0xff]  }
 0x38e   : > { %v2023_v55 = vmax.f32 %v2021_v5, %v2022_v16  ;;  %v2065_v6 = vmax.f32 %v2063_v9, %v2064_v17  ;;  %v5667_v5 = vld [vmem:[#allocation6 + $0x324] ss:$16 sps:$4 sm:$0xff]   ;;  %v5670_v9 = vld [vmem:[#allocation6 + $0x32c] ss:$16 sps:$4 sm:$0xff]   ;;  %v5665_v12 = vld [vmem:[#allocation6 + $0x320] ss:$16 sps:$4 sm:$0xff]  }
 0x38f   : > { %v5668_v13 = vld [vmem:[#allocation6 + $0x328] ss:$16 sps:$4 sm:$0xff]   ;;  %v5673_v16 = vld [vmem:[#allocation6 + $0x344] ss:$16 sps:$4 sm:$0xff]   ;;  %v5676_v17 = vld [vmem:[#allocation6 + $0x34c] ss:$16 sps:$4 sm:$0xff]  }
 0x390   : > { %v2082_v7 = vcombine.low %v2002_v8, %v2023_v55  ;;  %v2083_v10 = vcombine.low %v2044_v11, %v2065_v6  ;;  %v5671_v8 = vld [vmem:[#allocation6 + $0x340] ss:$16 sps:$4 sm:$0xff]   ;;  %v5674_v11 = vld [vmem:[#allocation6 + $0x348] ss:$16 sps:$4 sm:$0xff]   ;;  %v5679_v55 = vld [vmem:[#allocation6 + $0x364] ss:$16 sps:$4 sm:$0xff]  }
 0x391   : > { %v5682_v6 = vld [vmem:[#allocation6 + $0x36c] ss:$16 sps:$4 sm:$0xff]  }
 0x392   : > { %v2104_v15 = vrot.slane %v2082_v7, %v6694_v56  ;;  %v2111_v18 = vrot.slane %v2083_v10, %v6694_v56  ;;  %v5677_v7 = vld [vmem:[#allocation6 + $0x360] ss:$16 sps:$4 sm:$0xff]   ;;  %v5680_v10 = vld [vmem:[#allocation6 + $0x368] ss:$16 sps:$4 sm:$0xff]  }
 0x394   : > { %v2113_v51 = vcombine.low %v2104_v15, %v2111_v18  ;;  %v5685_v15 = vld [vmem:[#allocation6 + $0x384] ss:$16 sps:$4 sm:$0xff]   ;;  %v5688_v18 = vld [vmem:[#allocation6 + $0x38c] ss:$16 sps:$4 sm:$0xff]  }
 0x396   : > { %v2127_v21 = vrot.slane %v2113_v51, %v6694_v56  ;;  %v5683_v51 = vld [vmem:[#allocation6 + $0x380] ss:$16 sps:$4 sm:$0xff]  }
 0x398   : > { %v2128_v23 = vcombine.low %v2120_v54, %v2127_v21  ;;  %v5686_v54 = vld [vmem:[#allocation6 + $0x388] ss:$16 sps:$4 sm:$0xff]   ;;  %v5691_v21 = vld [vmem:[#allocation6 + $0x3a4] ss:$16 sps:$4 sm:$0xff]  }
 0x39a   : > { %v6721_v27 = vadd.f32 %v2136_v22, %v2128_v23  ;;  %v5694_v22 = vld [vmem:[#allocation6 + $0x3ac] ss:$16 sps:$4 sm:$0xff]   ;;  %v5689_v23 = vld [vmem:[#allocation6 + $0x3a0] ss:$16 sps:$4 sm:$0xff]  }
 0x39c   : > { %v2146_v19 = vrot.slane %v6721_v27, %v6715_v24  ;;  %v2142_v56 = vrot.slane %v6721_v27, %v6718_v25  ;;  %v2154_v20 = vrot.slane %v6721_v27, %v2153_v26 }
 0x39e   : > { %v2180_v14 = vpack.c.bf16 %v2146_v19, %v2146_v19  ;;  %v2179_v33 = vpack.c.bf16 %v2142_v56, %v2142_v56  ;;  %v2182_v36 = vpack.c.bf16 %v2154_v20, %v2154_v20  ;;  %v5692_v19 = vld [vmem:[#allocation6 + $0x3a8] ss:$16 sps:$4 sm:$0xff]   ;;  %v5697_v56 = vld [vmem:[#allocation6 + $0x3c4] ss:$16 sps:$4 sm:$0xff]   ;;  %v5700_v20 = vld [vmem:[#allocation6 + $0x3cc] ss:$16 sps:$4 sm:$0xff]  }
 0x3a0   : > { %3777 = vmatprep.mubr.bf16.mxu1 %v2180_v14  ;;  %3941 = vmatprep.mubr.bf16.mxu0 %v2180_v14  ;;  %v5695_v14 = vld [vmem:[#allocation6 + $0x3c0] ss:$16 sps:$4 sm:$0xff]  }
 0x3a1   : > { %3778 = vmatmul.mubr.bf16.vlgmr.msra.gmra.mrb[48].mxu1 %v2179_v33  ;;  %3942 = vmatmul.mubr.bf16.vlgmr.msra.gmra.mrb[96].mxu0 %v2179_v33  ;;  %v5706_v33 = vld [vmem:[#allocation6 + $0x3ec] ss:$16 sps:$4 sm:$0xff]  }
 0x3a2   : > { %3787 = vmatpush1.bf16.msra.mxu1 %v5611_v29  ;;  %3951 = vmatpush1.bf16.msra.mxu0 %v5614_v32  ;;  %v5698_v29 = vld [vmem:[#allocation6 + $0x3c8] ss:$16 sps:$4 sm:$0xff]   ;;  %v5703_v32 = vld [vmem:[#allocation6 + $0x3e4] ss:$16 sps:$4 sm:$0xff]  }
 0x3a3   : > { %3818 = vmatprep.mubr.bf16.mxu1 %v2182_v36  ;;  %3982 = vmatprep.mubr.bf16.mxu0 %v2182_v36  ;;  %v5701_v36 = vld [vmem:[#allocation6 + $0x3e0] ss:$16 sps:$4 sm:$0xff]  }
 0x3a4   : > { %3788 = vmatprep.subr.bf16.mxu1 %v5619_v34  ;;  %3952 = vmatprep.subr.bf16.mxu0 %v5622_v35  ;;  %v2149_v34 = vsub.s32 2, %v6691_v1  ;;  %v2161_v35 = vsub.s32 5, %v6691_v1 }
 0x3a6   : > { %3789 = vmatpush1.bf16.msra.mxu1 %v5617_v37  ;;  %3953 = vmatpush1.bf16.msra.mxu0 %v5620_v38  ;;  %v5704_v37 = vld [vmem:[#allocation6 + $0x3e8] ss:$16 sps:$4 sm:$0xff]   ;;  %v2150_v38 = vrot.slane %v6721_v27, %v2149_v34 }
 0x3a7   : > { %3790 = vmatprep.subr.bf16.mxu1 %v5625_v30  ;;  %3954 = vmatprep.subr.bf16.mxu0 %v5628_v39  ;;  %v5709_v30 = vld [vmem:[#allocation6 + $0x404] ss:$16 sps:$4 sm:$0xff]   ;;  %v5712_v39 = vld [vmem:[#allocation6 + $0x40c] ss:$16 sps:$4 sm:$0xff]  }
 0x3aa   : > { %3791 = vmatpush1.bf16.msra.mxu1 %v5623_v40  ;;  %3955 = vmatpush1.bf16.msra.mxu0 %v5626_v28  ;;  %v2162_v40 = vrot.slane %v6721_v27, %v2161_v35  ;;  %v5707_v28 = vld [vmem:[#allocation6 + $0x400] ss:$16 sps:$4 sm:$0xff]   ;;  %v5782_v35 = vld [vmem:[#allocation6 + $0x588] ss:$16 sps:$4 sm:$0xff]  }
 0x3ab   : > { %3792 = vmatprep.subr.bf16.mxu1 %v5631_v41  ;;  %3956 = vmatprep.subr.bf16.mxu0 %v5634_v42  ;;  %v2181_v41 = vpack.c.bf16 %v2150_v38, %v2150_v38  ;;  %v5710_v42 = vld [vmem:[#allocation6 + $0x408] ss:$16 sps:$4 sm:$0xff]   ;;  %v5785_v38 = vld [vmem:[#allocation6 + $0x5a0] ss:$16 sps:$4 sm:$0xff]  }
 0x3ae   : > { %3793 = vmatpush1.bf16.msra.mxu1 %v5629_v43  ;;  %3957 = vmatpush1.bf16.msra.mxu0 %v5632_v44  ;;  %v2184_v43 = vpack.c.bf16 %v2162_v40, %v2162_v40  ;;  %v5715_v44 = vld [vmem:[#allocation6 + $0x424] ss:$16 sps:$4 sm:$0xff]   ;;  %v5796_v40 = vld [vmem:[#allocation6 + $0x5cc] ss:$16 sps:$4 sm:$0xff]  }
 0x3af   : > { %3794 = vmatprep.subr.bf16.mxu1 %v5637_v47  ;;  %3958 = vmatprep.subr.bf16.mxu0 %v5640_v45  ;;  %v5718_v47 = vld [vmem:[#allocation6 + $0x42c] ss:$16 sps:$4 sm:$0xff]   ;;  %v5713_v45 = vld [vmem:[#allocation6 + $0x420] ss:$16 sps:$4 sm:$0xff]  }
 0x3b2   : > { %3795 = vmatpush1.bf16.msra.mxu1 %v5635_v46  ;;  %3959 = vmatpush1.bf16.msra.mxu0 %v5638_v49  ;;  %v5716_v46 = vld [vmem:[#allocation6 + $0x428] ss:$16 sps:$4 sm:$0xff]   ;;  %v5721_v49 = vld [vmem:[#allocation6 + $0x444] ss:$16 sps:$4 sm:$0xff]  }
 0x3b3   : > { %3796 = vmatprep.subr.bf16.mxu1 %v5643_v31  ;;  %3960 = vmatprep.subr.bf16.mxu0 %v5646_v53  ;;  %v5724_v31 = vld [vmem:[#allocation6 + $0x44c] ss:$16 sps:$4 sm:$0xff]   ;;  %v5719_v53 = vld [vmem:[#allocation6 + $0x440] ss:$16 sps:$4 sm:$0xff]  }
 0x3b6   : > { %3797 = vmatpush1.bf16.msra.mxu1 %v5641_v52  ;;  %3961 = vmatpush1.bf16.msra.mxu0 %v5644_v50  ;;  %v5722_v52 = vld [vmem:[#allocation6 + $0x448] ss:$16 sps:$4 sm:$0xff]   ;;  %v5727_v50 = vld [vmem:[#allocation6 + $0x464] ss:$16 sps:$4 sm:$0xff]  }
 0x3b7   : > { %3798 = vmatprep.subr.bf16.mxu1 %v5649_v48  ;;  %3962 = vmatprep.subr.bf16.mxu0 %v5652_v57  ;;  %v5730_v48 = vld [vmem:[#allocation6 + $0x46c] ss:$16 sps:$4 sm:$0xff]   ;;  %v5725_v57 = vld [vmem:[#allocation6 + $0x460] ss:$16 sps:$4 sm:$0xff]  }
 0x3ba   : > { %3799 = vmatpush1.bf16.msra.mxu1 %v5647_v58  ;;  %3963 = vmatpush1.bf16.msra.mxu0 %v5650_v59  ;;  %v5728_v58 = vld [vmem:[#allocation6 + $0x468] ss:$16 sps:$4 sm:$0xff]   ;;  %v5733_v59 = vld [vmem:[#allocation6 + $0x484] ss:$16 sps:$4 sm:$0xff]  }
 0x3bb   : > { %3800 = vmatprep.subr.bf16.mxu1 %v5655_v60  ;;  %3964 = vmatprep.subr.bf16.mxu0 %v5658_v61  ;;  %v5736_v60 = vld [vmem:[#allocation6 + $0x48c] ss:$16 sps:$4 sm:$0xff]   ;;  %v5731_v61 = vld [vmem:[#allocation6 + $0x480] ss:$16 sps:$4 sm:$0xff]  }
 0x3be   : > { %3801 = vmatpush1.bf16.msra.mxu1 %v5653_v62  ;;  %3965 = vmatpush1.bf16.msra.mxu0 %v5656_v63  ;;  %v5734_v62 = vld [vmem:[#allocation6 + $0x488] ss:$16 sps:$4 sm:$0xff]   ;;  %v5739_v63 = vld [vmem:[#allocation6 + $0x4a4] ss:$16 sps:$4 sm:$0xff]  }
 0x3bf   : > { %3802 = vmatprep.subr.bf16.mxu1 %v5661_v0  ;;  %3966 = vmatprep.subr.bf16.mxu0 %v5664_v2  ;;  %v5742_v0 = vld [vmem:[#allocation6 + $0x4ac] ss:$16 sps:$4 sm:$0xff]   ;;  %v5737_v2 = vld [vmem:[#allocation6 + $0x4a0] ss:$16 sps:$4 sm:$0xff]  }
 0x3c2   : > { %3803 = vmatpush1.bf16.msra.mxu1 %v5659_v3  ;;  %3967 = vmatpush1.bf16.msra.mxu0 %v5662_v4  ;;  %v5740_v3 = vld [vmem:[#allocation6 + $0x4a8] ss:$16 sps:$4 sm:$0xff]   ;;  %v5745_v4 = vld [vmem:[#allocation6 + $0x4c4] ss:$16 sps:$4 sm:$0xff]  }
 0x3c3   : > { %3804 = vmatprep.subr.bf16.mxu1 %v5667_v5  ;;  %3968 = vmatprep.subr.bf16.mxu0 %v5670_v9  ;;  %v5748_v5 = vld [vmem:[#allocation6 + $0x4cc] ss:$16 sps:$4 sm:$0xff]   ;;  %v5743_v9 = vld [vmem:[#allocation6 + $0x4c0] ss:$16 sps:$4 sm:$0xff]  }
 0x3c6   : > { %3805 = vmatpush1.bf16.msra.mxu1 %v5665_v12  ;;  %3969 = vmatpush1.bf16.msra.mxu0 %v5668_v13  ;;  %v5746_v12 = vld [vmem:[#allocation6 + $0x4c8] ss:$16 sps:$4 sm:$0xff]   ;;  %v5751_v13 = vld [vmem:[#allocation6 + $0x4e4] ss:$16 sps:$4 sm:$0xff]  }
 0x3c7   : > { %3806 = vmatprep.subr.bf16.mxu1 %v5673_v16  ;;  %3970 = vmatprep.subr.bf16.mxu0 %v5676_v17  ;;  %v5754_v16 = vld [vmem:[#allocation6 + $0x4ec] ss:$16 sps:$4 sm:$0xff]   ;;  %v5749_v17 = vld [vmem:[#allocation6 + $0x4e0] ss:$16 sps:$4 sm:$0xff]  }
 0x3ca   : > { %3807 = vmatpush1.bf16.msra.mxu1 %v5671_v8  ;;  %3971 = vmatpush1.bf16.msra.mxu0 %v5674_v11  ;;  %v5752_v8 = vld [vmem:[#allocation6 + $0x4e8] ss:$16 sps:$4 sm:$0xff]   ;;  %v5757_v11 = vld [vmem:[#allocation6 + $0x504] ss:$16 sps:$4 sm:$0xff]  }
 0x3cb   : > { %3808 = vmatprep.subr.bf16.mxu1 %v5679_v55  ;;  %3972 = vmatprep.subr.bf16.mxu0 %v5682_v6  ;;  %v5760_v55 = vld [vmem:[#allocation6 + $0x50c] ss:$16 sps:$4 sm:$0xff]   ;;  %v5755_v6 = vld [vmem:[#allocation6 + $0x500] ss:$16 sps:$4 sm:$0xff]  }
 0x3ce   : > { %3809 = vmatpush1.bf16.msra.mxu1 %v5677_v7  ;;  %3973 = vmatpush1.bf16.msra.mxu0 %v5680_v10  ;;  %v5758_v7 = vld [vmem:[#allocation6 + $0x508] ss:$16 sps:$4 sm:$0xff]   ;;  %v5763_v10 = vld [vmem:[#allocation6 + $0x524] ss:$16 sps:$4 sm:$0xff]  }
 0x3cf   : > { %3810 = vmatprep.subr.bf16.mxu1 %v5685_v15  ;;  %3974 = vmatprep.subr.bf16.mxu0 %v5688_v18  ;;  %v5766_v15 = vld [vmem:[#allocation6 + $0x52c] ss:$16 sps:$4 sm:$0xff]   ;;  %v5761_v18 = vld [vmem:[#allocation6 + $0x520] ss:$16 sps:$4 sm:$0xff]  }
 0x3d2   : > { %3811 = vmatpush1.bf16.msra.mxu1 %v5683_v51  ;;  %3975 = vmatpush1.bf16.msra.mxu0 %v5686_v54  ;;  %v5764_v51 = vld [vmem:[#allocation6 + $0x528] ss:$16 sps:$4 sm:$0xff]   ;;  %v5769_v54 = vld [vmem:[#allocation6 + $0x544] ss:$16 sps:$4 sm:$0xff]  }
 0x3d3   : > { %3812 = vmatprep.subr.bf16.mxu1 %v5691_v21  ;;  %3976 = vmatprep.subr.bf16.mxu0 %v5694_v22  ;;  %v5772_v21 = vld [vmem:[#allocation6 + $0x54c] ss:$16 sps:$4 sm:$0xff]   ;;  %v5767_v22 = vld [vmem:[#allocation6 + $0x540] ss:$16 sps:$4 sm:$0xff]  }
 0x3d6   : > { %3813 = vmatpush1.bf16.msra.mxu1 %v5689_v23  ;;  %3977 = vmatpush1.bf16.msra.mxu0 %v5692_v19  ;;  %v5770_v23 = vld [vmem:[#allocation6 + $0x548] ss:$16 sps:$4 sm:$0xff]   ;;  %v5775_v19 = vld [vmem:[#allocation6 + $0x564] ss:$16 sps:$4 sm:$0xff]  }
 0x3d7   : > { %3814 = vmatprep.subr.bf16.mxu1 %v5697_v56  ;;  %3978 = vmatprep.subr.bf16.mxu0 %v5700_v20  ;;  %v5778_v56 = vld [vmem:[#allocation6 + $0x56c] ss:$16 sps:$4 sm:$0xff]   ;;  %v5773_v20 = vld [vmem:[#allocation6 + $0x560] ss:$16 sps:$4 sm:$0xff]  }
 0x3da   : > { %3815 = vmatpush1.bf16.msra.mxu1 %v5695_v14  ;;  %3979 = vmatpush1.bf16.msra.mxu0 %v5698_v29  ;;  %v5776_v14 = vld [vmem:[#allocation6 + $0x568] ss:$16 sps:$4 sm:$0xff]   ;;  %v5781_v29 = vld [vmem:[#allocation6 + $0x584] ss:$16 sps:$4 sm:$0xff]  }
 0x3db   : > { %3816 = vmatprep.subr.bf16.mxu1 %v5703_v32  ;;  %3980 = vmatprep.subr.bf16.mxu0 %v5706_v33  ;;  %v5784_v32 = vld [vmem:[#allocation6 + $0x58c] ss:$16 sps:$4 sm:$0xff]   ;;  %v5779_v33 = vld [vmem:[#allocation6 + $0x580] ss:$16 sps:$4 sm:$0xff]  }
 0x3de   : > { %3817 = vmatpush1.bf16.msra.mxu1 %v5701_v36  ;;  %3981 = vmatpush1.bf16.msra.mxu0 %v5704_v37  ;;  %v5787_v36 = vld [vmem:[#allocation6 + $0x5a4] ss:$16 sps:$4 sm:$0xff]   ;;  %v5790_v37 = vld [vmem:[#allocation6 + $0x5ac] ss:$16 sps:$4 sm:$0xff]  }
 0x3df   : > { %3827 = vmatprep.subr.bf16.mxu1 %v5709_v30  ;;  %3991 = vmatprep.subr.bf16.mxu0 %v5712_v39  ;;  %v5788_v30 = vld [vmem:[#allocation6 + $0x5a8] ss:$16 sps:$4 sm:$0xff]   ;;  %v5793_v39 = vld [vmem:[#allocation6 + $0x5c4] ss:$16 sps:$4 sm:$0xff]  }
 0x3e1   : > { %3819 = vmatmul.mubr.bf16.vlgmr.msra.gmra.mrb[48].mxu1 %v2181_v41  ;;  %3983 = vmatmul.mubr.bf16.vlgmr.msra.gmra.mrb[96].mxu0 %v2181_v41  ;;  %v5794_v41 = vld [vmem:[#allocation6 + $0x5c8] ss:$16 sps:$4 sm:$0xff]  }
 0x3e2   : > { %3828 = vmatpush1.bf16.msra.mxu1 %v5707_v28  ;;  %3859 = vmatprep.mubr.bf16.mxu1 %v2184_v43  ;;  %v5791_v28 = vld [vmem:[#allocation6 + $0x5c0] ss:$16 sps:$4 sm:$0xff]  }
 0x3e3   : > { %3992 = vmatpush1.bf16.msra.mxu0 %v5710_v42  ;;  %4023 = vmatprep.mubr.bf16.mxu0 %v2184_v43  ;;  %v5799_v42 = vld [vmem:[#allocation6 + $0x5e4] ss:$16 sps:$4 sm:$0xff]   ;;  %v2157_v43 = vsub.s32 4, %v6691_v1 }
 0x3e4   : > { %3829 = vmatprep.subr.bf16.mxu1 %v5715_v44  ;;  %3993 = vmatprep.subr.bf16.mxu0 %v5718_v47  ;;  %v5802_v44 = vld [vmem:[#allocation6 + $0x5ec] ss:$16 sps:$4 sm:$0xff]   ;;  %v2169_v47 = vsub.s32 7, %v6691_v1 }
 0x3e6   : > { %3830 = vmatpush1.bf16.msra.mxu1 %v5713_v45  ;;  %v5797_v45 = vld [vmem:[#allocation6 + $0x5e0] ss:$16 sps:$4 sm:$0xff]  }
 0x3e7   : > { %3994 = vmatpush1.bf16.msra.mxu0 %v5716_v46  ;;  %3831 = vmatprep.subr.bf16.mxu1 %v5721_v49  ;;  %v5800_v46 = vld [vmem:[#allocation6 + $0x5e8] ss:$16 sps:$4 sm:$0xff]   ;;  %v2158_v49 = vrot.slane %v6721_v27, %v2157_v43  ;;  %v5880_v43 = vld [vmem:[#allocation6 + $0x78c] ss:$16 sps:$4 sm:$0xff]  }
 0x3e8   : > { %3995 = vmatprep.subr.bf16.mxu0 %v5724_v31  ;;  %v5805_v31 = vld [vmem:[#allocation6 + $0x604] ss:$16 sps:$4 sm:$0xff]  }
 0x3ea   : > { %3832 = vmatpush1.bf16.msra.mxu1 %v5719_v53  ;;  %v5808_v53 = vld [vmem:[#allocation6 + $0x60c] ss:$16 sps:$4 sm:$0xff]  }
 0x3eb   : > { %3996 = vmatpush1.bf16.msra.mxu0 %v5722_v52  ;;  %3833 = vmatprep.subr.bf16.mxu1 %v5727_v50  ;;  %v2170_v52 = vrot.slane %v6721_v27, %v2169_v47  ;;  %v5803_v50 = vld [vmem:[#allocation6 + $0x600] ss:$16 sps:$4 sm:$0xff]   ;;  %v5878_v47 = vld [vmem:[#allocation6 + $0x788] ss:$16 sps:$4 sm:$0xff]  }
 0x3ec   : > { %3997 = vmatprep.subr.bf16.mxu0 %v5730_v48  ;;  %v2183_v48 = vpack.c.bf16 %v2158_v49, %v2158_v49  ;;  %v5881_v49 = vld [vmem:[#allocation6 + $0x7a0] ss:$16 sps:$4 sm:$0xff]  }
 0x3ee   : > { %3834 = vmatpush1.bf16.msra.mxu1 %v5725_v57  ;;  %v5806_v57 = vld [vmem:[#allocation6 + $0x608] ss:$16 sps:$4 sm:$0xff]  }
 0x3ef   : > { %3998 = vmatpush1.bf16.msra.mxu0 %v5728_v58  ;;  %3835 = vmatprep.subr.bf16.mxu1 %v5733_v59  ;;  %v5811_v58 = vld [vmem:[#allocation6 + $0x624] ss:$16 sps:$4 sm:$0xff]   ;;  %v2186_v59 = vpack.c.bf16 %v2170_v52, %v2170_v52  ;;  %v5892_v52 = vld [vmem:[#allocation6 + $0x7cc] ss:$16 sps:$4 sm:$0xff]  }
 0x3f0   : > { %3999 = vmatprep.subr.bf16.mxu0 %v5736_v60  ;;  %v5814_v60 = vld [vmem:[#allocation6 + $0x62c] ss:$16 sps:$4 sm:$0xff]  }
 0x3f2   : > { %3836 = vmatpush1.bf16.msra.mxu1 %v5731_v61  ;;  %v5809_v61 = vld [vmem:[#allocation6 + $0x620] ss:$16 sps:$4 sm:$0xff]  }
 0x3f3   : > { %4000 = vmatpush1.bf16.msra.mxu0 %v5734_v62  ;;  %3837 = vmatprep.subr.bf16.mxu1 %v5739_v63  ;;  %v5812_v62 = vld [vmem:[#allocation6 + $0x628] ss:$16 sps:$4 sm:$0xff]   ;;  %v5817_v63 = vld [vmem:[#allocation6 + $0x644] ss:$16 sps:$4 sm:$0xff]  }
 0x3f4   : > { %4001 = vmatprep.subr.bf16.mxu0 %v5742_v0  ;;  %v5820_v0 = vld [vmem:[#allocation6 + $0x64c] ss:$16 sps:$4 sm:$0xff]  }
 0x3f6   : > { %3838 = vmatpush1.bf16.msra.mxu1 %v5737_v2  ;;  %v5815_v2 = vld [vmem:[#allocation6 + $0x640] ss:$16 sps:$4 sm:$0xff]  }
 0x3f7   : > { %4002 = vmatpush1.bf16.msra.mxu0 %v5740_v3  ;;  %3839 = vmatprep.subr.bf16.mxu1 %v5745_v4  ;;  %v5818_v3 = vld [vmem:[#allocation6 + $0x648] ss:$16 sps:$4 sm:$0xff]   ;;  %v5823_v4 = vld [vmem:[#allocation6 + $0x664] ss:$16 sps:$4 sm:$0xff]  }
 0x3f8   : > { %4003 = vmatprep.subr.bf16.mxu0 %v5748_v5  ;;  %v5826_v5 = vld [vmem:[#allocation6 + $0x66c] ss:$16 sps:$4 sm:$0xff]  }
 0x3fa   : > { %3840 = vmatpush1.bf16.msra.mxu1 %v5743_v9  ;;  %v5821_v9 = vld [vmem:[#allocation6 + $0x660] ss:$16 sps:$4 sm:$0xff]  }
 0x3fb   : > { %4004 = vmatpush1.bf16.msra.mxu0 %v5746_v12  ;;  %3841 = vmatprep.subr.bf16.mxu1 %v5751_v13  ;;  %v5824_v12 = vld [vmem:[#allocation6 + $0x668] ss:$16 sps:$4 sm:$0xff]   ;;  %v5829_v13 = vld [vmem:[#allocation6 + $0x684] ss:$16 sps:$4 sm:$0xff]  }
 0x3fc   : > { %4005 = vmatprep.subr.bf16.mxu0 %v5754_v16  ;;  %v5832_v16 = vld [vmem:[#allocation6 + $0x68c] ss:$16 sps:$4 sm:$0xff]  }
 0x3fe   : > { %3842 = vmatpush1.bf16.msra.mxu1 %v5749_v17  ;;  %v5827_v17 = vld [vmem:[#allocation6 + $0x680] ss:$16 sps:$4 sm:$0xff]  }
 0x3ff   : > { %4006 = vmatpush1.bf16.msra.mxu0 %v5752_v8  ;;  %3843 = vmatprep.subr.bf16.mxu1 %v5757_v11  ;;  %v5830_v8 = vld [vmem:[#allocation6 + $0x688] ss:$16 sps:$4 sm:$0xff]   ;;  %v5835_v11 = vld [vmem:[#allocation6 + $0x6a4] ss:$16 sps:$4 sm:$0xff]  }
 0x400   : > { %4007 = vmatprep.subr.bf16.mxu0 %v5760_v55  ;;  %v5838_v55 = vld [vmem:[#allocation6 + $0x6ac] ss:$16 sps:$4 sm:$0xff]  }
 0x402   : > { %3844 = vmatpush1.bf16.msra.mxu1 %v5755_v6  ;;  %v5833_v6 = vld [vmem:[#allocation6 + $0x6a0] ss:$16 sps:$4 sm:$0xff]  }
 0x403   : > { %4008 = vmatpush1.bf16.msra.mxu0 %v5758_v7  ;;  %3845 = vmatprep.subr.bf16.mxu1 %v5763_v10  ;;  %v5836_v7 = vld [vmem:[#allocation6 + $0x6a8] ss:$16 sps:$4 sm:$0xff]   ;;  %v5841_v10 = vld [vmem:[#allocation6 + $0x6c4] ss:$16 sps:$4 sm:$0xff]  }
 0x404   : > { %4009 = vmatprep.subr.bf16.mxu0 %v5766_v15  ;;  %v5844_v15 = vld [vmem:[#allocation6 + $0x6cc] ss:$16 sps:$4 sm:$0xff]  }
 0x406   : > { %3846 = vmatpush1.bf16.msra.mxu1 %v5761_v18  ;;  %v5839_v18 = vld [vmem:[#allocation6 + $0x6c0] ss:$16 sps:$4 sm:$0xff]  }
 0x407   : > { %4010 = vmatpush1.bf16.msra.mxu0 %v5764_v51  ;;  %3847 = vmatprep.subr.bf16.mxu1 %v5769_v54  ;;  %v5842_v51 = vld [vmem:[#allocation6 + $0x6c8] ss:$16 sps:$4 sm:$0xff]   ;;  %v5847_v54 = vld [vmem:[#allocation6 + $0x6e4] ss:$16 sps:$4 sm:$0xff]  }
 0x408   : > { %4011 = vmatprep.subr.bf16.mxu0 %v5772_v21  ;;  %v5850_v21 = vld [vmem:[#allocation6 + $0x6ec] ss:$16 sps:$4 sm:$0xff]  }
 0x40a   : > { %3848 = vmatpush1.bf16.msra.mxu1 %v5767_v22  ;;  %v5845_v22 = vld [vmem:[#allocation6 + $0x6e0] ss:$16 sps:$4 sm:$0xff]  }
 0x40b   : > { %4012 = vmatpush1.bf16.msra.mxu0 %v5770_v23  ;;  %3849 = vmatprep.subr.bf16.mxu1 %v5775_v19  ;;  %v5848_v23 = vld [vmem:[#allocation6 + $0x6e8] ss:$16 sps:$4 sm:$0xff]   ;;  %v5853_v19 = vld [vmem:[#allocation6 + $0x704] ss:$16 sps:$4 sm:$0xff]  }
 0x40c   : > { %4013 = vmatprep.subr.bf16.mxu0 %v5778_v56  ;;  %v5856_v56 = vld [vmem:[#allocation6 + $0x70c] ss:$16 sps:$4 sm:$0xff]  }
 0x40e   : > { %3850 = vmatpush1.bf16.msra.mxu1 %v5773_v20  ;;  %v5851_v20 = vld [vmem:[#allocation6 + $0x700] ss:$16 sps:$4 sm:$0xff]  }
 0x40f   : > { %4014 = vmatpush1.bf16.msra.mxu0 %v5776_v14  ;;  %3851 = vmatprep.subr.bf16.mxu1 %v5781_v29  ;;  %v5854_v14 = vld [vmem:[#allocation6 + $0x708] ss:$16 sps:$4 sm:$0xff]   ;;  %v5859_v29 = vld [vmem:[#allocation6 + $0x724] ss:$16 sps:$4 sm:$0xff]  }
 0x410   : > { %4015 = vmatprep.subr.bf16.mxu0 %v5784_v32  ;;  %v5862_v32 = vld [vmem:[#allocation6 + $0x72c] ss:$16 sps:$4 sm:$0xff]  }
 0x412   : > { %3852 = vmatpush1.bf16.msra.mxu1 %v5779_v33  ;;  %v5857_v33 = vld [vmem:[#allocation6 + $0x720] ss:$16 sps:$4 sm:$0xff]  }
 0x413   : > { %4016 = vmatpush1.bf16.msra.mxu0 %v5782_v35  ;;  %3853 = vmatprep.subr.bf16.mxu1 %v5787_v36  ;;  %v5860_v35 = vld [vmem:[#allocation6 + $0x728] ss:$16 sps:$4 sm:$0xff]   ;;  %v5865_v36 = vld [vmem:[#allocation6 + $0x744] ss:$16 sps:$4 sm:$0xff]  }
 0x414   : > { %4017 = vmatprep.subr.bf16.mxu0 %v5790_v37  ;;  %v5868_v37 = vld [vmem:[#allocation6 + $0x74c] ss:$16 sps:$4 sm:$0xff]  }
 0x416   : > { %3854 = vmatpush1.bf16.msra.mxu1 %v5785_v38  ;;  %v5863_v38 = vld [vmem:[#allocation6 + $0x740] ss:$16 sps:$4 sm:$0xff]  }
 0x417   : > { %4018 = vmatpush1.bf16.msra.mxu0 %v5788_v30  ;;  %3855 = vmatprep.subr.bf16.mxu1 %v5793_v39  ;;  %v5866_v30 = vld [vmem:[#allocation6 + $0x748] ss:$16 sps:$4 sm:$0xff]   ;;  %v5871_v39 = vld [vmem:[#allocation6 + $0x764] ss:$16 sps:$4 sm:$0xff]  }
 0x418   : > { %4019 = vmatprep.subr.bf16.mxu0 %v5796_v40  ;;  %v5874_v40 = vld [vmem:[#allocation6 + $0x76c] ss:$16 sps:$4 sm:$0xff]  }
 0x41a   : > { %3856 = vmatpush1.bf16.msra.mxu1 %v5791_v28  ;;  %v5869_v28 = vld [vmem:[#allocation6 + $0x760] ss:$16 sps:$4 sm:$0xff]  }
 0x41b   : > { %4020 = vmatpush1.bf16.msra.mxu0 %v5794_v41  ;;  %3857 = vmatprep.subr.bf16.mxu1 %v5799_v42  ;;  %v5872_v41 = vld [vmem:[#allocation6 + $0x768] ss:$16 sps:$4 sm:$0xff]   ;;  %v5877_v42 = vld [vmem:[#allocation6 + $0x784] ss:$16 sps:$4 sm:$0xff]  }
 0x41c   : > { %4021 = vmatprep.subr.bf16.mxu0 %v5802_v44  ;;  %v5875_v44 = vld [vmem:[#allocation6 + $0x780] ss:$16 sps:$4 sm:$0xff]  }
 0x41e   : > { %3858 = vmatpush1.bf16.msra.mxu1 %v5797_v45  ;;  %v5883_v45 = vld [vmem:[#allocation6 + $0x7a4] ss:$16 sps:$4 sm:$0xff]  }
 0x41f   : > { %4022 = vmatpush1.bf16.msra.mxu0 %v5800_v46  ;;  %3868 = vmatprep.subr.bf16.mxu1 %v5805_v31  ;;  %v5886_v46 = vld [vmem:[#allocation6 + $0x7ac] ss:$16 sps:$4 sm:$0xff]   ;;  %v5884_v31 = vld [vmem:[#allocation6 + $0x7a8] ss:$16 sps:$4 sm:$0xff]  }
 0x420   : > { %4032 = vmatprep.subr.bf16.mxu0 %v5808_v53  ;;  %v5889_v53 = vld [vmem:[#allocation6 + $0x7c4] ss:$16 sps:$4 sm:$0xff]  }
 0x421   : > { %3860 = vmatmul.mubr.bf16.vlgmr.msra.gmra.mrb[48].mxu1 %v2183_v48 }
 0x422   : > { %4024 = vmatmul.mubr.bf16.vlgmr.msra.gmra.mrb[96].mxu0 %v2183_v48  ;;  %3869 = vmatpush1.bf16.msra.mxu1 %v5803_v50  ;;  %v5887_v50 = vld [vmem:[#allocation6 + $0x7c0] ss:$16 sps:$4 sm:$0xff]   ;;  %v5890_v48 = vld [vmem:[#allocation6 + $0x7c8] ss:$16 sps:$4 sm:$0xff]  }
 0x423   : > { %3900 = vmatprep.mubr.bf16.mxu1 %v2186_v59  ;;  %4033 = vmatpush1.bf16.msra.mxu0 %v5806_v57  ;;  %v5895_v57 = vld [vmem:[#allocation6 + $0x7e4] ss:$16 sps:$4 sm:$0xff]  }
 0x424   : > { %4064 = vmatprep.mubr.bf16.mxu0 %v2186_v59  ;;  %3870 = vmatprep.subr.bf16.mxu1 %v5811_v58  ;;  %v2165_v58 = vsub.s32 6, %v6691_v1  ;;  %v5898_v59 = vld [vmem:[#allocation6 + $0x7ec] ss:$16 sps:$4 sm:$0xff]   ;;  %v6007_v1 = vld [vmem:[%s6879_s11 + $0x70] sm:$0xff]  }
 0x425   : > { %4034 = vmatprep.subr.bf16.mxu0 %v5814_v60  ;;  %v5893_v60 = vld [vmem:[#allocation6 + $0x7e0] ss:$16 sps:$4 sm:$0xff]  }
 0x426   : > { %3871 = vmatpush1.bf16.msra.mxu1 %v5809_v61  ;;  %v5896_v61 = vld [vmem:[#allocation6 + $0x7e8] ss:$16 sps:$4 sm:$0xff]  }
 0x427   : > { %4035 = vmatpush1.bf16.msra.mxu0 %v5812_v62  ;;  %3872 = vmatprep.subr.bf16.mxu1 %v5817_v63  ;;  %v2166_v62 = vrot.slane %v6721_v27, %v2165_v58  ;;  %v5901_v63 = vld [vmem:[#allocation8 + $0x4] ss:$8 sps:$4 sm:$0xff]   ;;  %v5908_v27 = vld [vmem:[#allocation8 + $0x30] ss:$8 sps:$4 sm:$0xff]  }
 0x428   : > { %4036 = vmatprep.subr.bf16.mxu0 %v5820_v0  ;;  %v5899_v0 = vld [vmem:[#allocation8] ss:$8 sps:$4 sm:$0xff]  }
 0x42a   : > { %3873 = vmatpush1.bf16.msra.mxu1 %v5815_v2  ;;  %v2185_v2 = vpack.c.bf16 %v2166_v62, %v2166_v62 }
 0x42b   : > { %4037 = vmatpush1.bf16.msra.mxu0 %v5818_v3  ;;  %3874 = vmatprep.subr.bf16.mxu1 %v5823_v4  ;;  %v5904_v3 = vld [vmem:[#allocation8 + $0x14] ss:$8 sps:$4 sm:$0xff]   ;;  %v5902_v4 = vld [vmem:[#allocation8 + $0x10] ss:$8 sps:$4 sm:$0xff]  }
 0x42c   : > { %4038 = vmatprep.subr.bf16.mxu0 %v5826_v5  ;;  %v5907_v5 = vld [vmem:[#allocation8 + $0x24] ss:$8 sps:$4 sm:$0xff]  }
 0x42e   : > { %3875 = vmatpush1.bf16.msra.mxu1 %v5821_v9  ;;  %v5905_v9 = vld [vmem:[#allocation8 + $0x20] ss:$8 sps:$4 sm:$0xff]  }
 0x42f   : > { %4039 = vmatpush1.bf16.msra.mxu0 %v5824_v12  ;;  %3876 = vmatprep.subr.bf16.mxu1 %v5829_v13  ;;  %v5910_v12 = vld [vmem:[#allocation8 + $0x34] ss:$8 sps:$4 sm:$0xff]   ;;  %v5913_v13 = vld [vmem:[#allocation8 + $0x44] ss:$8 sps:$4 sm:$0xff]  }
 0x430   : > { %4040 = vmatprep.subr.bf16.mxu0 %v5832_v16  ;;  %v5911_v16 = vld [vmem:[#allocation8 + $0x40] ss:$8 sps:$4 sm:$0xff]  }
 0x432   : > { %3877 = vmatpush1.bf16.msra.mxu1 %v5827_v17  ;;  %v5916_v17 = vld [vmem:[#allocation8 + $0x54] ss:$8 sps:$4 sm:$0xff]  }
 0x433   : > { %4041 = vmatpush1.bf16.msra.mxu0 %v5830_v8  ;;  %3878 = vmatprep.subr.bf16.mxu1 %v5835_v11  ;;  %v5914_v8 = vld [vmem:[#allocation8 + $0x50] ss:$8 sps:$4 sm:$0xff]   ;;  %v5919_v11 = vld [vmem:[#allocation8 + $0x64] ss:$8 sps:$4 sm:$0xff]  }
 0x434   : > { %4042 = vmatprep.subr.bf16.mxu0 %v5838_v55  ;;  %v5917_v55 = vld [vmem:[#allocation8 + $0x60] ss:$8 sps:$4 sm:$0xff]  }
 0x436   : > { %3879 = vmatpush1.bf16.msra.mxu1 %v5833_v6  ;;  %v5922_v6 = vld [vmem:[#allocation8 + $0x74] ss:$8 sps:$4 sm:$0xff]  }
 0x437   : > { %4043 = vmatpush1.bf16.msra.mxu0 %v5836_v7  ;;  %3880 = vmatprep.subr.bf16.mxu1 %v5841_v10  ;;  %v5920_v7 = vld [vmem:[#allocation8 + $0x70] ss:$8 sps:$4 sm:$0xff]   ;;  %v5925_v10 = vld [vmem:[#allocation8 + $0x84] ss:$8 sps:$4 sm:$0xff]  }
 0x438   : > { %4044 = vmatprep.subr.bf16.mxu0 %v5844_v15  ;;  %v5923_v15 = vld [vmem:[#allocation8 + $0x80] ss:$8 sps:$4 sm:$0xff]  }
 0x43a   : > { %3881 = vmatpush1.bf16.msra.mxu1 %v5839_v18  ;;  %v5928_v18 = vld [vmem:[#allocation8 + $0x94] ss:$8 sps:$4 sm:$0xff]  }
 0x43b   : > { %4045 = vmatpush1.bf16.msra.mxu0 %v5842_v51  ;;  %3882 = vmatprep.subr.bf16.mxu1 %v5847_v54  ;;  %v5926_v51 = vld [vmem:[#allocation8 + $0x90] ss:$8 sps:$4 sm:$0xff]   ;;  %v5931_v54 = vld [vmem:[#allocation8 + $0xa4] ss:$8 sps:$4 sm:$0xff]  }
 0x43c   : > { %4046 = vmatprep.subr.bf16.mxu0 %v5850_v21  ;;  %v5929_v21 = vld [vmem:[#allocation8 + $0xa0] ss:$8 sps:$4 sm:$0xff]  }
 0x43e   : > { %3883 = vmatpush1.bf16.msra.mxu1 %v5845_v22  ;;  %v5934_v22 = vld [vmem:[#allocation8 + $0xb4] ss:$8 sps:$4 sm:$0xff]  }
 0x43f   : > { %4047 = vmatpush1.bf16.msra.mxu0 %v5848_v23  ;;  %3884 = vmatprep.subr.bf16.mxu1 %v5853_v19  ;;  %v5932_v23 = vld [vmem:[#allocation8 + $0xb0] ss:$8 sps:$4 sm:$0xff]   ;;  %v5937_v19 = vld [vmem:[#allocation8 + $0xc4] ss:$8 sps:$4 sm:$0xff]  }
 0x440   : > { %4048 = vmatprep.subr.bf16.mxu0 %v5856_v56  ;;  %v5935_v56 = vld [vmem:[#allocation8 + $0xc0] ss:$8 sps:$4 sm:$0xff]  }
 0x442   : > { %3885 = vmatpush1.bf16.msra.mxu1 %v5851_v20  ;;  %v5940_v20 = vld [vmem:[#allocation8 + $0xd4] ss:$8 sps:$4 sm:$0xff]  }
 0x443   : > { %4049 = vmatpush1.bf16.msra.mxu0 %v5854_v14  ;;  %3886 = vmatprep.subr.bf16.mxu1 %v5859_v29  ;;  %v5938_v14 = vld [vmem:[#allocation8 + $0xd0] ss:$8 sps:$4 sm:$0xff]   ;;  %v5943_v29 = vld [vmem:[#allocation8 + $0xe4] ss:$8 sps:$4 sm:$0xff]  }
 0x444   : > { %4050 = vmatprep.subr.bf16.mxu0 %v5862_v32  ;;  %v5941_v32 = vld [vmem:[#allocation8 + $0xe0] ss:$8 sps:$4 sm:$0xff]  }
 0x446   : > { %3887 = vmatpush1.bf16.msra.mxu1 %v5857_v33  ;;  %v5946_v33 = vld [vmem:[#allocation8 + $0xf4] ss:$8 sps:$4 sm:$0xff]  }
 0x447   : > { %4051 = vmatpush1.bf16.msra.mxu0 %v5860_v35  ;;  %3888 = vmatprep.subr.bf16.mxu1 %v5865_v36  ;;  %v5944_v35 = vld [vmem:[#allocation8 + $0xf0] ss:$8 sps:$4 sm:$0xff]   ;;  %v5949_v36 = vld [vmem:[#allocation8 + $0x104] ss:$8 sps:$4 sm:$0xff]  }
 0x448   : > { %4052 = vmatprep.subr.bf16.mxu0 %v5868_v37  ;;  %v5995_v37 = vld [vmem:[%s6879_s11 + $0x40] sm:$0xff]  }
 0x44a   : > { %3889 = vmatpush1.bf16.msra.mxu1 %v5863_v38  ;;  %v5996_v38 = vld [vmem:[%s6879_s11] sm:$0xff]  }
 0x44b   : > { %4053 = vmatpush1.bf16.msra.mxu0 %v5866_v30  ;;  %3890 = vmatprep.subr.bf16.mxu1 %v5871_v39  ;;  %v5997_v30 = vld [vmem:[%s6879_s11 + $0x48] sm:$0xff]  }
 0x44c   : > { %4054 = vmatprep.subr.bf16.mxu0 %v5874_v40  ;;  %v5998_v39 = vld [vmem:[%s6879_s11 + $0x8] sm:$0xff]   ;;  %v5999_v40 = vld [vmem:[%s6879_s11 + $0x50] sm:$0xff]  }
 0x44e   : > { %3891 = vmatpush1.bf16.msra.mxu1 %v5869_v28  ;;  %v6000_v28 = vld [vmem:[%s6879_s11 + $0x10] sm:$0xff]  }
 0x44f   : > { %4055 = vmatpush1.bf16.msra.mxu0 %v5872_v41  ;;  %3892 = vmatprep.subr.bf16.mxu1 %v5877_v42  ;;  %v6001_v41 = vld [vmem:[%s6879_s11 + $0x58] sm:$0xff]  }
 0x450   : > { %4056 = vmatprep.subr.bf16.mxu0 %v5880_v43  ;;  %v6002_v42 = vld [vmem:[%s6879_s11 + $0x18] sm:$0xff]   ;;  %v6003_v43 = vld [vmem:[%s6879_s11 + $0x60] sm:$0xff]  }
 0x452   : > { %3893 = vmatpush1.bf16.msra.mxu1 %v5875_v44  ;;  %v6004_v44 = vld [vmem:[%s6879_s11 + $0x20] sm:$0xff]  }
 0x453   : > { %4057 = vmatpush1.bf16.msra.mxu0 %v5878_v47  ;;  %3894 = vmatprep.subr.bf16.mxu1 %v5883_v45  ;;  %v6005_v47 = vld [vmem:[%s6879_s11 + $0x68] sm:$0xff]  }
 0x454   : > { %4058 = vmatprep.subr.bf16.mxu0 %v5886_v46  ;;  %v6006_v45 = vld [vmem:[%s6879_s11 + $0x28] sm:$0xff]   ;;  %v6781_v46 = vld [vmem:[%s6876_s8] sm:$0xf] }
 0x456   : > { %3895 = vmatpush1.bf16.msra.mxu1 %v5881_v49  ;;  %v3728_v49 = vrot.slane %v6781_v46, %v6718_v25 }
 0x457   : > { %4059 = vmatpush1.bf16.msra.mxu0 %v5884_v31  ;;  %3896 = vmatprep.subr.bf16.mxu1 %v5889_v53  ;;  %v3732_v31 = vrot.slane %v6781_v46, %v6715_v24  ;;  %v3740_v53 = vrot.slane %v6781_v46, %v2153_v26 }
 0x458   : > { %4060 = vmatprep.subr.bf16.mxu0 %v5892_v52 }
 0x45a   : > { %3897 = vmatpush1.bf16.msra.mxu1 %v5887_v50 }
 0x45b   : > { %4061 = vmatpush1.bf16.msra.mxu0 %v5890_v48  ;;  %3898 = vmatprep.subr.bf16.mxu1 %v5895_v57 }
 0x45c   : > { %4062 = vmatprep.subr.bf16.mxu0 %v5898_v59 }
 0x45e   : > { %3899 = vmatpush1.bf16.msra.mxu1 %v5893_v60 }
 0x45f   : > { %4063 = vmatpush1.bf16.msra.mxu0 %v5896_v61  ;;  %4477 = vmatprep.subr.bf16.mxu1 %v5901_v63 }
 0x460   : > { %5292 = vmatprep.subr.bf16.mxu0 %v5995_v37  ;;  %v3736_v37 = vrot.slane %v6781_v46, %v2149_v34  ;;  %v6008_v34 = vld [vmem:[%s6879_s11 + $0x30] sm:$0xff]  }
 0x461   : > { %3901 = vmatmul.mubr.bf16.vlgmr.msra.gmra.mrb[48].mxu1 %v2185_v2 }
 0x462   : > { %4065 = vmatmul.mubr.bf16.vlgmr.msra.gmra.mrb[96].mxu0 %v2185_v2  ;;  %4478 = vmatpush1.bf16.msra.mxu1 %v5899_v0 }
 0x463   : > { %4479 = vmatprep.subr.bf16.mxu1 %v5904_v3  ;;  %5293 = vmatpush3.bf16.msra.mxu0 %v5996_v38  ;;  %v5991_v38 = vld [vmem:[#allocation8 + $0x1e4] ss:$8 sps:$4 sm:$0xff]  }
 0x464   : > { %5294 = vmatprep.subr.bf16.mxu0 %v5997_v30  ;;  %v5989_v30 = vld [vmem:[#allocation8 + $0x1e0] ss:$8 sps:$4 sm:$0xff]  }
 0x466   : > { %4480 = vmatpush1.bf16.msra.mxu1 %v5902_v4 }
 0x467   : > { %4481 = vmatprep.subr.bf16.mxu1 %v5907_v5  ;;  %5295 = vmatpush3.bf16.msra.mxu0 %v5998_v39 }
 0x468   : > { %5296 = vmatprep.subr.bf16.mxu0 %v5999_v40  ;;  %v5994_v40 = vld [vmem:[#allocation8 + $0x1f4] ss:$8 sps:$4 sm:$0xff]  }
 0x46a   : > { %4482 = vmatpush1.bf16.msra.mxu1 %v5905_v9  ;;  %v5947_v9 = vld [vmem:[#allocation8 + $0x100] ss:$8 sps:$4 sm:$0xff]  }
 0x46b   : > { %4483 = vmatprep.subr.bf16.mxu1 %v5910_v12  ;;  %5297 = vmatpush3.bf16.msra.mxu0 %v6000_v28  ;;  %v5992_v28 = vld [vmem:[#allocation8 + $0x1f0] ss:$8 sps:$4 sm:$0xff]  }
 0x46c   : > { %5298 = vmatprep.subr.bf16.mxu0 %v6001_v41 }
 0x46e   : > { %4484 = vmatpush1.bf16.msra.mxu1 %v5908_v27  ;;  %v5952_v27 = vld [vmem:[#allocation8 + $0x114] ss:$8 sps:$4 sm:$0xff]  }
 0x46f   : > { %4485 = vmatprep.subr.bf16.mxu1 %v5913_v13  ;;  %5299 = vmatpush3.bf16.msra.mxu0 %v6002_v42  ;;  %v5950_v13 = vld [vmem:[#allocation8 + $0x110] ss:$8 sps:$4 sm:$0xff]  }
 0x470   : > { %5300 = vmatprep.subr.bf16.mxu0 %v6003_v43  ;;  %v6009_v43 = vld [vmem:[%s6879_s11 + $0x78] sm:$0xff]  }
 0x472   : > { %4486 = vmatpush1.bf16.msra.mxu1 %v5911_v16  ;;  %v5955_v16 = vld [vmem:[#allocation8 + $0x124] ss:$8 sps:$4 sm:$0xff]  }
 0x473   : > { %4487 = vmatprep.subr.bf16.mxu1 %v5916_v17  ;;  %5301 = vmatpush3.bf16.msra.mxu0 %v6004_v44  ;;  %v5953_v17 = vld [vmem:[#allocation8 + $0x120] ss:$8 sps:$4 sm:$0xff]   ;;  %v6010_v44 = vld [vmem:[%s6879_s11 + $0x38] sm:$0xff]  }
 0x474   : > { %5302 = vmatprep.subr.bf16.mxu0 %v6005_v47  ;;  %v4145_v47 = vld [vmem:[%s6878_s10] sm:$0x3] }
 0x475   : > { %v4474_v46 = vrot.slane %v4145_v47, %v6715_v24  ;;  %v4595_v24 = vld [vmem:[%s6916_s14] sm:$0x1] }
 0x476   : > { %4488 = vmatpush1.bf16.msra.mxu1 %v5914_v8  ;;  %v5958_v8 = vld [vmem:[#allocation8 + $0x134] ss:$8 sps:$4 sm:$0xff]  }
 0x477   : > { %4489 = vmatprep.subr.bf16.mxu1 %v5919_v11  ;;  %5303 = vmatpush3.bf16.msra.mxu0 %v6006_v45  ;;  %v5956_v11 = vld [vmem:[#allocation8 + $0x130] ss:$8 sps:$4 sm:$0xff]   ;;  %v4470_v45 = vrot.slane %v4145_v47, %v6718_v25 }
 0x478   : > { %5304 = vmatprep.subr.bf16.mxu0 %v6007_v1 }
 0x47a   : > { %4490 = vmatpush1.bf16.msra.mxu1 %v5917_v55  ;;  %v5961_v55 = vld [vmem:[#allocation8 + $0x144] ss:$8 sps:$4 sm:$0xff]  }
 0x47b   : > { %4491 = vmatprep.subr.bf16.mxu1 %v5922_v6  ;;  %v5959_v6 = vld [vmem:[#allocation8 + $0x140] ss:$8 sps:$4 sm:$0xff]   ;;  %5305 = vmatpush3.bf16.msra.mxu0 %v6008_v34 }
 0x47c   : > { %5306 = vmatprep.subr.bf16.mxu0 %v6009_v43 }
 0x47e   : > { %4492 = vmatpush1.bf16.msra.mxu1 %v5920_v7  ;;  %v5964_v7 = vld [vmem:[#allocation8 + $0x154] ss:$8 sps:$4 sm:$0xff]  }
 0x47f   : > { %4493 = vmatprep.subr.bf16.mxu1 %v5925_v10  ;;  %v5962_v10 = vld [vmem:[#allocation8 + $0x150] ss:$8 sps:$4 sm:$0xff]   ;;  %5307 = vmatpush3.bf16.msra.mxu0 %v6010_v44 }
 0x482   : > { %4494 = vmatpush1.bf16.msra.mxu1 %v5923_v15  ;;  %v5967_v15 = vld [vmem:[#allocation8 + $0x164] ss:$8 sps:$4 sm:$0xff]  }
 0x483   : > { %4495 = vmatprep.subr.bf16.mxu1 %v5928_v18  ;;  %v5965_v18 = vld [vmem:[#allocation8 + $0x160] ss:$8 sps:$4 sm:$0xff]  }
 0x486   : > { %4496 = vmatpush1.bf16.msra.mxu1 %v5926_v51  ;;  %v5970_v51 = vld [vmem:[#allocation8 + $0x174] ss:$8 sps:$4 sm:$0xff]  }
 0x487   : > { %4497 = vmatprep.subr.bf16.mxu1 %v5931_v54  ;;  %v5968_v54 = vld [vmem:[#allocation8 + $0x170] ss:$8 sps:$4 sm:$0xff]  }
 0x48a   : > { %4498 = vmatpush1.bf16.msra.mxu1 %v5929_v21  ;;  %v5973_v21 = vld [vmem:[#allocation8 + $0x184] ss:$8 sps:$4 sm:$0xff]  }
 0x48b   : > { %4499 = vmatprep.subr.bf16.mxu1 %v5934_v22  ;;  %v5971_v22 = vld [vmem:[#allocation8 + $0x180] ss:$8 sps:$4 sm:$0xff]  }
 0x48e   : > { %4500 = vmatpush1.bf16.msra.mxu1 %v5932_v23  ;;  %v5976_v23 = vld [vmem:[#allocation8 + $0x194] ss:$8 sps:$4 sm:$0xff]  }
 0x48f   : > { %4501 = vmatprep.subr.bf16.mxu1 %v5937_v19  ;;  %v5974_v19 = vld [vmem:[#allocation8 + $0x190] ss:$8 sps:$4 sm:$0xff]  }
 0x492   : > { %4502 = vmatpush1.bf16.msra.mxu1 %v5935_v56  ;;  %v5979_v56 = vld [vmem:[#allocation8 + $0x1a4] ss:$8 sps:$4 sm:$0xff]  }
 0x493   : > { %4503 = vmatprep.subr.bf16.mxu1 %v5940_v20  ;;  %v5977_v20 = vld [vmem:[#allocation8 + $0x1a0] ss:$8 sps:$4 sm:$0xff]  }
 0x496   : > { %4504 = vmatpush1.bf16.msra.mxu1 %v5938_v14  ;;  %v5982_v14 = vld [vmem:[#allocation8 + $0x1b4] ss:$8 sps:$4 sm:$0xff]  }
 0x497   : > { %4505 = vmatprep.subr.bf16.mxu1 %v5943_v29  ;;  %v5980_v29 = vld [vmem:[#allocation8 + $0x1b0] ss:$8 sps:$4 sm:$0xff]  }
 0x49a   : > { %4506 = vmatpush1.bf16.msra.mxu1 %v5941_v32  ;;  %v5985_v32 = vld [vmem:[#allocation8 + $0x1c4] ss:$8 sps:$4 sm:$0xff]  }
 0x49b   : > { %4507 = vmatprep.subr.bf16.mxu1 %v5946_v33  ;;  %v5983_v33 = vld [vmem:[#allocation8 + $0x1c0] ss:$8 sps:$4 sm:$0xff]  }
 0x49e   : > { %4508 = vmatpush1.bf16.msra.mxu1 %v5944_v35  ;;  %v5988_v35 = vld [vmem:[#allocation8 + $0x1d4] ss:$8 sps:$4 sm:$0xff]  }
 0x49f   : > { %4518 = vmatprep.subr.bf16.mxu1 %v5949_v36  ;;  %v5986_v36 = vld [vmem:[#allocation8 + $0x1d0] ss:$8 sps:$4 sm:$0xff]  }
 0x534   : > { %v3902_v52 = vpop.f32.mrb[48].mxu1 }
 0x535   : > { %v5354_v50 = vadd.f32 %v3902_v52, %v3728_v49  ;;  %v6790_v48 = vpop.f32.mrb[96].mxu0  ;;  %v3904_v57 = vpop.f32.mrb[49].mxu1 }
 0x536   : > { %v5355_v58 = vadd.f32 %v3904_v57, %v3732_v31  ;;  %v4068_v59 = vpop.f32.mrb[97].mxu0  ;;  %v3906_v60 = vpop.f32.mrb[50].mxu1  ;;  %v5356_v39 = vadd.f32 %v6790_v48, %v3736_v37 }
 0x537   : > { %v4073_v61 = vmax.f32 %v5354_v50, 0.0  ;;  %v5357_v62 = vadd.f32 %v4068_v59, %v3740_v53  ;;  %v4070_v63 = vpop.f32.mrb[98].mxu0  ;;  %v3907_v0 = vpop.f32.mrb[51].mxu1 }
 0x538   : > { %v4074_v2 = vmax.f32 %v5355_v58, 0.0  ;;  %v4071_v3 = vpop.f32.mrb[99].mxu0  ;;  %v4075_v41 = vmax.f32 %v5356_v39, 0.0 }
 0x539   : > { %v4076_v4 = vmax.f32 %v5357_v62, 0.0  ;;  %v4077_v12 = vpack.c.bf16 %v4073_v61, %v4073_v61 }
 0x53a   : > { %v4078_v5 = vpack.c.bf16 %v4074_v2, %v4074_v2  ;;  %v4079_v42 = vpack.c.bf16 %v4075_v41, %v4075_v41 }
 0x53b   : > { %v4080_v26 = vpack.c.bf16 %v4076_v4, %v4076_v4 }
 0x53c   : > { %4509 = vmatprep.mubr.bf16.mxu1 %v4078_v5 }
 0x53d   : > { %4510 = vmatmul.mubr.bf16.vlgmr.msra.gmra.mrb[52].mxu1 %v4077_v12 }
 0x53e   : > { %4519 = vmatpush1.bf16.msra.mxu1 %v5947_v9  ;;  %4550 = vmatprep.mubr.bf16.mxu1 %v4080_v26 }
 0x53f   : > { %4520 = vmatprep.subr.bf16.mxu1 %v5952_v27 }
 0x542   : > { %4521 = vmatpush1.bf16.msra.mxu1 %v5950_v13 }
 0x543   : > { %4522 = vmatprep.subr.bf16.mxu1 %v5955_v16 }
 0x546   : > { %4523 = vmatpush1.bf16.msra.mxu1 %v5953_v17 }
 0x547   : > { %4524 = vmatprep.subr.bf16.mxu1 %v5958_v8 }
 0x54a   : > { %4525 = vmatpush1.bf16.msra.mxu1 %v5956_v11 }
 0x54b   : > { %4526 = vmatprep.subr.bf16.mxu1 %v5961_v55 }
 0x54e   : > { %4527 = vmatpush1.bf16.msra.mxu1 %v5959_v6 }
 0x54f   : > { %4528 = vmatprep.subr.bf16.mxu1 %v5964_v7 }
 0x552   : > { %4529 = vmatpush1.bf16.msra.mxu1 %v5962_v10 }
 0x553   : > { %4530 = vmatprep.subr.bf16.mxu1 %v5967_v15 }
 0x556   : > { %4531 = vmatpush1.bf16.msra.mxu1 %v5965_v18 }
 0x557   : > { %4532 = vmatprep.subr.bf16.mxu1 %v5970_v51 }
 0x55a   : > { %4533 = vmatpush1.bf16.msra.mxu1 %v5968_v54 }
 0x55b   : > { %4534 = vmatprep.subr.bf16.mxu1 %v5973_v21 }
 0x55e   : > { %4535 = vmatpush1.bf16.msra.mxu1 %v5971_v22 }
 0x55f   : > { %4536 = vmatprep.subr.bf16.mxu1 %v5976_v23 }
 0x562   : > { %4537 = vmatpush1.bf16.msra.mxu1 %v5974_v19 }
 0x563   : > { %4538 = vmatprep.subr.bf16.mxu1 %v5979_v56 }
 0x566   : > { %4539 = vmatpush1.bf16.msra.mxu1 %v5977_v20 }
 0x567   : > { %4540 = vmatprep.subr.bf16.mxu1 %v5982_v14 }
 0x56a   : > { %4541 = vmatpush1.bf16.msra.mxu1 %v5980_v29 }
 0x56b   : > { %4542 = vmatprep.subr.bf16.mxu1 %v5985_v32 }
 0x56e   : > { %4543 = vmatpush1.bf16.msra.mxu1 %v5983_v33 }
 0x56f   : > { %4544 = vmatprep.subr.bf16.mxu1 %v5988_v35 }
 0x572   : > { %4545 = vmatpush1.bf16.msra.mxu1 %v5986_v36 }
 0x573   : > { %4546 = vmatprep.subr.bf16.mxu1 %v5991_v38 }
 0x576   : > { %4547 = vmatpush1.bf16.msra.mxu1 %v5989_v30 }
 0x577   : > { %4548 = vmatprep.subr.bf16.mxu1 %v5994_v40 }
 0x57a   : > { %4549 = vmatpush1.bf16.msra.mxu1 %v5992_v28 }
 0x57d   : > { %4551 = vmatmul.mubr.bf16.vlgmr.msra.gmra.mrb[52].mxu1 %v4079_v42 }
 0x650   : > { %v4552_v49 = vpop.f32.mrb[52].mxu1 }
 0x651   : > { %v5358_v31 = vadd.f32 %v4552_v49, %v4470_v45  ;;  %v4554_v53 = vpop.f32.mrb[53].mxu1 }
 0x652   : > { %v5359_v52 = vadd.f32 %v4554_v53, %v4474_v46  ;;  %v4556_v50 = vpop.f32.mrb[54].mxu1 }
 0x653   : > { %v4559_v48 = vmax.f32 %v5358_v31, 0.0  ;;  %v4557_v57 = vpop.f32.mrb[55].mxu1 }
 0x654   : > { %v4560_v58 = vmax.f32 %v5359_v52, 0.0 }
 0x655   : > { %v4561_v60 = vpack.c.bf16 %v4559_v48, %v4559_v48 }
 0x656   : > { %v4562_v59 = vpack.c.bf16 %v4560_v58, %v4560_v58 }
 0x658   : > { %4724 = vmatprep.mubr.bf16.mxu0 %v4562_v59 }
 0x659   : > { %4725 = vmatmul.mubr.bf16.vlgmr.msra.gmra.mrb[100].mxu0 %v4561_v60 }
 0x72c   : > { %v5308_v61 = vpop.f32.mrb[100].mxu0 }
 0x72d   : > { %v5309_v25 = vpop.f32.mrb[101].mxu0 }
 0x72e   : > { %v5310_v62 = vadd.f32 %v5309_v25, %v5308_v61  ;;  %v5311_v63 = vpop.f32.mrb[102].mxu0 }
 0x72f   : > { %v5312_v0 = vpop.f32.mrb[103].mxu0 }
 0x730   : > { %v4727_v2 = vadd.f32 %v5310_v62, %v4595_v24 }
 0x732   : > { %4732 = vst [vmem:[%s499_s16] sm:$0x1] %v4727_v2 }
 0x733   : > { %6108 = shalt.err (!%p6105_p6)
}
 0x734   : > { %s6109_s23 = scalar_lea.hbm %s6821_s22, 16  ;;  %s6113_s21 = scalar_lea.hbm %s6918_s7, 32 }
 0x735   : > { %p6110_p7 = scmp.ne.s32.totalorder %s6821_s22, %s6109_s23  ;;  %p6114_p4 = scmp.lt.u32.totalorder %s6821_s22, %s6918_s7 }
 0x736   : > { %p6115_p8 = scmp.lt.u32.totalorder %s6113_s21, %s6109_s23  ;;  %p6117_p13 = scmp.lt.u32.totalorder %s6109_s23, %s6821_s22 }
 0x737   : > { %p6111_p9 = pnand %p6110_p7, %p6919_p10 }
 0x738   : > { %p6116_p1 = por %p6115_p8, %p6114_p4 }
 0x739   : > { %p6112_p12 = pneg %p6111_p9 }
 0x73a   : > { %p6118_p11 = por %p6117_p13, %p6116_p1 }
 0x73c   : > { %p6119_p0 = pnand %p6118_p11, %p6112_p12 }
 0x73e   : > { %6122 = shalt.err (!%p6119_p0)
}
 0x73f   : > { %5400 = dma.vmem_to_hbm [thread:$0]  (%p6919_p10), %s6823_s13, 16, %s6821_s22, %s4734_s19  }
 0x740 PF: > { %s6920_s25 = sld [smem:[#allocation16_spill]]  ;;  %s6921_s16 = sld [smem:[#allocation13_spill]] }
 0x741   : > { %s6922_s18 = sld [smem:[#allocation19_spill]] }
 0x746   : > { %p5422_p2 = scmp.ge.s32.totalorder %s6920_s25, 2  ;;  %s4758_s12 = sand.u32 1, %s6921_s16  }
 0x747   : > { %p6923_p3 = scmp.ne.s32.totalorder %s6922_s18, 0  ;;  %s4759_s24 = scalar_lea.sflag [#allocation5], %s4758_s12 }
 0x749   : > { %p5413_p5 = pnand %p5422_p2, %p6923_p3 }
 0x74b   : > { %6156 = dma.done.wait (!%p5413_p5), %s4759_s24, 16  }
 0x74c   : > { %6158 = vsyncadd (!%p5413_p5), %s4759_s24, 4294967280  ;;  %s28_s30 = sadd.s32 1, %s6920_s25   ;;  %s6924_s28 = sld [smem:[#allocation14_spill]] }
 0x74d   : > { %p25_p6 = scmp.ge.s32.totalorder %s28_s30, 4   ;;  %s6925_s27 = sld [smem:[#allocation20_spill]] }
 0x74e   : > { %s6926_s29 = sld [smem:[#allocation15_spill]]  ;;  %s6927_s15 = sld [smem:[#allocation17_spill]] }
 0x74f   : > { %s6928_s25 = smov %s6165_s26  ;;  %27 = sbr.rel (!%p25_p6) target bundleno = 10 (0xa), region = 128 }
 0x752   : > { %s6929_s26 = smov %s6924_s28 }
 0x754   : > { %s6930_s28 = smov %s6926_s29  ;;  %s6931_s29 = smov %s6927_s15 }
 0x756   :  { %4763 = vsyncpa [#allocation4], 1 }
 0x757   :  { %4765 = vsyncpa [#allocation4 + $0x1], 1 }
 0x758   :  { %4766 = vsyncpa [#allocation7], 1 }
 0x759   :  { %4767 = vsyncpa [#allocation5], 1 }
 0x75a   :  { %4769 = vsyncpa [#allocation5 + $0x1], 1 }

</bundles_post_ra>
